<compile_context>
chip_gen: v7x
topology: tpu7x:2x2x1
jax: 0.10.0
libtpu: 0.0.40
codegen_flags: <defaults>
</compile_context>

<pallas_src>
import functools

import jax
import jax.numpy as jnp
from jax.experimental import pallas as pl
from jax.experimental.pallas import tpu as pltpu

EMBED_DIM = 128
NUM_HEADS = 4
HEAD_SIZE = EMBED_DIM // NUM_HEADS
LN_EPS = 1e-5
DROPOUT = 0.2  # eval-mode dropout == identity


def block_kernel(x_ref, ln1w_ref, ln1b_ref, wqkv_ref, wo_ref, bo_ref,
                 ln2w_ref, ln2b_ref, w1_ref, b1_ref, w2_ref, b2_ref, o_ref,
                 *, matmul_dtype):
    Bb, T, C = x_ref.shape
    nh = NUM_HEADS
    hs = C // nh

    def mm(a, b):
        # MXU matmul; optionally bf16 inputs with f32 accumulation (v6e/v7x).
        return jnp.dot(a.astype(matmul_dtype), b.astype(matmul_dtype),
                       preferred_element_type=jnp.float32)

    x = x_ref[...]                       # (Bb, T, C)
    x2d = x.reshape(Bb * T, C)           # M = Bb*T feeds the MXU properly

    # ---------------- LayerNorm 1 ----------------
    mu = jnp.mean(x2d, axis=-1, keepdims=True)
    xc = x2d - mu
    var = jnp.mean(xc * xc, axis=-1, keepdims=True)
    h = xc * jax.lax.rsqrt(var + LN_EPS) * ln1w_ref[...] + ln1b_ref[...]

    # -------- fused QKV projection: one (Bb*T, C) x (C, 3C) matmul --------
    qkv = mm(h, wqkv_ref[...])           # (Bb*T, 3C)

    scale = C ** (-0.5)  # PyTorch module scales by C**-0.5 (embed dim, not head_size)
    q3 = (qkv[:, 0 * C:1 * C] * scale).reshape(Bb, T, C)   # scale folded into q
    k3 = qkv[:, 1 * C:2 * C].reshape(Bb, T, C)
    v3 = qkv[:, 2 * C:3 * C].reshape(Bb, T, C)

    # causal mask: grid- and head-invariant, built once per step
    row = jax.lax.broadcasted_iota(jnp.int32, (T, T), 0)
    col = jax.lax.broadcasted_iota(jnp.int32, (T, T), 1)
    causal = (col <= row)[None, :, :]                       # (1, T, T)
    neg = jnp.float32(-1e30)  # finite: safe even if a row were fully masked

    head_outs = []
    for hd in range(nh):                 # static unroll over the 4 heads
        lo, hi = hd * hs, (hd + 1) * hs
        qh = q3[:, :, lo:hi]             # (Bb, T, hs)
        kh = k3[:, :, lo:hi]
        vh = v3[:, :, lo:hi]
        # contract on the last dim of both operands -> no explicit k transpose
        s = jnp.einsum('bqd,bkd->bqk', qh, kh,
                       preferred_element_type=jnp.float32)
        s = jnp.where(causal, s, neg)
        m = jnp.max(s, axis=-1, keepdims=True)
        e = jnp.exp(s - m)
        w = e * pl.reciprocal(jnp.sum(e, axis=-1, keepdims=True), approx=True)
        head_outs.append(
            jnp.einsum('bqk,bkd->bqd', w, vh,
                       preferred_element_type=jnp.float32))

    # concat of all heads -> lane-dense (Bb*T, 128) slab for the projection
    attn = jnp.concatenate(head_outs, axis=-1).reshape(Bb * T, C)

    # TODO(synk): training-mode dropout (attn probs / proj / FFN outputs) not
    #             reproduced bit-exactly vs torch RNG; eval mode is the identity.

    # ---------------- output projection + residual ----------------
    y = x2d + mm(attn, wo_ref[...]) + bo_ref[...]

    # ---------------- LayerNorm 2 ----------------
    mu2 = jnp.mean(y, axis=-1, keepdims=True)
    yc = y - mu2
    var2 = jnp.mean(yc * yc, axis=-1, keepdims=True)
    h2 = yc * jax.lax.rsqrt(var2 + LN_EPS) * ln2w_ref[...] + ln2b_ref[...]

    # ---------------- FeedForward + residual ----------------
    f = mm(h2, w1_ref[...]) + b1_ref[...]
    f = jnp.maximum(f, 0.0)
    f = mm(f, w2_ref[...]) + b2_ref[...]

    o_ref[...] = (y + f).reshape(Bb, T, C).astype(o_ref.dtype)


def block_forward(x, params, *, batch_block=8, matmul_dtype=jnp.float32):
    """x: (B, T, C) f32; params: dict of (already-transposed) weights -> (B, T, C).

    Set matmul_dtype=jnp.bfloat16 on v6e/v7x for ~2-4x MXU throughput
    (relax the validation tolerance accordingly).
    """
    B, T, C = x.shape
    if B % batch_block != 0:
        batch_block = B
    Bb = batch_block

    def full2d(shape):
        return pl.BlockSpec(shape, lambda i: (0, 0))

    kernel = functools.partial(block_kernel, matmul_dtype=matmul_dtype)

    return pl.pallas_call(
        kernel,
        out_shape=jax.ShapeDtypeStruct((B, T, C), x.dtype),
        grid_spec=pltpu.PrefetchScalarGridSpec(
            num_scalar_prefetch=0,
            grid=(B // Bb,),
            in_specs=[
                pl.BlockSpec((Bb, T, C), lambda i: (i, 0, 0)),  # x (batch-blocked)
                full2d((1, C)),            # ln1 gamma
                full2d((1, C)),            # ln1 beta
                full2d((C, 3 * C)),        # fused [Wq | Wk | Wv]
                full2d((C, C)),            # Wo (multi-head output projection)
                full2d((1, C)),            # bo
                full2d((1, C)),            # ln2 gamma
                full2d((1, C)),            # ln2 beta
                full2d((C, 4 * C)),        # FFN W1
                full2d((1, 4 * C)),        # FFN b1
                full2d((4 * C, C)),        # FFN W2
                full2d((1, C)),            # FFN b2
            ],
            out_specs=pl.BlockSpec((Bb, T, C), lambda i: (i, 0, 0)),
        ),
        compiler_params=pltpu.CompilerParams(
            dimension_semantics=("parallel",),
        ),
    )(x, params['ln1_w'], params['ln1_b'], params['wqkv'], params['wo'],
      params['bo'], params['ln2_w'], params['ln2_b'], params['w1'],
      params['b1'], params['w2'], params['b2'])


# --------------------------- pure-JAX reference ---------------------------

def _layer_norm_ref(z, g, b, eps=LN_EPS):
    mu = jnp.mean(z, axis=-1, keepdims=True)
    var = jnp.mean((z - mu) ** 2, axis=-1, keepdims=True)
    return (z - mu) / jnp.sqrt(var + eps) * g + b


def block_reference(x, params):
    """Mirrors the PyTorch Block.forward in eval mode (dropout = identity)."""
    B, T, C = x.shape
    nh, hs = NUM_HEADS, C // NUM_HEADS

    h = _layer_norm_ref(x, params['ln1_w'], params['ln1_b'])
    qkv = h @ params['wqkv']                               # (B, T, 3C)
    q, k, v = qkv[..., :C], qkv[..., C:2 * C], qkv[..., 2 * C:]

    mask = jnp.tril(jnp.ones((T, T), dtype=bool))
    outs = []
    for hd in range(nh):
        lo, hi = hd * hs, (hd + 1) * hs
        qh, kh, vh = q[..., lo:hi], k[..., lo:hi], v[..., lo:hi]
        s = (qh @ jnp.swapaxes(kh, -1, -2)) * (C ** -0.5)
        s = jnp.where(mask[None], s, -jnp.inf)
        w = jax.nn.softmax(s, axis=-1)
        outs.append(w @ vh)
    attn = jnp.concatenate(outs, axis=-1)                  # (B, T, C)

    y = x + attn @ params['wo'] + params['bo']
    h2 = _layer_norm_ref(y, params['ln2_w'], params['ln2_b'])
    f = jnp.maximum(h2 @ params['w1'] + params['b1'], 0.0)
    f = f @ params['w2'] + params['b2']
    return y + f


def init_params(key, C=EMBED_DIM):
    ks = jax.random.split(key, 11)

    def lin(k, fan_in, shape):
        b = 1.0 / (fan_in ** 0.5)
        return jax.random.uniform(k, shape, jnp.float32, -b, b)

    return {
        'ln1_w': 1.0 + 0.1 * jax.random.normal(ks[0], (1, C), jnp.float32),
        'ln1_b': 0.1 * jax.random.normal(ks[1], (1, C), jnp.float32),
        # fused [Wq | Wk | Wv]; each (C, C) block is the per-head weights
        # concatenated along columns (head 0 first), matching torch.cat order.
        'wqkv': lin(ks[2], C, (C, 3 * C)),
        'wo':   lin(ks[3], C, (C, C)),
        'bo':   lin(ks[4], C, (1, C)),
        'ln2_w': 1.0 + 0.1 * jax.random.normal(ks[5], (1, C), jnp.float32),
        'ln2_b': 0.1 * jax.random.normal(ks[6], (1, C), jnp.float32),
        'w1':   lin(ks[7], C, (C, 4 * C)),
        'b1':   lin(ks[8], C, (1, 4 * C)),
        'w2':   lin(ks[9], 4 * C, (4 * C, C)),
        'b2':   lin(ks[10], 4 * C, (1, C)),
    }


if __name__ == "__main__":
    B, T, C = 16, 16, EMBED_DIM   # Bb=8 -> grid of 2 steps, M = Bb*T = 128

    key = jax.random.PRNGKey(0)
    kx, kp = jax.random.split(key)
    x = jax.random.normal(kx, (B, T, C), dtype=jnp.float32)
    params = init_params(kp)

    out = block_forward(x, params, batch_block=8)
    out = jax.block_until_ready(out)

    ref = block_reference(x, params)
    assert out.shape == (B, T, C)
    # tolerance absorbs the EUP approx-reciprocal used in the softmax denominator
    assert jnp.allclose(out, ref, atol=2e-3, rtol=2e-3), (
        "mismatch vs reference: max abs err = "
        f"{float(jnp.max(jnp.abs(out - ref)))}")

    print("KERNEL_OK")
</pallas_src>

<mosaic_0001>
module attributes {stable_mosaic.version = 11 : i64} {
  func.func @block_kernel(%arg0: i32, %arg1: memref<8x16x128xf32, #tpu.memory_space<vmem>>, %arg2: memref<1x128xf32, #tpu.memory_space<vmem>>, %arg3: memref<1x128xf32, #tpu.memory_space<vmem>>, %arg4: memref<128x384xf32, #tpu.memory_space<vmem>>, %arg5: memref<128x128xf32, #tpu.memory_space<vmem>>, %arg6: memref<1x128xf32, #tpu.memory_space<vmem>>, %arg7: memref<1x128xf32, #tpu.memory_space<vmem>>, %arg8: memref<1x128xf32, #tpu.memory_space<vmem>>, %arg9: memref<128x512xf32, #tpu.memory_space<vmem>>, %arg10: memref<1x512xf32, #tpu.memory_space<vmem>>, %arg11: memref<512x128xf32, #tpu.memory_space<vmem>>, %arg12: memref<1x128xf32, #tpu.memory_space<vmem>>, %arg13: memref<8x16x128xf32, #tpu.memory_space<vmem>>) attributes {dimension_semantics = [#tpu.dimension_semantics<parallel>], iteration_bounds = array<i64: 2>, scalar_prefetch = 0 : i64, scratch_operands = 0 : i64, tpu.core_type = #tpu.core_type<tc>, window_params = [{transform_indices = @transform_0, window_bounds = array<i64: 8, 16, 128>}, {pipeline_mode = #tpu.pipeline_mode<synchronous>, transform_indices = @transform_1, window_bounds = array<i64: 1, 128>}, {pipeline_mode = #tpu.pipeline_mode<synchronous>, transform_indices = @transform_2, window_bounds = array<i64: 1, 128>}, {pipeline_mode = #tpu.pipeline_mode<synchronous>, transform_indices = @transform_3, window_bounds = array<i64: 128, 384>}, {pipeline_mode = #tpu.pipeline_mode<synchronous>, transform_indices = @transform_4, window_bounds = array<i64: 128, 128>}, {pipeline_mode = #tpu.pipeline_mode<synchronous>, transform_indices = @transform_5, window_bounds = array<i64: 1, 128>}, {pipeline_mode = #tpu.pipeline_mode<synchronous>, transform_indices = @transform_6, window_bounds = array<i64: 1, 128>}, {pipeline_mode = #tpu.pipeline_mode<synchronous>, transform_indices = @transform_7, window_bounds = array<i64: 1, 128>}, {pipeline_mode = #tpu.pipeline_mode<synchronous>, transform_indices = @transform_8, window_bounds = array<i64: 128, 512>}, {pipeline_mode = #tpu.pipeline_mode<synchronous>, transform_indices = @transform_9, window_bounds = array<i64: 1, 512>}, {pipeline_mode = #tpu.pipeline_mode<synchronous>, transform_indices = @transform_10, window_bounds = array<i64: 512, 128>}, {pipeline_mode = #tpu.pipeline_mode<synchronous>, transform_indices = @transform_11, window_bounds = array<i64: 1, 128>}, {transform_indices = @transform_12, window_bounds = array<i64: 8, 16, 128>}]} {
    %c0 = arith.constant 0 : index
    %c0_0 = arith.constant 0 : index
    %c0_1 = arith.constant 0 : index
    %0 = vector.load %arg1[%c0, %c0_0, %c0_1] : memref<8x16x128xf32, #tpu.memory_space<vmem>>, vector<8x16x128xf32>
    %1 = vector.shape_cast %0 : vector<8x16x128xf32> to vector<128x128xf32>
    %cst = arith.constant dense<0.000000e+00> : vector<128xf32>
    %2 = vector.multi_reduction <add>, %1, %cst [1] : vector<128x128xf32> to vector<128xf32>
    %3 = vector.shape_cast %2 : vector<128xf32> to vector<128x1xf32>
    %cst_2 = arith.constant 1.280000e+02 : f32
    %4 = vector.broadcast %cst_2 : f32 to vector<128x1xf32>
    %5 = arith.divf %3, %4 : vector<128x1xf32>
    %6 = vector.broadcast %5 : vector<128x1xf32> to vector<128x128xf32>
    %7 = arith.subf %1, %6 : vector<128x128xf32>
    %8 = arith.mulf %7, %7 : vector<128x128xf32>
    %cst_3 = arith.constant dense<0.000000e+00> : vector<128xf32>
    %9 = vector.multi_reduction <add>, %8, %cst_3 [1] : vector<128x128xf32> to vector<128xf32>
    %10 = vector.shape_cast %9 : vector<128xf32> to vector<128x1xf32>
    %cst_4 = arith.constant 1.280000e+02 : f32
    %11 = vector.broadcast %cst_4 : f32 to vector<128x1xf32>
    %12 = arith.divf %10, %11 : vector<128x1xf32>
    %cst_5 = arith.constant 9.99999974E-6 : f32
    %13 = vector.broadcast %cst_5 : f32 to vector<128x1xf32>
    %14 = arith.addf %12, %13 : vector<128x1xf32>
    %15 = math.rsqrt %14 : vector<128x1xf32>
    %16 = vector.broadcast %15 : vector<128x1xf32> to vector<128x128xf32>
    %17 = arith.mulf %7, %16 : vector<128x128xf32>
    %c0_6 = arith.constant 0 : index
    %c0_7 = arith.constant 0 : index
    %18 = vector.load %arg2[%c0_6, %c0_7] : memref<1x128xf32, #tpu.memory_space<vmem>>, vector<1x128xf32>
    %19 = vector.broadcast %18 : vector<1x128xf32> to vector<128x128xf32>
    %20 = arith.mulf %17, %19 : vector<128x128xf32>
    %c0_8 = arith.constant 0 : index
    %c0_9 = arith.constant 0 : index
    %21 = vector.load %arg3[%c0_8, %c0_9] : memref<1x128xf32, #tpu.memory_space<vmem>>, vector<1x128xf32>
    %22 = vector.broadcast %21 : vector<1x128xf32> to vector<128x128xf32>
    %23 = arith.addf %20, %22 : vector<128x128xf32>
    %c0_10 = arith.constant 0 : index
    %c0_11 = arith.constant 0 : index
    %24 = vector.load %arg4[%c0_10, %c0_11] : memref<128x384xf32, #tpu.memory_space<vmem>>, vector<128x384xf32>
    %cst_12 = arith.constant dense<0.000000e+00> : vector<128x384xf32>
    %25 = tpu.matmul %23, %24, %cst_12 {dimension_numbers = #tpu.dot_dimension_numbers<[1], [0], [0], [1], [0, 0, 1, 1], [], []>} : vector<128x128xf32>, vector<128x384xf32>, vector<128x384xf32> -> vector<128x384xf32>
    %26 = vector.extract_strided_slice %25 {offsets = [0, 0], sizes = [128, 128], strides = [1, 1]} : vector<128x384xf32> to vector<128x128xf32>
    %cst_13 = arith.constant 0.0883883461 : f32
    %27 = vector.broadcast %cst_13 : f32 to vector<128x128xf32>
    %28 = arith.mulf %26, %27 : vector<128x128xf32>
    %29 = vector.shape_cast %28 : vector<128x128xf32> to vector<8x16x128xf32>
    %30 = vector.extract_strided_slice %25 {offsets = [0, 128], sizes = [128, 128], strides = [1, 1]} : vector<128x384xf32> to vector<128x128xf32>
    %31 = vector.shape_cast %30 : vector<128x128xf32> to vector<8x16x128xf32>
    %32 = vector.extract_strided_slice %25 {offsets = [0, 256], sizes = [128, 128], strides = [1, 1]} : vector<128x384xf32> to vector<128x128xf32>
    %33 = vector.shape_cast %32 : vector<128x128xf32> to vector<8x16x128xf32>
    %34 = tpu.iota {dimensions = array<i32: 0>} : vector<16x16xi32>
    %35 = tpu.iota {dimensions = array<i32: 1>} : vector<16x16xi32>
    %36 = arith.cmpi sle, %35, %34 : vector<16x16xi32>
    %37 = vector.shape_cast %36 : vector<16x16xi1> to vector<1x16x16xi1>
    %38 = vector.extract_strided_slice %29 {offsets = [0, 0, 0], sizes = [8, 16, 32], strides = [1, 1, 1]} : vector<8x16x128xf32> to vector<8x16x32xf32>
    %39 = vector.extract_strided_slice %31 {offsets = [0, 0, 0], sizes = [8, 16, 32], strides = [1, 1, 1]} : vector<8x16x128xf32> to vector<8x16x32xf32>
    %40 = vector.extract_strided_slice %33 {offsets = [0, 0, 0], sizes = [8, 16, 32], strides = [1, 1, 1]} : vector<8x16x128xf32> to vector<8x16x32xf32>
    "tpu.trace_start"() <{level = 10 : i32, message = "bqd,bkd->bqk"}> : () -> ()
    %cst_14 = arith.constant dense<0.000000e+00> : vector<8x16x16xf32>
    %41 = tpu.matmul %38, %39, %cst_14 {dimension_numbers = #tpu.dot_dimension_numbers<[2], [2], [1], [1], [0, 0, 0, 1, 1, 1], [0], [0]>} : vector<8x16x32xf32>, vector<8x16x32xf32>, vector<8x16x16xf32> -> vector<8x16x16xf32>
    %cst_15 = arith.constant -1.000000e+30 : f32
    "tpu.trace_stop"() : () -> ()
    %42 = vector.shape_cast %37 : vector<1x16x16xi1> to vector<1x16x16xi1>
    %43 = vector.broadcast %42 : vector<1x16x16xi1> to vector<8x16x16xi1>
    %44 = vector.broadcast %cst_15 : f32 to vector<8x16x16xf32>
    %45 = arith.select %43, %41, %44 : vector<8x16x16xi1>, vector<8x16x16xf32>
    %cst_16 = arith.constant dense<0xFF800000> : vector<8x16xf32>
    %46 = vector.multi_reduction <maximumf>, %45, %cst_16 [2] : vector<8x16x16xf32> to vector<8x16xf32>
    %47 = vector.shape_cast %46 : vector<8x16xf32> to vector<8x16x1xf32>
    %48 = vector.broadcast %47 : vector<8x16x1xf32> to vector<8x16x16xf32>
    %49 = arith.subf %45, %48 : vector<8x16x16xf32>
    %50 = math.exp %49 : vector<8x16x16xf32>
    %cst_17 = arith.constant dense<0.000000e+00> : vector<8x16xf32>
    %51 = vector.multi_reduction <add>, %50, %cst_17 [2] : vector<8x16x16xf32> to vector<8x16xf32>
    %52 = vector.shape_cast %51 : vector<8x16xf32> to vector<8x16x1xf32>
    %53 = tpu.reciprocal %52 {approx = true} : vector<8x16x1xf32> -> vector<8x16x1xf32>
    %54 = vector.broadcast %53 : vector<8x16x1xf32> to vector<8x16x16xf32>
    %55 = arith.mulf %50, %54 : vector<8x16x16xf32>
    "tpu.trace_start"() <{level = 10 : i32, message = "bqk,bkd->bqd"}> : () -> ()
    %cst_18 = arith.constant dense<0.000000e+00> : vector<8x16x32xf32>
    %56 = tpu.matmul %55, %40, %cst_18 {dimension_numbers = #tpu.dot_dimension_numbers<[2], [1], [1], [2], [0, 0, 0, 1, 1, 2], [0], [0]>} : vector<8x16x16xf32>, vector<8x16x32xf32>, vector<8x16x32xf32> -> vector<8x16x32xf32>
    "tpu.trace_stop"() : () -> ()
    %57 = vector.extract_strided_slice %29 {offsets = [0, 0, 32], sizes = [8, 16, 32], strides = [1, 1, 1]} : vector<8x16x128xf32> to vector<8x16x32xf32>
    %58 = vector.extract_strided_slice %31 {offsets = [0, 0, 32], sizes = [8, 16, 32], strides = [1, 1, 1]} : vector<8x16x128xf32> to vector<8x16x32xf32>
    %59 = vector.extract_strided_slice %33 {offsets = [0, 0, 32], sizes = [8, 16, 32], strides = [1, 1, 1]} : vector<8x16x128xf32> to vector<8x16x32xf32>
    "tpu.trace_start"() <{level = 10 : i32, message = "bqd,bkd->bqk"}> : () -> ()
    %cst_19 = arith.constant dense<0.000000e+00> : vector<8x16x16xf32>
    %60 = tpu.matmul %57, %58, %cst_19 {dimension_numbers = #tpu.dot_dimension_numbers<[2], [2], [1], [1], [0, 0, 0, 1, 1, 1], [0], [0]>} : vector<8x16x32xf32>, vector<8x16x32xf32>, vector<8x16x16xf32> -> vector<8x16x16xf32>
    %cst_20 = arith.constant -1.000000e+30 : f32
    "tpu.trace_stop"() : () -> ()
    %61 = vector.shape_cast %37 : vector<1x16x16xi1> to vector<1x16x16xi1>
    %62 = vector.broadcast %61 : vector<1x16x16xi1> to vector<8x16x16xi1>
    %63 = vector.broadcast %cst_20 : f32 to vector<8x16x16xf32>
    %64 = arith.select %62, %60, %63 : vector<8x16x16xi1>, vector<8x16x16xf32>
    %cst_21 = arith.constant dense<0xFF800000> : vector<8x16xf32>
    %65 = vector.multi_reduction <maximumf>, %64, %cst_21 [2] : vector<8x16x16xf32> to vector<8x16xf32>
    %66 = vector.shape_cast %65 : vector<8x16xf32> to vector<8x16x1xf32>
    %67 = vector.broadcast %66 : vector<8x16x1xf32> to vector<8x16x16xf32>
    %68 = arith.subf %64, %67 : vector<8x16x16xf32>
    %69 = math.exp %68 : vector<8x16x16xf32>
    %cst_22 = arith.constant dense<0.000000e+00> : vector<8x16xf32>
    %70 = vector.multi_reduction <add>, %69, %cst_22 [2] : vector<8x16x16xf32> to vector<8x16xf32>
    %71 = vector.shape_cast %70 : vector<8x16xf32> to vector<8x16x1xf32>
    %72 = tpu.reciprocal %71 {approx = true} : vector<8x16x1xf32> -> vector<8x16x1xf32>
    %73 = vector.broadcast %72 : vector<8x16x1xf32> to vector<8x16x16xf32>
    %74 = arith.mulf %69, %73 : vector<8x16x16xf32>
    "tpu.trace_start"() <{level = 10 : i32, message = "bqk,bkd->bqd"}> : () -> ()
    %cst_23 = arith.constant dense<0.000000e+00> : vector<8x16x32xf32>
    %75 = tpu.matmul %74, %59, %cst_23 {dimension_numbers = #tpu.dot_dimension_numbers<[2], [1], [1], [2], [0, 0, 0, 1, 1, 2], [0], [0]>} : vector<8x16x16xf32>, vector<8x16x32xf32>, vector<8x16x32xf32> -> vector<8x16x32xf32>
    "tpu.trace_stop"() : () -> ()
    %76 = vector.extract_strided_slice %29 {offsets = [0, 0, 64], sizes = [8, 16, 32], strides = [1, 1, 1]} : vector<8x16x128xf32> to vector<8x16x32xf32>
    %77 = vector.extract_strided_slice %31 {offsets = [0, 0, 64], sizes = [8, 16, 32], strides = [1, 1, 1]} : vector<8x16x128xf32> to vector<8x16x32xf32>
    %78 = vector.extract_strided_slice %33 {offsets = [0, 0, 64], sizes = [8, 16, 32], strides = [1, 1, 1]} : vector<8x16x128xf32> to vector<8x16x32xf32>
    "tpu.trace_start"() <{level = 10 : i32, message = "bqd,bkd->bqk"}> : () -> ()
    %cst_24 = arith.constant dense<0.000000e+00> : vector<8x16x16xf32>
    %79 = tpu.matmul %76, %77, %cst_24 {dimension_numbers = #tpu.dot_dimension_numbers<[2], [2], [1], [1], [0, 0, 0, 1, 1, 1], [0], [0]>} : vector<8x16x32xf32>, vector<8x16x32xf32>, vector<8x16x16xf32> -> vector<8x16x16xf32>
    %cst_25 = arith.constant -1.000000e+30 : f32
    "tpu.trace_stop"() : () -> ()
    %80 = vector.shape_cast %37 : vector<1x16x16xi1> to vector<1x16x16xi1>
    %81 = vector.broadcast %80 : vector<1x16x16xi1> to vector<8x16x16xi1>
    %82 = vector.broadcast %cst_25 : f32 to vector<8x16x16xf32>
    %83 = arith.select %81, %79, %82 : vector<8x16x16xi1>, vector<8x16x16xf32>
    %cst_26 = arith.constant dense<0xFF800000> : vector<8x16xf32>
    %84 = vector.multi_reduction <maximumf>, %83, %cst_26 [2] : vector<8x16x16xf32> to vector<8x16xf32>
    %85 = vector.shape_cast %84 : vector<8x16xf32> to vector<8x16x1xf32>
    %86 = vector.broadcast %85 : vector<8x16x1xf32> to vector<8x16x16xf32>
    %87 = arith.subf %83, %86 : vector<8x16x16xf32>
    %88 = math.exp %87 : vector<8x16x16xf32>
    %cst_27 = arith.constant dense<0.000000e+00> : vector<8x16xf32>
    %89 = vector.multi_reduction <add>, %88, %cst_27 [2] : vector<8x16x16xf32> to vector<8x16xf32>
    %90 = vector.shape_cast %89 : vector<8x16xf32> to vector<8x16x1xf32>
    %91 = tpu.reciprocal %90 {approx = true} : vector<8x16x1xf32> -> vector<8x16x1xf32>
    %92 = vector.broadcast %91 : vector<8x16x1xf32> to vector<8x16x16xf32>
    %93 = arith.mulf %88, %92 : vector<8x16x16xf32>
    "tpu.trace_start"() <{level = 10 : i32, message = "bqk,bkd->bqd"}> : () -> ()
    %cst_28 = arith.constant dense<0.000000e+00> : vector<8x16x32xf32>
    %94 = tpu.matmul %93, %78, %cst_28 {dimension_numbers = #tpu.dot_dimension_numbers<[2], [1], [1], [2], [0, 0, 0, 1, 1, 2], [0], [0]>} : vector<8x16x16xf32>, vector<8x16x32xf32>, vector<8x16x32xf32> -> vector<8x16x32xf32>
    "tpu.trace_stop"() : () -> ()
    %95 = vector.extract_strided_slice %29 {offsets = [0, 0, 96], sizes = [8, 16, 32], strides = [1, 1, 1]} : vector<8x16x128xf32> to vector<8x16x32xf32>
    %96 = vector.extract_strided_slice %31 {offsets = [0, 0, 96], sizes = [8, 16, 32], strides = [1, 1, 1]} : vector<8x16x128xf32> to vector<8x16x32xf32>
    %97 = vector.extract_strided_slice %33 {offsets = [0, 0, 96], sizes = [8, 16, 32], strides = [1, 1, 1]} : vector<8x16x128xf32> to vector<8x16x32xf32>
    "tpu.trace_start"() <{level = 10 : i32, message = "bqd,bkd->bqk"}> : () -> ()
    %cst_29 = arith.constant dense<0.000000e+00> : vector<8x16x16xf32>
    %98 = tpu.matmul %95, %96, %cst_29 {dimension_numbers = #tpu.dot_dimension_numbers<[2], [2], [1], [1], [0, 0, 0, 1, 1, 1], [0], [0]>} : vector<8x16x32xf32>, vector<8x16x32xf32>, vector<8x16x16xf32> -> vector<8x16x16xf32>
    %cst_30 = arith.constant -1.000000e+30 : f32
    "tpu.trace_stop"() : () -> ()
    %99 = vector.shape_cast %37 : vector<1x16x16xi1> to vector<1x16x16xi1>
    %100 = vector.broadcast %99 : vector<1x16x16xi1> to vector<8x16x16xi1>
    %101 = vector.broadcast %cst_30 : f32 to vector<8x16x16xf32>
    %102 = arith.select %100, %98, %101 : vector<8x16x16xi1>, vector<8x16x16xf32>
    %cst_31 = arith.constant dense<0xFF800000> : vector<8x16xf32>
    %103 = vector.multi_reduction <maximumf>, %102, %cst_31 [2] : vector<8x16x16xf32> to vector<8x16xf32>
    %104 = vector.shape_cast %103 : vector<8x16xf32> to vector<8x16x1xf32>
    %105 = vector.broadcast %104 : vector<8x16x1xf32> to vector<8x16x16xf32>
    %106 = arith.subf %102, %105 : vector<8x16x16xf32>
    %107 = math.exp %106 : vector<8x16x16xf32>
    %cst_32 = arith.constant dense<0.000000e+00> : vector<8x16xf32>
    %108 = vector.multi_reduction <add>, %107, %cst_32 [2] : vector<8x16x16xf32> to vector<8x16xf32>
    %109 = vector.shape_cast %108 : vector<8x16xf32> to vector<8x16x1xf32>
    %110 = tpu.reciprocal %109 {approx = true} : vector<8x16x1xf32> -> vector<8x16x1xf32>
    %111 = vector.broadcast %110 : vector<8x16x1xf32> to vector<8x16x16xf32>
    %112 = arith.mulf %107, %111 : vector<8x16x16xf32>
    "tpu.trace_start"() <{level = 10 : i32, message = "bqk,bkd->bqd"}> : () -> ()
    %cst_33 = arith.constant dense<0.000000e+00> : vector<8x16x32xf32>
    %113 = tpu.matmul %112, %97, %cst_33 {dimension_numbers = #tpu.dot_dimension_numbers<[2], [1], [1], [2], [0, 0, 0, 1, 1, 2], [0], [0]>} : vector<8x16x16xf32>, vector<8x16x32xf32>, vector<8x16x32xf32> -> vector<8x16x32xf32>
    "tpu.trace_stop"() : () -> ()
    %114 = tpu.concatenate %56, %75, %94, %113 in 2 : vector<8x16x32xf32>, vector<8x16x32xf32>, vector<8x16x32xf32>, vector<8x16x32xf32> -> vector<8x16x128xf32>
    %115 = vector.shape_cast %114 : vector<8x16x128xf32> to vector<128x128xf32>
    %c0_34 = arith.constant 0 : index
    %c0_35 = arith.constant 0 : index
    %116 = vector.load %arg5[%c0_34, %c0_35] : memref<128x128xf32, #tpu.memory_space<vmem>>, vector<128x128xf32>
    %cst_36 = arith.constant dense<0.000000e+00> : vector<128x128xf32>
    %117 = tpu.matmul %115, %116, %cst_36 {dimension_numbers = #tpu.dot_dimension_numbers<[1], [0], [0], [1], [0, 0, 1, 1], [], []>} : vector<128x128xf32>, vector<128x128xf32>, vector<128x128xf32> -> vector<128x128xf32>
    %118 = arith.addf %1, %117 : vector<128x128xf32>
    %c0_37 = arith.constant 0 : index
    %c0_38 = arith.constant 0 : index
    %119 = vector.load %arg6[%c0_37, %c0_38] : memref<1x128xf32, #tpu.memory_space<vmem>>, vector<1x128xf32>
    %120 = vector.broadcast %119 : vector<1x128xf32> to vector<128x128xf32>
    %121 = arith.addf %118, %120 : vector<128x128xf32>
    %cst_39 = arith.constant dense<0.000000e+00> : vector<128xf32>
    %122 = vector.multi_reduction <add>, %121, %cst_39 [1] : vector<128x128xf32> to vector<128xf32>
    %123 = vector.shape_cast %122 : vector<128xf32> to vector<128x1xf32>
    %cst_40 = arith.constant 1.280000e+02 : f32
    %124 = vector.broadcast %cst_40 : f32 to vector<128x1xf32>
    %125 = arith.divf %123, %124 : vector<128x1xf32>
    %126 = vector.broadcast %125 : vector<128x1xf32> to vector<128x128xf32>
    %127 = arith.subf %121, %126 : vector<128x128xf32>
    %128 = arith.mulf %127, %127 : vector<128x128xf32>
    %cst_41 = arith.constant dense<0.000000e+00> : vector<128xf32>
    %129 = vector.multi_reduction <add>, %128, %cst_41 [1] : vector<128x128xf32> to vector<128xf32>
    %130 = vector.shape_cast %129 : vector<128xf32> to vector<128x1xf32>
    %cst_42 = arith.constant 1.280000e+02 : f32
    %131 = vector.broadcast %cst_42 : f32 to vector<128x1xf32>
    %132 = arith.divf %130, %131 : vector<128x1xf32>
    %cst_43 = arith.constant 9.99999974E-6 : f32
    %133 = vector.broadcast %cst_43 : f32 to vector<128x1xf32>
    %134 = arith.addf %132, %133 : vector<128x1xf32>
    %135 = math.rsqrt %134 : vector<128x1xf32>
    %136 = vector.broadcast %135 : vector<128x1xf32> to vector<128x128xf32>
    %137 = arith.mulf %127, %136 : vector<128x128xf32>
    %c0_44 = arith.constant 0 : index
    %c0_45 = arith.constant 0 : index
    %138 = vector.load %arg7[%c0_44, %c0_45] : memref<1x128xf32, #tpu.memory_space<vmem>>, vector<1x128xf32>
    %139 = vector.broadcast %138 : vector<1x128xf32> to vector<128x128xf32>
    %140 = arith.mulf %137, %139 : vector<128x128xf32>
    %c0_46 = arith.constant 0 : index
    %c0_47 = arith.constant 0 : index
    %141 = vector.load %arg8[%c0_46, %c0_47] : memref<1x128xf32, #tpu.memory_space<vmem>>, vector<1x128xf32>
    %142 = vector.broadcast %141 : vector<1x128xf32> to vector<128x128xf32>
    %143 = arith.addf %140, %142 : vector<128x128xf32>
    %c0_48 = arith.constant 0 : index
    %c0_49 = arith.constant 0 : index
    %144 = vector.load %arg9[%c0_48, %c0_49] : memref<128x512xf32, #tpu.memory_space<vmem>>, vector<128x512xf32>
    %cst_50 = arith.constant dense<0.000000e+00> : vector<128x512xf32>
    %145 = tpu.matmul %143, %144, %cst_50 {dimension_numbers = #tpu.dot_dimension_numbers<[1], [0], [0], [1], [0, 0, 1, 1], [], []>} : vector<128x128xf32>, vector<128x512xf32>, vector<128x512xf32> -> vector<128x512xf32>
    %c0_51 = arith.constant 0 : index
    %c0_52 = arith.constant 0 : index
    %146 = vector.load %arg10[%c0_51, %c0_52] : memref<1x512xf32, #tpu.memory_space<vmem>>, vector<1x512xf32>
    %147 = vector.broadcast %146 : vector<1x512xf32> to vector<128x512xf32>
    %148 = arith.addf %145, %147 : vector<128x512xf32>
    %cst_53 = arith.constant 0.000000e+00 : f32
    %149 = vector.broadcast %cst_53 : f32 to vector<128x512xf32>
    %150 = arith.maximumf %148, %149 : vector<128x512xf32>
    %c0_54 = arith.constant 0 : index
    %c0_55 = arith.constant 0 : index
    %151 = vector.load %arg11[%c0_54, %c0_55] : memref<512x128xf32, #tpu.memory_space<vmem>>, vector<512x128xf32>
    %cst_56 = arith.constant dense<0.000000e+00> : vector<128x128xf32>
    %152 = tpu.matmul %150, %151, %cst_56 {dimension_numbers = #tpu.dot_dimension_numbers<[1], [0], [0], [1], [0, 0, 1, 1], [], []>} : vector<128x512xf32>, vector<512x128xf32>, vector<128x128xf32> -> vector<128x128xf32>
    %c0_57 = arith.constant 0 : index
    %c0_58 = arith.constant 0 : index
    %153 = vector.load %arg12[%c0_57, %c0_58] : memref<1x128xf32, #tpu.memory_space<vmem>>, vector<1x128xf32>
    %154 = vector.broadcast %153 : vector<1x128xf32> to vector<128x128xf32>
    %155 = arith.addf %152, %154 : vector<128x128xf32>
    %156 = arith.addf %121, %155 : vector<128x128xf32>
    %157 = vector.shape_cast %156 : vector<128x128xf32> to vector<8x16x128xf32>
    %c0_59 = arith.constant 0 : index
    %c0_60 = arith.constant 0 : index
    %c0_61 = arith.constant 0 : index
    %158 = vector.load %arg13[%c0_59, %c0_60, %c0_61] : memref<8x16x128xf32, #tpu.memory_space<vmem>>, vector<8x16x128xf32>
    tpu.vector_store %arg13[%c0_59, %c0_60, %c0_61], %157 {strides = array<i32>} : memref<8x16x128xf32, #tpu.memory_space<vmem>>, vector<8x16x128xf32>,
    return
  }
  func.func @transform_0(%arg0: i32) -> (i32, i32, i32) {
    %c0_i32 = arith.constant 0 : i32
    %c0_i32_0 = arith.constant 0 : i32
    %c0_i32_1 = arith.constant 0 : i32
    return %arg0, %c0_i32, %c0_i32_0 : i32, i32, i32
  }
  func.func @transform_1(%arg0: i32) -> (i32, i32) {
    %c0_i32 = arith.constant 0 : i32
    %c0_i32_0 = arith.constant 0 : i32
    %c0_i32_1 = arith.constant 0 : i32
    return %c0_i32, %c0_i32_0 : i32, i32
  }
  func.func @transform_2(%arg0: i32) -> (i32, i32) {
    %c0_i32 = arith.constant 0 : i32
    %c0_i32_0 = arith.constant 0 : i32
    %c0_i32_1 = arith.constant 0 : i32
    return %c0_i32, %c0_i32_0 : i32, i32
  }
  func.func @transform_3(%arg0: i32) -> (i32, i32) {
    %c0_i32 = arith.constant 0 : i32
    %c0_i32_0 = arith.constant 0 : i32
    %c0_i32_1 = arith.constant 0 : i32
    return %c0_i32, %c0_i32_0 : i32, i32
  }
  func.func @transform_4(%arg0: i32) -> (i32, i32) {
    %c0_i32 = arith.constant 0 : i32
    %c0_i32_0 = arith.constant 0 : i32
    %c0_i32_1 = arith.constant 0 : i32
    return %c0_i32, %c0_i32_0 : i32, i32
  }
  func.func @transform_5(%arg0: i32) -> (i32, i32) {
    %c0_i32 = arith.constant 0 : i32
    %c0_i32_0 = arith.constant 0 : i32
    %c0_i32_1 = arith.constant 0 : i32
    return %c0_i32, %c0_i32_0 : i32, i32
  }
  func.func @transform_6(%arg0: i32) -> (i32, i32) {
    %c0_i32 = arith.constant 0 : i32
    %c0_i32_0 = arith.constant 0 : i32
    %c0_i32_1 = arith.constant 0 : i32
    return %c0_i32, %c0_i32_0 : i32, i32
  }
  func.func @transform_7(%arg0: i32) -> (i32, i32) {
    %c0_i32 = arith.constant 0 : i32
    %c0_i32_0 = arith.constant 0 : i32
    %c0_i32_1 = arith.constant 0 : i32
    return %c0_i32, %c0_i32_0 : i32, i32
  }
  func.func @transform_8(%arg0: i32) -> (i32, i32) {
    %c0_i32 = arith.constant 0 : i32
    %c0_i32_0 = arith.constant 0 : i32
    %c0_i32_1 = arith.constant 0 : i32
    return %c0_i32, %c0_i32_0 : i32, i32
  }
  func.func @transform_9(%arg0: i32) -> (i32, i32) {
    %c0_i32 = arith.constant 0 : i32
    %c0_i32_0 = arith.constant 0 : i32
    %c0_i32_1 = arith.constant 0 : i32
    return %c0_i32, %c0_i32_0 : i32, i32
  }
  func.func @transform_10(%arg0: i32) -> (i32, i32) {
    %c0_i32 = arith.constant 0 : i32
    %c0_i32_0 = arith.constant 0 : i32
    %c0_i32_1 = arith.constant 0 : i32
    return %c0_i32, %c0_i32_0 : i32, i32
  }
  func.func @transform_11(%arg0: i32) -> (i32, i32) {
    %c0_i32 = arith.constant 0 : i32
    %c0_i32_0 = arith.constant 0 : i32
    %c0_i32_1 = arith.constant 0 : i32
    return %c0_i32, %c0_i32_0 : i32, i32
  }
  func.func @transform_12(%arg0: i32) -> (i32, i32, i32) {
    %c0_i32 = arith.constant 0 : i32
    %c0_i32_0 = arith.constant 0 : i32
    %c0_i32_1 = arith.constant 0 : i32
    return %arg0, %c0_i32, %c0_i32_0 : i32, i32, i32
  }
}

</mosaic_0001>

<bundles_post_ra>
// kernel: tpu_custom_call.1
= control target key start
LH: loop header
LB: loop body
LE: loop exit
PB: predicated region body
PF: predicated region fallthrough
CT: control target
= control target key end

     0   :  { %s14766_s0 = inlined_call_operand.hbm [shape: f32[16,16,128], index: 0, kind: input, shape index: {}]   ;;  %s14767_s1 = inlined_call_operand.vmem [shape: f32[1,128], index: 1, kind: input, shape index: {}]   ;;  %s14768_s2 = inlined_call_operand.vmem [shape: f32[1,128], index: 2, kind: input, shape index: {}]   ;;  %s14769_s3 = inlined_call_operand.hbm [shape: f32[128,384], index: 3, kind: input, shape index: {}]   ;;  %s14770_s4 = inlined_call_operand.hbm [shape: f32[128,128], index: 4, kind: input, shape index: {}]   ;;  %s14771_s5 = inlined_call_operand.vmem [shape: f32[1,128], index: 5, kind: input, shape index: {}]   ;;  %s14772_s6 = inlined_call_operand.vmem [shape: f32[1,128], index: 6, kind: input, shape index: {}]   ;;  %s14773_s7 = inlined_call_operand.vmem [shape: f32[1,128], index: 7, kind: input, shape index: {}]   ;;  %s14774_s8 = inlined_call_operand.hbm [shape: f32[128,512], index: 8, kind: input, shape index: {}]   ;;  %s14775_s9 = inlined_call_operand.vmem [shape: f32[1,512], index: 9, kind: input, shape index: {}]   ;;  %s14776_s10 = inlined_call_operand.hbm [shape: f32[512,128], index: 10, kind: input, shape index: {}]   ;;  %s14777_s11 = inlined_call_operand.vmem [shape: f32[1,128], index: 11, kind: input, shape index: {}]   ;;  %s14778_s12 = inlined_call_operand.hbm [shape: f32[16,16,128], index: 12, kind: output, shape index: {}]  }
   0x1   :  { %14824 = sst [smem:[#allocation54_spill]] %s14769_s3 }
   0x2   :  { %14825 = sst [smem:[#allocation55_spill]] %s14775_s9 }
   0x3   :  { %14826 = sst [smem:[#allocation56_spill]] %s14777_s11 }
   0x4   :  { %14827 = sst [smem:[#allocation57_spill]] %s14778_s12 }
   0x5   :  { %17 = vsyncpa [#allocation3], 0 }
   0x6   :  { %19 = vsyncpa [#allocation3 + $0x1], 0 }
   0x7   :  { %20 = vsyncpa [#allocation6], 0 }
   0x8   :  { %21 = vsyncpa [#allocation9], 0 }
   0x9   :  { %22 = vsyncpa [#allocation4], 0 }
   0xa   :  { %24 = vsyncpa [#allocation4 + $0x1], 0  ;;  %s12092_s21 = smov 0   ;;  %s12094_s22 = smov 0  }
   0xb   :  { %s12096_s23 = smov 0   ;;  %s12098_s24 = smov 0  }
   0xc LB: > { %14828 = sst [smem:[#allocation16_spill]] %s11995_s21  ;;  %s12113_s25 = sadd.s32 4294967295, %s12007_s24   ;;  %s12007_s24 = sphi %s12098_s24, %s14967_s24   ;;  %s12003_s23 = sphi %s12096_s23, %s14966_s23   ;;  %s11999_s22 = sphi %s12094_s22, %s14965_s22   ;;  %s11995_s21 = sphi %s12092_s21, %s14964_s21  }
   0xd   : > { %s9170_s26 = sadd.s32 4294967294, %s12007_s24   ;;  %p50_p0 = scmp.ne.s32.totalorder %s11999_s22, %s11995_s21 }
   0xe   : > { %p14780_p1 = scmp.eq.s32.totalorder %s12113_s25, 0  ;;  %p311_p3 = scmp.eq.s32.totalorder %s9170_s26, 1 }
   0xf   : > { %p9171_p5 = scmp.ge.s32.totalorder %s12007_s24, 1  ;;  %p318_p7 = scmp.lt.s32.totalorder %s12007_s24, 3 }
  0x10   : > { %p12122_p4 = por %p14780_p1, %p50_p0  ;;  %p12127_p6 = por %p311_p3, %p50_p0 }
  0x11   : > { %p12132_p8 = pnand %p9171_p5, %p318_p7  ;;  %s12009_s30 = smov [#allocation5]  }
  0x12   : > { %s14829_s27 = scalar_select %p12122_p4, 1, 0 }
  0x13   : > { %s14830_s28 = scalar_select %p12127_p6, 1, 0 }
  0x14   : > { %s14832_s29 = scalar_select %p12132_p8, 1, 0 }
  0x15   : > { %14831 = sst [smem:[#allocation17_spill]] %s14830_s28  ;;  %s336_s13 = sshll.u32 %s12009_s30, 4  ;;  %s12136_s13 = int_to_ptr.vmem [resolvable:$true] %s336_s13 }
  0x16   : > { %p11016_p9 = pneg %p12132_p8  ;;  %s12010_s15 = smov [#allocation8]  }
  0x17   : > { %s371_s16 = sshll.u32 %s12010_s15, 4  ;;  %s14834_s3 = sld [smem:[#allocation54_spill]]  ;;  %s12147_s16 = int_to_ptr.vmem [resolvable:$true] %s371_s16 }
  0x18   : > { %p12143_p11 = pnand %p11016_p9, %p14780_p1 }
  0x1a   : > { %p12157_p13 = pneg %p12143_p11 }
  0x1d   : > { %s11791_s19 = scalar_lea.hbm %s14834_s3, 6144 }
  0x1e   : > { %p11792_p12 = scmp.ne.s32.totalorder %s14834_s3, %s11791_s19  ;;  %p11798_p5 = scmp.lt.u32.totalorder %s11791_s19, %s14834_s3 }
  0x20   : > { %p11794_p0 = pnand %p12157_p13, %p11792_p12 }
  0x22   : > { %p11795_p3 = pneg %p11794_p0 }
  0x24   : > { %p11800_p7 = pnand %p11798_p5, %p11795_p3 }
  0x26   : > { %11803 = shalt.err (!%p11800_p7)
}
  0x27   : > { %s11804_s17 = scalar_lea.vmem %s12136_s13, 6144  ;;  %p11812_p2 = scmp.lt.s32.totalorder %s12136_s13, %s12136_s13 }
  0x28   : > { %p11805_p9 = scmp.ne.s32.totalorder %s12136_s13, %s11804_s17  ;;  %p11813_p6 = scmp.lt.s32.totalorder %s11804_s17, %s11804_s17 }
  0x2a   : > { %p11807_p10 = pnand %p11805_p9, %p12157_p13  ;;  %p11814_p12 = por %p11813_p6, %p11812_p2 }
  0x2c   : > { %p11808_p1 = pneg %p11807_p10 }
  0x2e   : > { %p11815_p0 = pnand %p11814_p12, %p11808_p1 }
  0x30   : > { %11818 = shalt.err (!%p11815_p0)
}
  0x31   : > { %s12011_s18 = smov 384   ;;  %s12012_s28 = smov 24  }
  0x32   : > { %11019 = dma.hbm_to_vmem [thread:$0]  (!%p12143_p11), %s14834_s3, 6144, %s12136_s13, [#allocation6], %s12011_s18, %s12011_s18, %s12012_s28  }
  0x33   : > { %s11819_s21 = scalar_lea.hbm %s14774_s8, 8192 }
  0x34   : > { %p11820_p2 = scmp.ne.s32.totalorder %s14774_s8, %s11819_s21  ;;  %p11826_p10 = scmp.lt.u32.totalorder %s11819_s21, %s14774_s8 }
  0x36   : > { %p11822_p1 = pnand %p11820_p2, %p12157_p13 }
  0x38   : > { %p11823_p6 = pneg %p11822_p1 }
  0x3a   : > { %p11828_p3 = pnand %p11826_p10, %p11823_p6 }
  0x3c   : > { %11831 = shalt.err (!%p11828_p3)
}
  0x3d   : > { %s11832_s13 = scalar_lea.vmem %s12147_s16, 8192  ;;  %p11840_p12 = scmp.lt.s32.totalorder %s12147_s16, %s12147_s16 }
  0x3e   : > { %p11833_p5 = scmp.ne.s32.totalorder %s12147_s16, %s11832_s13  ;;  %p11841_p0 = scmp.lt.s32.totalorder %s11832_s13, %s11832_s13 }
  0x40   : > { %p11835_p7 = pnand %p11833_p5, %p12157_p13  ;;  %p11842_p2 = por %p11841_p0, %p11840_p12 }
  0x42   : > { %p11836_p9 = pneg %p11835_p7 }
  0x44   : > { %p11843_p1 = pnand %p11842_p2, %p11836_p9 }
  0x46   : > { %11846 = shalt.err (!%p11843_p1)
}
  0x47   : > { %s12013_s11 = smov 512   ;;  %s12014_s9 = smov 32  }
  0x48   : > { %11025 = dma.hbm_to_vmem [thread:$0]  (!%p12143_p11), %s14774_s8, 8192, %s12147_s16, [#allocation9], %s12013_s11, %s12013_s11, %s12014_s9  }
  0x49   : > { %s12015_s18 = smov [#allocation7]   ;;  %s11847_s26 = scalar_lea.hbm %s14770_s4, 2048 }
  0x4a   : > { %s349_s28 = sshll.u32 %s12015_s18, 4  ;;  %p11848_p6 = scmp.ne.s32.totalorder %s14770_s4, %s11847_s26  ;;  %s350_s28 = int_to_ptr.vmem [resolvable:$true] %s349_s28 }
  0x4b   : > { %p11854_p5 = scmp.lt.u32.totalorder %s11847_s26, %s14770_s4 }
  0x4c   : > { %p11850_p10 = pnand %p11848_p6, %p12157_p13 }
  0x4e   : > { %p11851_p3 = pneg %p11850_p10 }
  0x50   : > { %p11856_p7 = pnand %p11854_p5, %p11851_p3 }
  0x52   : > { %11859 = shalt.err (!%p11856_p7)
}
  0x53   : > { %s11860_s16 = scalar_lea.vmem %s350_s28, 2048  ;;  %p11868_p2 = scmp.lt.s32.totalorder %s350_s28, %s350_s28 }
  0x54   : > { %p11861_p9 = scmp.ne.s32.totalorder %s350_s28, %s11860_s16  ;;  %p11869_p1 = scmp.lt.s32.totalorder %s11860_s16, %s11860_s16 }
  0x56   : > { %p11863_p12 = pnand %p11861_p9, %p12157_p13  ;;  %p11870_p4 = por %p11869_p1, %p11868_p2 }
  0x58   : > { %p11864_p0 = pneg %p11863_p12 }
  0x5a   : > { %p11871_p8 = pnand %p11870_p4, %p11864_p0 }
  0x5c   : > { %11874 = shalt.err (!%p11871_p8)
}
  0x5d   : > { %s12016_s11 = smov 128   ;;  %s12017_s9 = smov 8  }
  0x5e   : > { %11022 = dma.hbm_to_vmem [thread:$0]  (!%p12143_p11), %s14770_s4, 2048, %s350_s28, [#allocation6], %s12016_s11, %s12016_s11, %s12017_s9  }
  0x5f   : > { %s12018_s21 = smov [#allocation10]   ;;  %s11875_s26 = scalar_lea.hbm %s14776_s10, 8192 }
  0x60   : > { %s387_s18 = sshll.u32 %s12018_s21, 4  ;;  %p11876_p4 = scmp.ne.s32.totalorder %s14776_s10, %s11875_s26  ;;  %s388_s18 = int_to_ptr.vmem [resolvable:$true] %s387_s18 }
  0x61   : > { %p11882_p10 = scmp.lt.u32.totalorder %s11875_s26, %s14776_s10 }
  0x62   : > { %p11878_p8 = pnand %p11876_p4, %p12157_p13 }
  0x64   : > { %p11879_p6 = pneg %p11878_p8 }
  0x66   : > { %p11884_p3 = pnand %p11882_p10, %p11879_p6 }
  0x68   : > { %11887 = shalt.err (!%p11884_p3)
}
  0x69   : > { %s11888_s28 = scalar_lea.vmem %s388_s18, 8192  ;;  %p11896_p12 = scmp.lt.s32.totalorder %s388_s18, %s388_s18 }
  0x6a   : > { %p11889_p5 = scmp.ne.s32.totalorder %s388_s18, %s11888_s28  ;;  %p11897_p0 = scmp.lt.s32.totalorder %s11888_s28, %s11888_s28 }
  0x6c   : > { %p11891_p7 = pnand %p11889_p5, %p12157_p13  ;;  %p11898_p2 = por %p11897_p0, %p11896_p12 }
  0x6e   : > { %p11892_p9 = pneg %p11891_p7 }
  0x70   : > { %p11899_p1 = pnand %p11898_p2, %p11892_p9 }
  0x72   : > { %11902 = shalt.err (!%p11899_p1)
}
  0x73   : > { %11028 = dma.hbm_to_vmem [thread:$0]  (!%p12143_p11), %s14776_s10, 8192, %s388_s18, [#allocation9], %s12016_s11, %s12016_s11, %s12017_s9  }
  0x74   : > { %s12244_s30 = sadd.s32 1, %s12007_s24   ;;  %s37_s14 = sadd.s32 1, %s12003_s23 }
  0x75   : > { %s34_s21 = ssub.s32 %s12007_s24, %s12244_s30  ;;  %p44_p13 = scmp.ne.s32.totalorder %s12003_s23, %s11999_s22 }
  0x76   : > { %p35_p4 = scmp.eq.s32.totalorder %s34_s21, 0  ;;  %p45_p8 = scmp.eq.s32.totalorder %s12007_s24, 0 }
  0x77   : > { %p14836_p6 = scmp.eq.s32.totalorder %s12113_s25, 1  ;;  %p11041_p3 = scmp.lt.s32.totalorder %s12007_s24, 2 }
  0x78   : > { %s12260_s20 = scalar_select %p35_p4, %s12003_s23, %s37_s14  }
  0x79   : > { %p12254_p10 = por %p14836_p6, %p44_p13  ;;  %p46_p5 = por %p45_p8, %p44_p13 }
  0x7a   : > { %s404_s26 = sand.u32 1, %s12003_s23   ;;  %s9393_s18 = sshll.u32 %s12007_s24, 11 }
  0x7b   : > { %s9177_s15 = sshll.u32 %s404_s26, 7  ;;  %s12267_s16 = scalar_lea.hbm %s14766_s0, %s9393_s18 }
  0x7c   : > { %s408_s28 = scalar_lea.vmem [#allocation2], %s9177_s15  ;;  %p12271_p11 = pnand %p11041_p3, %p46_p5 }
  0x7d   : > { %s416_s3 = sshll.u32 %s408_s28, 4  ;;  %s12275_s14 = scalar_lea.sflag [#allocation3], %s404_s26  ;;  %s12269_s3 = int_to_ptr.vmem [resolvable:$true] %s416_s3 }
  0x7e   : > { %s11903_s21 = scalar_lea.hbm %s12267_s16, 2048  ;;  %p11905_p9 = pneg %p12271_p11 }
  0x7f   : > { %p11904_p7 = scmp.ne.s32.totalorder %s12267_s16, %s11903_s21  ;;  %s11908_s17 = scalar_lea.hbm %s14766_s0, 4096 }
  0x80   : > { %p11909_p2 = scmp.lt.u32.totalorder %s12267_s16, %s14766_s0  ;;  %p11910_p1 = scmp.lt.u32.totalorder %s11908_s17, %s11903_s21 }
  0x81   : > { %p11906_p12 = pnand %p11905_p9, %p11904_p7  ;;  %p11912_p4 = scmp.lt.u32.totalorder %s11903_s21, %s12267_s16 }
  0x82   : > { %p11911_p13 = por %p11910_p1, %p11909_p2 }
  0x83   : > { %p11907_p0 = pneg %p11906_p12 }
  0x84   : > { %p11913_p8 = por %p11912_p4, %p11911_p13 }
  0x86   : > { %p11914_p6 = pnand %p11913_p8, %p11907_p0 }
  0x88   : > { %11917 = shalt.err (!%p11914_p6)
}
  0x89   : > { %s11918_s26 = scalar_lea.vmem %s12269_s3, 2048  ;;  %s12019_s15 = smov [#allocation2]  }
  0x8a   : > { %p11919_p3 = scmp.ne.s32.totalorder %s12269_s3, %s11918_s26  ;;  %s11923_s18 = sshll.u32 %s12019_s15, 4  ;;  %s11924_s18 = int_to_ptr.vmem [resolvable:$false] %s11923_s18 }
  0x8b   : > { %s11925_s13 = scalar_lea.vmem %s11924_s18, 4096  ;;  %p11926_p12 = scmp.lt.s32.totalorder %s12269_s3, %s11924_s18 }
  0x8c   : > { %p11921_p5 = pnand %p11919_p3, %p11905_p9  ;;  %p11927_p2 = scmp.lt.s32.totalorder %s11925_s13, %s11918_s26 }
  0x8e   : > { %p11922_p7 = pneg %p11921_p5  ;;  %p11928_p1 = por %p11927_p2, %p11926_p12 }
  0x90   : > { %p11929_p13 = pnand %p11928_p1, %p11922_p7 }
  0x92   : > { %11932 = shalt.err (!%p11929_p13)
}
  0x93   : > { %11032 = dma.hbm_to_vmem [thread:$0]  (!%p12271_p11), %s12267_s16, 2048, %s12269_s3, %s12275_s14, %s12016_s11, %s12016_s11, %s12017_s9  }
  0x94   : > { %p14839_p9 = scmp.ne.s32.totalorder %s14832_s29, 0 }
  0x96   : > { %428 = sbr.rel (%p14839_p9) target bundleno = 4523 (0x11ab), region = 68 }
  0x9d   : > { %s12309_s21 = sand.u32 1, %s11999_s22   ;;  %p14840_p0 = scmp.ne.s32.totalorder %s14829_s27, 0 }
  0x9e   : > { %s9182_s17 = sshll.u32 %s12309_s21, 7  ;;  %s431_s28 = scalar_lea.sflag [#allocation3], %s12309_s21 }
  0x9f   : > { %s12315_s12 = scalar_lea.vmem [#allocation2], %s9182_s17 }
  0xa0   : > { %11978 = dma.done.wait (%p14840_p0), %s431_s28, 2048  }
  0xa1   : > { %11980 = vsyncadd (%p14840_p0), %s431_s28, 4294965248  ;;  %p14841_p11 = scmp.eq.s32.totalorder %s12113_s25, 0 }
  0xa3   : > { %11982 = dma.done.wait (%p14841_p11), [#allocation6], 8192   ;;  %p14842_p4 = pmov %p14841_p11 }
  0xa5   : > { %11984 = vsyncadd (%p14842_p4), [#allocation6], 4294959104  ;;  %p14843_p8 = pmov %p14842_p4 }
  0xa6   : > { %p14844_p6 = pmov %p14842_p4 }
  0xa7   : > { %11986 = dma.done.wait (%p14843_p8), [#allocation9], 16384  }
  0xa8   : > { %11988 = vsyncadd (%p14844_p6), [#allocation9], 4294950912  ;;  %v12330_v0 = vld [vmem:[%s12315_s12] sm:$0xff]  ;;  %v12333_v1 = vld [vmem:[%s12315_s12 + $0x10] sm:$0xff]  ;;  %vm1109_vm0 = vcmask 261120   ;;  %s12021_s16 = smov 96  }
  0xa9   : > { %509 = vadd.xlane.f32.xlu0 %v12330_v0  ;;  %513 = vadd.xlane.f32.xlu1 %v12333_v1  ;;  %v12338_v2 = vld [vmem:[%s12315_s12 + $0x8] sm:$0xff]  ;;  %v12341_v3 = vld [vmem:[%s12315_s12 + $0x18] sm:$0xff]  ;;  %v12346_v4 = vld [vmem:[%s12315_s12 + $0x20] sm:$0xff]  ;;  %vm1826_vm4 = vcmask 130048   ;;  %s12022_s3 = smov 64   ;;  %s12023_s14 = smov 32  }
  0xaa   : > { %v12349_v5 = vld [vmem:[%s12315_s12 + $0x28] sm:$0xff]  ;;  %v12354_v6 = vld [vmem:[%s12315_s12 + $0x30] sm:$0xff]  ;;  %v12357_v7 = vld [vmem:[%s12315_s12 + $0x38] sm:$0xff]  ;;  %vm7723_vm5 = vcmask 523264   ;;  %vm7740_vm6 = vcmask 785408   ;;  %s14957_s11 = sld [smem:[#allocation55_spill]] }
  0xab   : > { %v12362_v8 = vld [vmem:[%s12315_s12 + $0x40] sm:$0xff]  ;;  %v12365_v9 = vld [vmem:[%s12315_s12 + $0x48] sm:$0xff]  ;;  %v12370_v10 = vld [vmem:[%s12315_s12 + $0x50] sm:$0xff]  ;;  %s14959_s13 = sld [smem:[#allocation57_spill]] }
  0xac   : > { %v12373_v11 = vld [vmem:[%s12315_s12 + $0x58] sm:$0xff]  ;;  %v12378_v12 = vld [vmem:[%s12315_s12 + $0x60] sm:$0xff]  ;;  %v12381_v13 = vld [vmem:[%s12315_s12 + $0x68] sm:$0xff] }
  0xad   : > { %511 = vadd.xlane.f32.xlu0 %v12338_v2  ;;  %515 = vadd.xlane.f32.xlu1 %v12341_v3  ;;  %v12386_v14 = vld [vmem:[%s12315_s12 + $0x70] sm:$0xff]  ;;  %v12389_v15 = vld [vmem:[%s12315_s12 + $0x78] sm:$0xff]  ;;  %v733_v16 = vld [vmem:[#allocation5 + $0x8] sm:$0xff] }
  0xae   : > { %v736_v17 = vld [vmem:[#allocation5 + $0x20] sm:$0xff]  ;;  %v735_v20 = vld [vmem:[#allocation5 + $0x18] sm:$0xff]  ;;  %v742_v22 = vld [vmem:[#allocation5 + $0x50] sm:$0xff] }
  0xaf   : > { %v732_v18 = vld [vmem:[#allocation5] sm:$0xff]  ;;  %v10436_v19 = vpack.c.bf16 %v736_v17, %v733_v16  ;;  %v739_v21 = vld [vmem:[#allocation5 + $0x38] sm:$0xff]  ;;  %v734_v25 = vld [vmem:[#allocation5 + $0x10] sm:$0xff] }
  0xb0   : > { %v10438_v23 = vpack.c.bf16 %v735_v20, %v732_v18  ;;  %v10440_v24 = vpack.c.bf16 %v742_v22, %v739_v21  ;;  %v737_v26 = vld [vmem:[#allocation5 + $0x28] sm:$0xff]  ;;  %v738_v27 = vld [vmem:[#allocation5 + $0x30] sm:$0xff]  ;;  %v748_v31 = vld [vmem:[#allocation5 + $0x80] sm:$0xff] }
  0xb1   : > { %517 = vadd.xlane.f32.xlu0 %v12346_v4  ;;  %519 = vadd.xlane.f32.xlu1 %v12349_v5  ;;  %v10468_v28 = vpack.c.bf16 %v737_v26, %v734_v25  ;;  %v741_v29 = vld [vmem:[#allocation5 + $0x48] sm:$0xff]  ;;  %v740_v33 = vld [vmem:[#allocation5 + $0x40] sm:$0xff]  ;;  %v743_v34 = vld [vmem:[#allocation5 + $0x58] sm:$0xff] }
  0xb2   : > { %10437 = vmatprep.subr.bf16.mxu0 %v10436_v19  ;;  %v745_v30 = vld [vmem:[#allocation5 + $0x68] sm:$0xff]  ;;  %v10442_v32 = vpack.c.bf16 %v741_v29, %v738_v27  ;;  %v10472_v36 = vpack.c.bf16 %v743_v34, %v740_v33  ;;  %v744_v37 = vld [vmem:[#allocation5 + $0x60] sm:$0xff]  ;;  %v747_v38 = vld [vmem:[#allocation5 + $0x78] sm:$0xff] }
  0xb3   : > { %10439 = vmatpush1.bf16.msra.mxu0 %v10438_v23  ;;  %10469 = vmatprep.subr.bf16.mxu1 %v10468_v28  ;;  %v10444_v35 = vpack.c.bf16 %v748_v31, %v745_v30  ;;  %v10446_v39 = vpack.c.bf16 %v747_v38, %v744_v37  ;;  %v754_v23 = vld [vmem:[#allocation5 + $0xb0] sm:$0xff]  ;;  %v753_v30 = vld [vmem:[#allocation5 + $0xa8] sm:$0xff]  ;;  %vm12555_vm1 = vmpackc.low %vm1109_vm0, %vm1109_vm0 }
  0xb4   : > { %10441 = vmatprep.subr.bf16.mxu0 %v10440_v24  ;;  %10471 = vmatpush3.bf16.msra.mxu1 %v10468_v28  ;;  %v746_v24 = vld [vmem:[#allocation5 + $0x70] sm:$0xff]  ;;  %v749_v28 = vld [vmem:[#allocation5 + $0x88] sm:$0xff] }
  0xb5   : > { %521 = vadd.xlane.f32.xlu0 %v12354_v6  ;;  %523 = vadd.xlane.f32.xlu1 %v12357_v7  ;;  %v750_v29 = vld [vmem:[#allocation5 + $0x90] sm:$0xff] }
  0xb6   : > { %10473 = vmatprep.subr.bf16.mxu1 %v10472_v36  ;;  %v10450_v34 = vpack.c.bf16 %v753_v30, %v750_v29  ;;  %v775_v30 = vld [vmem:[#allocation5 + $0x158] sm:$0xff] }
  0xb7   : > { %10443 = vmatpush1.bf16.msra.mxu0 %v10442_v32 }
  0xb8   : > { %10445 = vmatprep.subr.bf16.mxu0 %v10444_v35  ;;  %10475 = vmatpush3.bf16.msra.mxu1 %v10472_v36 }
  0xb9   : > { %525 = vadd.xlane.f32.xlu0 %v12362_v8  ;;  %527 = vadd.xlane.f32.xlu1 %v12365_v9 }
  0xbb   : > { %10447 = vmatpush1.bf16.msra.mxu0 %v10446_v39  ;;  %v757_v39 = vld [vmem:[#allocation5 + $0xc8] sm:$0xff] }
  0xbd   : > { %529 = vadd.xlane.f32.xlu0 %v12370_v10  ;;  %531 = vadd.xlane.f32.xlu1 %v12373_v11 }
  0xc1   : > { %533 = vadd.xlane.f32.xlu0 %v12378_v12  ;;  %535 = vadd.xlane.f32.xlu1 %v12381_v13 }
  0xc5   : > { %537 = vadd.xlane.f32.xlu0 %v12386_v14  ;;  %539 = vadd.xlane.f32.xlu1 %v12389_v15 }
 0x136   : > { %v510_v40 = vpop.xlane.xlu0 %509  ;;  %v514_v41 = vpop.xlane.xlu1 %513 }
 0x137   : > { %v542_v42 = vmul.f32 0.0078125, %v510_v40  ;;  %v544_v43 = vmul.f32 0.0078125, %v514_v41  ;;  %v760_v40 = vld [vmem:[#allocation5 + $0xe0] sm:$0xff] }
 0x138   : > { %v752_v41 = vld [vmem:[#allocation5 + $0xa0] sm:$0xff] }
 0x139   : > { %v12394_v44 = vsub.f32 %v12330_v0, %v542_v42  ;;  %v12397_v45 = vsub.f32 %v12333_v1, %v544_v43 }
 0x13a   : > { %v512_v46 = vpop.xlane.xlu0 %511  ;;  %v516_v47 = vpop.xlane.xlu1 %515 }
 0x13b   : > { %v543_v48 = vmul.f32 0.0078125, %v512_v46  ;;  %v574_v49 = vmul.f32 %v12394_v44, %v12394_v44  ;;  %v545_v50 = vmul.f32 0.0078125, %v516_v47  ;;  %v576_v51 = vmul.f32 %v12397_v45, %v12397_v45  ;;  %v755_v47 = vld [vmem:[#allocation5 + $0xb8] sm:$0xff] }
 0x13d   : > { %590 = vadd.xlane.f32.xlu0 %v574_v49  ;;  %v12404_v52 = vsub.f32 %v12338_v2, %v543_v48  ;;  %v12407_v53 = vsub.f32 %v12341_v3, %v545_v50  ;;  %v756_v48 = vld [vmem:[#allocation5 + $0xc0] sm:$0xff]  ;;  %v10452_v49 = vpack.c.bf16 %v760_v40, %v757_v39  ;;  %v10480_v50 = vpack.c.bf16 %v755_v47, %v752_v41  ;;  %v779_v40 = vld [vmem:[#allocation5 + $0x178] sm:$0xff] }
 0x13e   : > { %v518_v54 = vpop.xlane.xlu0 %517  ;;  %v520_v55 = vpop.xlane.xlu1 %519  ;;  %v776_v39 = vld [vmem:[#allocation5 + $0x160] sm:$0xff] }
 0x13f   : > { %v546_v56 = vmul.f32 0.0078125, %v518_v54  ;;  %v575_v57 = vmul.f32 %v12404_v52, %v12404_v52  ;;  %v547_v58 = vmul.f32 0.0078125, %v520_v55  ;;  %v577_v59 = vmul.f32 %v12407_v53, %v12407_v53 }
 0x140   : > { %v10496_v41 = vpack.c.bf16 %v779_v40, %v776_v39 }
 0x141   : > { %594 = vadd.xlane.f32.xlu0 %v576_v51  ;;  %592 = vadd.xlane.f32.xlu1 %v575_v57  ;;  %v12414_v60 = vsub.f32 %v12346_v4, %v546_v56  ;;  %v12417_v61 = vsub.f32 %v12349_v5, %v547_v58  ;;  %v763_v58 = vld [vmem:[#allocation5 + $0xf8] sm:$0xff] }
 0x142   : > { %v522_v62 = vpop.xlane.xlu0 %521  ;;  %v524_v63 = vpop.xlane.xlu1 %523 }
 0x143   : > { %v548_v0 = vmul.f32 0.0078125, %v522_v62  ;;  %v578_v1 = vmul.f32 %v12414_v60, %v12414_v60  ;;  %v549_v2 = vmul.f32 0.0078125, %v524_v63  ;;  %v579_v3 = vmul.f32 %v12417_v61, %v12417_v61  ;;  %v758_v62 = vld [vmem:[#allocation5 + $0xd0] sm:$0xff] }
 0x145   : > { %596 = vadd.xlane.f32.xlu1 %v577_v59  ;;  %598 = vadd.xlane.f32.xlu0 %v578_v1  ;;  %v12424_v16 = vsub.f32 %v12354_v6, %v548_v0  ;;  %v12427_v4 = vsub.f32 %v12357_v7, %v549_v2  ;;  %v751_v7 = vld [vmem:[#allocation5 + $0x98] sm:$0xff]  ;;  %v766_v59 = vld [vmem:[#allocation5 + $0x110] sm:$0xff]  ;;  %v761_v2 = vld [vmem:[#allocation5 + $0xe8] sm:$0xff] }
 0x146   : > { %v526_v5 = vpop.xlane.xlu0 %525  ;;  %v528_v17 = vpop.xlane.xlu1 %527  ;;  %v10448_v27 = vpack.c.bf16 %v754_v23, %v751_v7  ;;  %v772_v7 = vld [vmem:[#allocation5 + $0x140] sm:$0xff] }
 0x147   : > { %v550_v18 = vmul.f32 0.0078125, %v526_v5  ;;  %v580_v19 = vmul.f32 %v12424_v16, %v12424_v16  ;;  %v551_v20 = vmul.f32 0.0078125, %v528_v17  ;;  %v581_v21 = vmul.f32 %v12427_v4, %v12427_v4  ;;  %v764_v23 = vld [vmem:[#allocation5 + $0x100] sm:$0xff] }
 0x148   : > { %10449 = vmatprep.subr.bf16.mxu0 %v10448_v27  ;;  %v10456_v5 = vpack.c.bf16 %v766_v59, %v763_v58  ;;  %v768_v27 = vld [vmem:[#allocation5 + $0x120] sm:$0xff] }
 0x149   : > { %600 = vadd.xlane.f32.xlu1 %v579_v3  ;;  %602 = vadd.xlane.f32.xlu0 %v580_v19  ;;  %v12434_v22 = vsub.f32 %v12362_v8, %v550_v18  ;;  %v12437_v6 = vsub.f32 %v12365_v9, %v551_v20  ;;  %v10476_v8 = vpack.c.bf16 %v749_v28, %v746_v24  ;;  %v765_v3 = vld [vmem:[#allocation5 + $0x108] sm:$0xff]  ;;  %v771_v28 = vld [vmem:[#allocation5 + $0x138] sm:$0xff] }
 0x14a   : > { %v530_v25 = vpop.xlane.xlu0 %529  ;;  %v532_v26 = vpop.xlane.xlu1 %531  ;;  %10451 = vmatpush1.bf16.msra.mxu0 %v10450_v34  ;;  %v774_v34 = vld [vmem:[#allocation5 + $0x150] sm:$0xff] }
 0x14b   : > { %v552_v31 = vmul.f32 0.0078125, %v530_v25  ;;  %v582_v32 = vmul.f32 %v12434_v22, %v12434_v22  ;;  %v553_v33 = vmul.f32 0.0078125, %v532_v26  ;;  %v583_v9 = vmul.f32 %v12437_v6, %v12437_v6  ;;  %10477 = vmatprep.subr.bf16.mxu1 %v10476_v8  ;;  %10453 = vmatprep.subr.bf16.mxu0 %v10452_v49  ;;  %v767_v26 = vld [vmem:[#allocation5 + $0x118] sm:$0xff] }
 0x14c   : > { %10479 = vmatpush3.bf16.msra.mxu1 %v10476_v8  ;;  %v10488_v29 = vpack.c.bf16 %v767_v26, %v764_v23  ;;  %v773_v8 = vld [vmem:[#allocation5 + $0x148] sm:$0xff] }
 0x14d   : > { %604 = vadd.xlane.f32.xlu1 %v581_v21  ;;  %606 = vadd.xlane.f32.xlu0 %v582_v32  ;;  %v12444_v35 = vsub.f32 %v12370_v10, %v552_v31  ;;  %v12447_v36 = vsub.f32 %v12373_v11, %v553_v33  ;;  %v759_v10 = vld [vmem:[#allocation5 + $0xd8] sm:$0xff]  ;;  %v769_v21 = vld [vmem:[#allocation5 + $0x128] sm:$0xff]  ;;  %v778_v31 = vld [vmem:[#allocation5 + $0x170] sm:$0xff] }
 0x14e   : > { %v534_v37 = vpop.xlane.xlu0 %533  ;;  %v536_v38 = vpop.xlane.xlu1 %535  ;;  %v10454_v11 = vpack.c.bf16 %v759_v10, %v756_v48  ;;  %10481 = vmatprep.subr.bf16.mxu1 %v10480_v50  ;;  %v10460_v25 = vpack.c.bf16 %v772_v7, %v769_v21  ;;  %v770_v32 = vld [vmem:[#allocation5 + $0x130] sm:$0xff]  ;;  %v10464_v33 = vpack.c.bf16 %v778_v31, %v775_v30 }
 0x14f   : > { %v554_v42 = vmul.f32 0.0078125, %v534_v37  ;;  %v584_v43 = vmul.f32 %v12444_v35, %v12444_v35  ;;  %v555_v46 = vmul.f32 0.0078125, %v536_v38  ;;  %v585_v51 = vmul.f32 %v12447_v36, %v12447_v36 }
 0x150   : > { %10455 = vmatpush1.bf16.msra.mxu0 %v10454_v11  ;;  %10483 = vmatpush3.bf16.msra.mxu1 %v10480_v50  ;;  %v10492_v37 = vpack.c.bf16 %v773_v8, %v770_v32 }
 0x151   : > { %608 = vadd.xlane.f32.xlu1 %v583_v9  ;;  %610 = vadd.xlane.f32.xlu0 %v584_v43  ;;  %v12454_v54 = vsub.f32 %v12378_v12, %v554_v42  ;;  %v12457_v55 = vsub.f32 %v12381_v13, %v555_v46  ;;  %v762_v12 = vld [vmem:[#allocation5 + $0xf0] sm:$0xff]  ;;  %v10484_v13 = vpack.c.bf16 %v761_v2, %v758_v62  ;;  %v777_v9 = vld [vmem:[#allocation5 + $0x168] sm:$0xff]  ;;  %v14785_v42 = vmov 0.0  }
 0x152   : > { %v538_v56 = vpop.xlane.xlu0 %537  ;;  %v540_v57 = vpop.xlane.xlu1 %539  ;;  %v10458_v17 = vpack.c.bf16 %v765_v3, %v762_v12  ;;  %10457 = vmatprep.subr.bf16.mxu0 %v10456_v5  ;;  %v10466_v38 = vpack.c.bf16 %v777_v9, %v774_v34  ;;  %844 = vmatprep.mubr.f32.mxu0 %v14785_v42 }
 0x153   : > { %v556_v63 = vmul.f32 0.0078125, %v538_v56  ;;  %v586_v0 = vmul.f32 %v12454_v54, %v12454_v54  ;;  %v557_v1 = vmul.f32 0.0078125, %v540_v57  ;;  %v587_v18 = vmul.f32 %v12457_v55, %v12457_v55  ;;  %10485 = vmatprep.subr.bf16.mxu1 %v10484_v13 }
 0x154   : > { %10459 = vmatpush1.bf16.msra.mxu0 %v10458_v17  ;;  %10487 = vmatpush3.bf16.msra.mxu1 %v10484_v13  ;;  %v12477_v17 = vld [vmem:[%s14767_s1] ss:$0 sm:$0xff] }
 0x155   : > { %612 = vadd.xlane.f32.xlu1 %v585_v51  ;;  %614 = vadd.xlane.f32.xlu0 %v586_v0  ;;  %v12464_v19 = vsub.f32 %v12386_v14, %v556_v63  ;;  %v12467_v20 = vsub.f32 %v12389_v15, %v557_v1  ;;  %v10462_v14 = vpack.c.bf16 %v771_v28, %v768_v27 }
 0x156   : > { %10461 = vmatprep.subr.bf16.mxu0 %v10460_v25  ;;  %10489 = vmatprep.subr.bf16.mxu1 %v10488_v29  ;;  %v12483_v25 = vld [vmem:[%s14768_s2] ss:$0 sm:$0xff] }
 0x157   : > { %v588_v24 = vmul.f32 %v12464_v19, %v12464_v19  ;;  %v589_v15 = vmul.f32 %v12467_v20, %v12467_v20 }
 0x158   : > { %10463 = vmatpush1.bf16.msra.mxu0 %v10462_v14  ;;  %10491 = vmatpush3.bf16.msra.mxu1 %v10488_v29 }
 0x159   : > { %616 = vadd.xlane.f32.xlu1 %v587_v18  ;;  %618 = vadd.xlane.f32.xlu0 %v588_v24 }
 0x15a   : > { %10465 = vmatprep.subr.bf16.mxu0 %v10464_v33  ;;  %10493 = vmatprep.subr.bf16.mxu1 %v10492_v37 }
 0x15c   : > { %10467 = vmatpush1.bf16.msra.mxu0 %v10466_v38  ;;  %10495 = vmatpush3.bf16.msra.mxu1 %v10492_v37 }
 0x15d   : > { %620 = vadd.xlane.f32.xlu1 %v589_v15  ;;  %10497 = vmatprep.subr.bf16.mxu1 %v10496_v41 }
 0x160   : > { %10499 = vmatpush3.bf16.msra.mxu1 %v10496_v41 }
 0x1ca   : > { %v591_v43 = vpop.xlane.xlu0 %590 }
 0x1cb   : > { %v622_v46 = vmul.f32 0.0078125, %v591_v43 }
 0x1cd   : > { %v638_v47 = vadd.f32 1e-05, %v622_v46 }
 0x1ce   : > { %v593_v48 = vpop.xlane.xlu1 %592  ;;  %v595_v10 = vpop.xlane.xlu0 %594 }
 0x1cf   : > { %11455 = vrsqrt.f32 %v638_v47  ;;  %v623_v49 = vmul.f32 0.0078125, %v593_v48  ;;  %v624_v50 = vmul.f32 0.0078125, %v595_v10 }
 0x1d1   : > { %v639_v11 = vadd.f32 1e-05, %v623_v49  ;;  %v640_v51 = vadd.f32 1e-05, %v624_v50 }
 0x1d2   : > { %v597_v56 = vpop.xlane.xlu1 %596  ;;  %v599_v57 = vpop.xlane.xlu0 %598 }
 0x1d3   : > { %11457 = vrsqrt.f32 %v639_v11  ;;  %v625_v58 = vmul.f32 0.0078125, %v597_v56  ;;  %v626_v59 = vmul.f32 0.0078125, %v599_v57 }
 0x1d4   : > { %11459 = vrsqrt.f32 %v640_v51 }
 0x1d5   : > { %v641_v62 = vadd.f32 1e-05, %v625_v58  ;;  %v642_v63 = vadd.f32 1e-05, %v626_v59 }
 0x1d6   : > { %v601_v0 = vpop.xlane.xlu1 %600  ;;  %v603_v1 = vpop.xlane.xlu0 %602 }
 0x1d7   : > { %11461 = vrsqrt.f32 %v641_v62  ;;  %v627_v2 = vmul.f32 0.0078125, %v601_v0  ;;  %v628_v12 = vmul.f32 0.0078125, %v603_v1 }
 0x1d8   : > { %11463 = vrsqrt.f32 %v642_v63 }
 0x1d9   : > { %v11456_v3 = vpop.eup %11455  ;;  %v643_v5 = vadd.f32 1e-05, %v627_v2  ;;  %v644_v13 = vadd.f32 1e-05, %v628_v12 }
 0x1da   : > { %v605_v18 = vpop.xlane.xlu1 %604  ;;  %v607_v21 = vpop.xlane.xlu0 %606  ;;  %v670_v7 = vmul.f32 %v11456_v3, %v12394_v44 }
 0x1db   : > { %11465 = vrsqrt.f32 %v643_v5  ;;  %v629_v23 = vmul.f32 0.0078125, %v605_v18  ;;  %v630_v24 = vmul.f32 0.0078125, %v607_v21 }
 0x1dc   : > { %11467 = vrsqrt.f32 %v644_v13  ;;  %v693_v26 = vmul.f32 %v12477_v17, %v670_v7 }
 0x1dd   : > { %v11458_v27 = vpop.eup %11457  ;;  %v645_v28 = vadd.f32 1e-05, %v629_v23  ;;  %v646_v29 = vadd.f32 1e-05, %v630_v24 }
 0x1de   : > { %v11460_v14 = vpop.eup %11459  ;;  %v609_v15 = vpop.xlane.xlu1 %608  ;;  %v716_v31 = vadd.f32 %v12483_v25, %v693_v26  ;;  %v671_v44 = vmul.f32 %v11458_v27, %v12404_v52 }
 0x1df   : > { %v611_v30 = vpop.xlane.xlu0 %610  ;;  %11469 = vrsqrt.f32 %v645_v28  ;;  %v631_v32 = vmul.f32 0.0078125, %v609_v15  ;;  %v672_v8 = vmul.f32 %v11460_v14, %v12397_v45 }
 0x1e0   : > { %v632_v33 = vmul.f32 0.0078125, %v611_v30  ;;  %11471 = vrsqrt.f32 %v646_v29  ;;  %845 = vmatmul.mubr.f32.vlgmr.msra.gmra.mrb[0].mxu0 %v716_v31  ;;  %9908 = vmatprep.mubr.f32.mxu1 %v716_v31  ;;  %v694_v34 = vmul.f32 %v12477_v17, %v671_v44 }
 0x1e1   : > { %v11462_v9 = vpop.eup %11461  ;;  %v647_v37 = vadd.f32 1e-05, %v631_v32  ;;  %850 = vmatprep.mubr.f32.mxu0 %v14785_v42  ;;  %v695_v39 = vmul.f32 %v12477_v17, %v672_v8 }
 0x1e2   : > { %v648_v38 = vadd.f32 1e-05, %v632_v33  ;;  %v11464_v40 = vpop.eup %11463  ;;  %v613_v41 = vpop.xlane.xlu1 %612  ;;  %v717_v43 = vadd.f32 %v12483_v25, %v694_v34  ;;  %v673_v46 = vmul.f32 %v11462_v9, %v12407_v53 }
 0x1e3   : > { %v615_v52 = vpop.xlane.xlu0 %614  ;;  %11473 = vrsqrt.f32 %v647_v37  ;;  %v633_v45 = vmul.f32 0.0078125, %v613_v41  ;;  %v718_v48 = vadd.f32 %v12483_v25, %v695_v39  ;;  %v674_v49 = vmul.f32 %v11464_v40, %v12414_v60 }
 0x1e4   : > { %v634_v47 = vmul.f32 0.0078125, %v615_v52  ;;  %11475 = vrsqrt.f32 %v648_v38  ;;  %851 = vmatmul.mubr.f32.gmra.mrb[2].mxu0 %v717_v43  ;;  %9909 = vmatmul.mubr.f32.vlgmr.msra.gmra.mrb[0].mxu1 %v717_v43  ;;  %v696_v10 = vmul.f32 %v12477_v17, %v673_v46 }
 0x1e5   : > { %v11466_v50 = vpop.eup %11465  ;;  %v649_v11 = vadd.f32 1e-05, %v633_v45  ;;  %9911 = vmatprep.mubr.f32.mxu1 %v718_v48  ;;  %856 = vmatprep.mubr.f32.mxu0 %v14785_v42  ;;  %v697_v59 = vmul.f32 %v12477_v17, %v674_v49 }
 0x1e6   : > { %v650_v51 = vadd.f32 1e-05, %v634_v47  ;;  %v11468_v56 = vpop.eup %11467  ;;  %v617_v53 = vpop.xlane.xlu1 %616  ;;  %v719_v58 = vadd.f32 %v12483_v25, %v696_v10  ;;  %v675_v62 = vmul.f32 %v11466_v50, %v12417_v61 }
 0x1e7   : > { %v619_v57 = vpop.xlane.xlu0 %618  ;;  %11477 = vrsqrt.f32 %v649_v11  ;;  %v635_v63 = vmul.f32 0.0078125, %v617_v53  ;;  %v676_v60 = vmul.f32 %v11468_v56, %v12424_v16  ;;  %v720_v1 = vadd.f32 %v12483_v25, %v697_v59 }
 0x1e8   : > { %v636_v0 = vmul.f32 0.0078125, %v619_v57  ;;  %11479 = vrsqrt.f32 %v650_v51  ;;  %857 = vmatmul.mubr.f32.gmra.mrb[4].mxu0 %v718_v48  ;;  %9912 = vmatmul.mubr.f32.gmra.mrb[2].mxu1 %v719_v58  ;;  %v698_v2 = vmul.f32 %v12477_v17, %v675_v62  ;;  %v14846_v51 = vmov 0 }
 0x1e9   : > { %v11470_v12 = vpop.eup %11469  ;;  %v651_v3 = vadd.f32 1e-05, %v635_v63  ;;  %862 = vmatprep.mubr.f32.mxu0 %v14785_v42  ;;  %v699_v13 = vmul.f32 %v12477_v17, %v676_v60  ;;  %9914 = vmatprep.mubr.f32.mxu1 %v720_v1  ;;  %v14847_v51 = vsel %vm12555_vm1, 4294967295, %v14846_v51 }
 0x1ea   : > { %v652_v5 = vadd.f32 1e-05, %v636_v0  ;;  %v11472_v61 = vpop.eup %11471  ;;  %v621_v18 = vpop.xlane.xlu1 %620  ;;  %v721_v21 = vadd.f32 %v12483_v25, %v698_v2  ;;  %v677_v16 = vmul.f32 %v11470_v12, %v12427_v4  ;;  %14848 = vst [vmem:[#allocation19_spill] sm:$0xff] %v14847_v51 }
 0x1eb   : > { %11481 = vrsqrt.f32 %v651_v3  ;;  %v637_v7 = vmul.f32 0.0078125, %v621_v18  ;;  %v722_v23 = vadd.f32 %v12483_v25, %v699_v13  ;;  %v678_v24 = vmul.f32 %v11472_v61, %v12434_v22 }
 0x1ec   : > { %11483 = vrsqrt.f32 %v652_v5  ;;  %863 = vmatmul.mubr.f32.gmra.mrb[6].mxu0 %v719_v58  ;;  %9915 = vmatmul.mubr.f32.gmra.mrb[4].mxu1 %v721_v21  ;;  %v700_v26 = vmul.f32 %v12477_v17, %v677_v16 }
 0x1ed   : > { %v11474_v27 = vpop.eup %11473  ;;  %v653_v28 = vadd.f32 1e-05, %v637_v7  ;;  %9917 = vmatprep.mubr.f32.mxu1 %v722_v23  ;;  %868 = vmatprep.mubr.f32.mxu0 %v14785_v42  ;;  %v701_v29 = vmul.f32 %v12477_v17, %v678_v24 }
 0x1ee   : > { %v11476_v14 = vpop.eup %11475  ;;  %v723_v4 = vadd.f32 %v12483_v25, %v700_v26  ;;  %v679_v15 = vmul.f32 %v11474_v27, %v12437_v6 }
 0x1ef   : > { %11485 = vrsqrt.f32 %v653_v28  ;;  %v724_v22 = vadd.f32 %v12483_v25, %v701_v29  ;;  %v680_v30 = vmul.f32 %v11476_v14, %v12444_v35 }
 0x1f0   : > { %869 = vmatmul.mubr.f32.gmra.mrb[8].mxu0 %v720_v1  ;;  %9918 = vmatmul.mubr.f32.gmra.mrb[6].mxu1 %v723_v4  ;;  %v702_v31 = vmul.f32 %v12477_v17, %v679_v15 }
 0x1f1   : > { %v11478_v44 = vpop.eup %11477  ;;  %9920 = vmatprep.mubr.f32.mxu1 %v724_v22  ;;  %874 = vmatprep.mubr.f32.mxu0 %v14785_v42  ;;  %v703_v32 = vmul.f32 %v12477_v17, %v680_v30 }
 0x1f2   : > { %v11480_v33 = vpop.eup %11479  ;;  %v725_v8 = vadd.f32 %v12483_v25, %v702_v31  ;;  %v681_v6 = vmul.f32 %v11478_v44, %v12447_v36 }
 0x1f3   : > { %v726_v34 = vadd.f32 %v12483_v25, %v703_v32  ;;  %v682_v9 = vmul.f32 %v11480_v33, %v12454_v54 }
 0x1f4   : > { %875 = vmatmul.mubr.f32.gmra.mrb[10].mxu0 %v721_v21  ;;  %9921 = vmatmul.mubr.f32.gmra.mrb[8].mxu1 %v725_v8  ;;  %v704_v35 = vmul.f32 %v12477_v17, %v681_v6 }
 0x1f5   : > { %v11482_v37 = vpop.eup %11481  ;;  %9923 = vmatprep.mubr.f32.mxu1 %v726_v34  ;;  %880 = vmatprep.mubr.f32.mxu0 %v14785_v42  ;;  %v705_v38 = vmul.f32 %v12477_v17, %v682_v9 }
 0x1f6   : > { %v11484_v39 = vpop.eup %11483  ;;  %v727_v40 = vadd.f32 %v12483_v25, %v704_v35  ;;  %v683_v41 = vmul.f32 %v11482_v37, %v12457_v55 }
 0x1f7   : > { %v728_v36 = vadd.f32 %v12483_v25, %v705_v38  ;;  %v684_v52 = vmul.f32 %v11484_v39, %v12464_v19 }
 0x1f8   : > { %881 = vmatmul.mubr.f32.gmra.mrb[12].mxu0 %v722_v23  ;;  %9924 = vmatmul.mubr.f32.gmra.mrb[10].mxu1 %v727_v40  ;;  %v706_v54 = vmul.f32 %v12477_v17, %v683_v41 }
 0x1f9   : > { %v11486_v43 = vpop.eup %11485  ;;  %9926 = vmatprep.mubr.f32.mxu1 %v728_v36  ;;  %886 = vmatprep.mubr.f32.mxu0 %v14785_v42  ;;  %v707_v46 = vmul.f32 %v12477_v17, %v684_v52 }
 0x1fa   : > { %v729_v45 = vadd.f32 %v12483_v25, %v706_v54  ;;  %v685_v47 = vmul.f32 %v11486_v43, %v12467_v20 }
 0x1fb   : > { %v730_v55 = vadd.f32 %v12483_v25, %v707_v46 }
 0x1fc   : > { %887 = vmatmul.mubr.f32.gmra.mrb[14].mxu0 %v723_v4  ;;  %9927 = vmatmul.mubr.f32.gmra.mrb[12].mxu1 %v729_v45  ;;  %v708_v19 = vmul.f32 %v12477_v17, %v685_v47 }
 0x1fd   : > { %9929 = vmatprep.mubr.f32.mxu1 %v730_v55  ;;  %892 = vmatprep.mubr.f32.mxu0 %v14785_v42 }
 0x1fe   : > { %v731_v48 = vadd.f32 %v12483_v25, %v708_v19 }
 0x200   : > { %893 = vmatmul.mubr.f32.gmra.mrb[16].mxu0 %v724_v22  ;;  %9930 = vmatmul.mubr.f32.gmra.mrb[14].mxu1 %v731_v48 }
 0x201   : > { %898 = vmatprep.mubr.f32.mxu0 %v14785_v42 }
 0x204   : > { %899 = vmatmul.mubr.f32.gmra.mrb[18].mxu0 %v725_v8 }
 0x205   : > { %904 = vmatprep.mubr.f32.mxu0 %v14785_v42 }
 0x208   : > { %905 = vmatmul.mubr.f32.gmra.mrb[20].mxu0 %v726_v34 }
 0x209   : > { %910 = vmatprep.mubr.f32.mxu0 %v14785_v42 }
 0x20c   : > { %911 = vmatmul.mubr.f32.gmra.mrb[22].mxu0 %v727_v40 }
 0x20d   : > { %916 = vmatprep.mubr.f32.mxu0 %v14785_v42 }
 0x210   : > { %917 = vmatmul.mubr.f32.gmra.mrb[24].mxu0 %v728_v36 }
 0x211   : > { %922 = vmatprep.mubr.f32.mxu0 %v14785_v42 }
 0x214   : > { %923 = vmatmul.mubr.f32.gmra.mrb[26].mxu0 %v729_v45 }
 0x215   : > { %928 = vmatprep.mubr.f32.mxu0 %v14785_v42 }
 0x218   : > { %929 = vmatmul.mubr.f32.gmra.mrb[28].mxu0 %v730_v55 }
 0x219   : > { %934 = vmatprep.mubr.f32.mxu0 %v14785_v42 }
 0x21c   : > { %935 = vmatmul.mubr.f32.gmra.mrb[30].mxu0 %v731_v48 }
 0x2b3   : > { %v846_v20 = vpop.f32.mrb[0].mxu0 }
 0x2b4   : > { %v12547_v17 = vmul.f32 0.088388346, %v846_v20  ;;  %v848_v25 = vpop.f32.mrb[1].mxu0 }
 0x2b6   : > { %14845 = vst [vmem:[#allocation18_spill] sm:$0xff] %v12547_v17  ;;  %2651 = vrot.lane.b32.xlu1 %v12547_v17, %s12021_s16  ;;  %9936 = vmatprep.mubr.msk.f32.mxu1 %vm1109_vm0, %v12547_v17 }
 0x2b7   : > { %v852_v10 = vpop.f32.mrb[2].mxu0  ;;  %v9910_v49 = vpop.f32.mrb[0].mxu1 }
 0x2b8   : > { %v854_v50 = vpop.f32.mrb[3].mxu0  ;;  %v1007_v11 = vpop.f32.mrb[1].mxu1  ;;  %v12575_v2 = vmul.f32 0.088388346, %v852_v10 }
 0x2b9   : > { %v12559_v56 = vpack.i.bf16 %v854_v50, %v848_v25  ;;  %v10500_v53 = vpack.c.bf16 %v854_v50, %v848_v25  ;;  %v12561_v57 = vpack.i.bf16 %v9910_v49, %v1007_v11  ;;  %v12563_v58 = vpack.c.bf16 %v9910_v49, %v1007_v11 }
 0x2ba   : > { %14850 = vst [vmem:[#allocation21_spill] sm:$0xff] %v12575_v2 }
 0x2bb   : > { %14849 = vst [vmem:[#allocation20_spill] sm:$0xff] %v12559_v56  ;;  %v858_v59 = vpop.f32.mrb[4].mxu0  ;;  %v9913_v62 = vpop.f32.mrb[2].mxu1  ;;  %10502 = vmatprep.subr.msk.bf16.mxu1 %vm12555_vm1, %v10500_v53  ;;  %11096 = vrot.lane.b32.xlu0 %v12559_v56, %s12021_s16 }
 0x2bc   : > { %v860_v63 = vpop.f32.mrb[5].mxu0  ;;  %v1017_v0 = vpop.f32.mrb[3].mxu1  ;;  %10505 = vmatpush3.bf16.xpose.msk.msra.mxu1 %vm12555_vm1, %v10500_v53  ;;  %v12585_v7 = vmul.f32 0.088388346, %v858_v59 }
 0x2bd   : > { %v12571_v60 = vpack.i.bf16 %v9913_v62, %v1017_v0  ;;  %v12573_v1 = vpack.c.bf16 %v9913_v62, %v1017_v0 }
 0x2be   : > { %14852 = vst [vmem:[#allocation23_spill] sm:$0xff] %v12585_v7 }
 0x2bf   : > { %v864_v12 = vpop.f32.mrb[6].mxu0  ;;  %v9916_v3 = vpop.f32.mrb[4].mxu1  ;;  %2653 = vrot.lane.b32.xlu0 %v12575_v2, %s12021_s16 }
 0x2c0   : > { %v866_v5 = vpop.f32.mrb[7].mxu0  ;;  %v1027_v13 = vpop.f32.mrb[5].mxu1  ;;  %v12601_v15 = vmul.f32 0.088388346, %v864_v12 }
 0x2c1   : > { %v12579_v61 = vpack.i.bf16 %v866_v5, %v860_v63  ;;  %v10506_v18 = vpack.c.bf16 %v866_v5, %v860_v63  ;;  %v12581_v21 = vpack.i.bf16 %v9916_v3, %v1027_v13  ;;  %v12583_v16 = vpack.c.bf16 %v9916_v3, %v1027_v13 }
 0x2c3   : > { %14851 = vst [vmem:[#allocation22_spill] sm:$0xff] %v12579_v61  ;;  %v870_v23 = vpop.f32.mrb[8].mxu0  ;;  %v9919_v24 = vpop.f32.mrb[6].mxu1  ;;  %9937 = vmatmul.mubr.msk.f32.vlgmr.msra.gmra.mrb[16].mxu1 %vm1109_vm0, %v12575_v2  ;;  %10508 = vmatprep.subr.msk.bf16.mxu1 %vm12555_vm1, %v10506_v18 }
 0x2c4   : > { %11101 = vrot.lane.b32.xlu1 %v12579_v61, %s12021_s16  ;;  %v872_v26 = vpop.f32.mrb[9].mxu0  ;;  %v1037_v27 = vpop.f32.mrb[7].mxu1  ;;  %10511 = vmatpush3.bf16.xpose.msk.msra.mxu1 %vm12555_vm1, %v10506_v18  ;;  %v12609_v8 = vmul.f32 0.088388346, %v870_v23 }
 0x2c5   : > { %v12595_v28 = vpack.i.bf16 %v9919_v24, %v1037_v27  ;;  %9943 = vmatprep.mubr.msk.f32.mxu1 %vm1109_vm0, %v12585_v7  ;;  %v12599_v29 = vpack.c.bf16 %v9919_v24, %v1037_v27 }
 0x2c7   : > { %v876_v14 = vpop.f32.mrb[10].mxu0  ;;  %v9922_v4 = vpop.f32.mrb[8].mxu1 }
 0x2c8   : > { %v878_v22 = vpop.f32.mrb[11].mxu0  ;;  %v1047_v30 = vpop.f32.mrb[9].mxu1  ;;  %v12625_v41 = vmul.f32 0.088388346, %v876_v14 }
 0x2c9   : > { %v12603_v31 = vpack.i.bf16 %v878_v22, %v872_v26  ;;  %v10512_v44 = vpack.c.bf16 %v878_v22, %v872_v26  ;;  %v12605_v32 = vpack.i.bf16 %v9922_v4, %v1047_v30  ;;  %v12607_v33 = vpack.c.bf16 %v9922_v4, %v1047_v30 }
 0x2cb   : > { %14853 = vst [vmem:[#allocation24_spill] sm:$0xff] %v12603_v31  ;;  %v882_v6 = vpop.f32.mrb[12].mxu0  ;;  %v9925_v34 = vpop.f32.mrb[10].mxu1  ;;  %9944 = vmatmul.mubr.msk.f32.vlgmr.msra.gmra.mrb[18].mxu1 %vm1109_vm0, %v12601_v15  ;;  %10514 = vmatprep.subr.msk.bf16.mxu1 %vm12555_vm1, %v10512_v44 }
 0x2cc   : > { %11106 = vrot.lane.b32.xlu1 %v12603_v31, %s12021_s16  ;;  %v884_v9 = vpop.f32.mrb[13].mxu0  ;;  %v1057_v35 = vpop.f32.mrb[11].mxu1  ;;  %10517 = vmatpush3.bf16.xpose.msk.msra.mxu1 %vm12555_vm1, %v10512_v44  ;;  %v12633_v47 = vmul.f32 0.088388346, %v882_v6 }
 0x2cd   : > { %v12619_v37 = vpack.i.bf16 %v9925_v34, %v1057_v35  ;;  %9950 = vmatprep.mubr.msk.f32.mxu1 %vm1109_vm0, %v12609_v8  ;;  %v12623_v38 = vpack.c.bf16 %v9925_v34, %v1057_v35 }
 0x2cf   : > { %v888_v39 = vpop.f32.mrb[14].mxu0  ;;  %v9928_v40 = vpop.f32.mrb[12].mxu1 }
 0x2d0   : > { %v890_v36 = vpop.f32.mrb[15].mxu0  ;;  %v1067_v52 = vpop.f32.mrb[13].mxu1  ;;  %v12653_v11 = vmul.f32 0.088388346, %v888_v39 }
 0x2d1   : > { %v12627_v54 = vpack.i.bf16 %v890_v36, %v884_v9  ;;  %v10518_v43 = vpack.c.bf16 %v890_v36, %v884_v9  ;;  %v12629_v46 = vpack.i.bf16 %v9928_v40, %v1067_v52  ;;  %v12631_v45 = vpack.c.bf16 %v9928_v40, %v1067_v52 }
 0x2d3   : > { %14854 = vst [vmem:[#allocation25_spill] sm:$0xff] %v12627_v54  ;;  %v894_v55 = vpop.f32.mrb[16].mxu0  ;;  %v9931_v19 = vpop.f32.mrb[14].mxu1  ;;  %9951 = vmatmul.mubr.msk.f32.vlgmr.msra.gmra.mrb[20].mxu1 %vm1109_vm0, %v12625_v41  ;;  %10520 = vmatprep.subr.msk.bf16.mxu1 %vm12555_vm1, %v10518_v43 }
 0x2d4   : > { %11111 = vrot.lane.b32.xlu1 %v12627_v54, %s12021_s16  ;;  %v12641_v48 = vmul.f32 0.088388346, %v894_v55  ;;  %v896_v20 = vpop.f32.mrb[17].mxu0  ;;  %v1077_v25 = vpop.f32.mrb[15].mxu1  ;;  %10523 = vmatpush3.bf16.xpose.msk.msra.mxu1 %vm12555_vm1, %v10518_v43  ;;  %v1102_v55 = vlaneseq }
 0x2d5   : > { %v12645_v10 = vpack.i.bf16 %v9931_v19, %v1077_v25  ;;  %9957 = vmatprep.mubr.msk.f32.mxu1 %vm1109_vm0, %v12633_v47  ;;  %v12649_v49 = vpack.c.bf16 %v9931_v19, %v1077_v25 }
 0x2d6   : > { %9964 = vmatprep.mubr.msk.f32.mxu0 %vm1109_vm0, %v12641_v48  ;;  %v12715_v19 = vshrl.u32 %v1102_v55, 7  ;;  %v1106_v25 = vand.u32 127, %v1102_v55 }
 0x2d7   : > { %14855 = vst [vmem:[#allocation26_spill] sm:$0xff] %v12645_v10  ;;  %v900_v50 = vpop.f32.mrb[18].mxu0 }
 0x2d8   : > { %v902_v53 = vpop.f32.mrb[19].mxu0  ;;  %v12667_v5 = vmul.f32 0.088388346, %v900_v50  ;;  %14861 = vst [vmem:[#allocation32_spill] sm:$0xff] %v12715_v19  ;;  %vm12723_vm3 = vcmp.le.s32.totalorder %v1106_v25, %v12715_v19  ;;  %v14865_v50 = vmov 0 }
 0x2d9   : > { %v12655_v59 = vpack.i.bf16 %v902_v53, %v896_v20  ;;  %v10524_v62 = vpack.c.bf16 %v902_v53, %v896_v20  ;;  %v1104_v20 = vadd.s32 8, %v12715_v19  ;;  %v14866_v50 = vsel %vm12723_vm3, 4294967295, %v14865_v50 }
 0x2da   : > { %14867 = vst [vmem:[#allocation34_spill] sm:$0xff] %v14866_v50 }
 0x2db   : > { %14856 = vst [vmem:[#allocation27_spill] sm:$0xff] %v12655_v59  ;;  %v906_v63 = vpop.f32.mrb[20].mxu0  ;;  %9958 = vmatmul.mubr.msk.f32.vlgmr.msra.gmra.mrb[22].mxu1 %vm1109_vm0, %v12653_v11  ;;  %10526 = vmatprep.subr.msk.bf16.mxu0 %vm12555_vm1, %v10524_v62  ;;  %vm12718_vm2 = vcmp.le.s32.totalorder %v1106_v25, %v1104_v20 }
 0x2dc   : > { %v12661_v0 = vmul.f32 0.088388346, %v906_v63  ;;  %v908_v12 = vpop.f32.mrb[21].mxu0  ;;  %10529 = vmatpush3.bf16.xpose.msk.msra.mxu0 %vm12555_vm1, %v10524_v62 }
 0x2de   : > { %14857 = vst [vmem:[#allocation28_spill] sm:$0xff] %v12661_v0  ;;  %9971 = vmatprep.mubr.msk.f32.mxu1 %vm1109_vm0, %v12661_v0 }
 0x2df   : > { %v912_v3 = vpop.f32.mrb[22].mxu0 }
 0x2e0   : > { %v914_v13 = vpop.f32.mrb[23].mxu0  ;;  %v12681_v4 = vmul.f32 0.088388346, %v912_v3 }
 0x2e1   : > { %v12669_v18 = vpack.i.bf16 %v914_v13, %v908_v12  ;;  %v10530_v23 = vpack.c.bf16 %v914_v13, %v908_v12 }
 0x2e3   : > { %v918_v24 = vpop.f32.mrb[24].mxu0  ;;  %9965 = vmatmul.mubr.msk.f32.vlgmr.msra.gmra.mrb[32].mxu0 %vm1109_vm0, %v12667_v5  ;;  %10532 = vmatprep.subr.msk.bf16.mxu1 %vm12555_vm1, %v10530_v23 }
 0x2e4   : > { %v12675_v26 = vmul.f32 0.088388346, %v918_v24  ;;  %v920_v27 = vpop.f32.mrb[25].mxu0  ;;  %10535 = vmatpush3.bf16.xpose.msk.msra.mxu1 %vm12555_vm1, %v10530_v23 }
 0x2e6   : > { %9978 = vmatprep.mubr.msk.f32.mxu0 %vm1109_vm0, %v12675_v26 }
 0x2e7   : > { %v924_v14 = vpop.f32.mrb[26].mxu0 }
 0x2e8   : > { %v926_v22 = vpop.f32.mrb[27].mxu0  ;;  %v12696_v39 = vmul.f32 0.088388346, %v924_v14 }
 0x2e9   : > { %v12683_v30 = vpack.i.bf16 %v926_v22, %v920_v27  ;;  %v10536_v44 = vpack.c.bf16 %v926_v22, %v920_v27 }
 0x2ea   : > { %14858 = vst [vmem:[#allocation29_spill] sm:$0xff] %v12696_v39 }
 0x2eb   : > { %v930_v6 = vpop.f32.mrb[28].mxu0  ;;  %9972 = vmatmul.mubr.msk.f32.vlgmr.msra.gmra.mrb[24].mxu1 %vm1109_vm0, %v12681_v4  ;;  %10538 = vmatprep.subr.msk.bf16.mxu0 %vm12555_vm1, %v10536_v44 }
 0x2ec   : > { %v12689_v34 = vmul.f32 0.088388346, %v930_v6  ;;  %v932_v9 = vpop.f32.mrb[29].mxu0  ;;  %10541 = vmatpush3.bf16.xpose.msk.msra.mxu0 %vm12555_vm1, %v10536_v44 }
 0x2ed   : > { %10549 = vmatprep.subr.bf16.mxu0 %v12563_v58 }
 0x2ee   : > { %9985 = vmatprep.mubr.msk.f32.mxu1 %vm1109_vm0, %v12689_v34 }
 0x2ef   : > { %v936_v35 = vpop.f32.mrb[30].mxu0 }
 0x2f0   : > { %v938_v40 = vpop.f32.mrb[31].mxu0  ;;  %v12709_v43 = vmul.f32 0.088388346, %v936_v35 }
 0x2f1   : > { %v12698_v36 = vpack.i.bf16 %v938_v40, %v932_v9  ;;  %v10542_v52 = vpack.c.bf16 %v938_v40, %v932_v9 }
 0x2f2   : > { %14860 = vst [vmem:[#allocation31_spill] sm:$0xff] %v12709_v43 }
 0x2f3   : > { %14859 = vst [vmem:[#allocation30_spill] sm:$0xff] %v12698_v36  ;;  %9979 = vmatmul.mubr.msk.f32.vlgmr.msra.gmra.mrb[34].mxu0 %vm1109_vm0, %v12696_v39  ;;  %10544 = vmatprep.subr.msk.bf16.mxu1 %vm12555_vm1, %v10542_v52 }
 0x2f4   : > { %10547 = vmatpush3.bf16.xpose.msk.msra.mxu1 %vm12555_vm1, %v10542_v52  ;;  %10551 = vmatpush3.bf16.msra.mxu0 %v12563_v58  ;;  %v14862_v58 = vmov 0 }
 0x2f5   : > { %10553 = vmatprep.subr.bf16.mxu1 %v12573_v1  ;;  %10557 = vmatprep.subr.bf16.mxu0 %v12583_v16  ;;  %v14863_v58 = vsel %vm12718_vm2, 4294967295, %v14862_v58 }
 0x2f6   : > { %14864 = vst [vmem:[#allocation33_spill] sm:$0xff] %v14863_v58 }
 0x2fb   : > { %9986 = vmatmul.mubr.msk.f32.vlgmr.msra.gmra.mrb[26].mxu1 %vm1109_vm0, %v12709_v43 }
 0x2fc   : > { %10555 = vmatpush3.bf16.msra.mxu1 %v12573_v1 }
 0x2fd   : > { %10561 = vmatprep.subr.bf16.mxu1 %v12599_v29 }
 0x396   : > { %v9938_v53 = vpop.f32.mrb[16].mxu1 }
 0x397   : > { %v12729_v1 = vsel %vm12718_vm2, %v9938_v53, -1e+30  ;;  %v1188_v62 = vpop.f32.mrb[17].mxu1 }
 0x398   : > { %v12733_v63 = vsel %vm12723_vm3, %v1188_v62, -1e+30  ;;  %v1830_v12 = vsel %vm1826_vm4, %v12729_v1, -inf }
 0x399   : > { %1831 = vmax.xlane.f32.xlu1 %v1830_v12  ;;  %v1827_v3 = vsel %vm1826_vm4, %v12733_v63, -inf }
 0x39a   : > { %1828 = vmax.xlane.f32.xlu0 %v1827_v3 }
 0x39e   : > { %v9945_v13 = vpop.f32.mrb[18].mxu1 }
 0x39f   : > { %v12741_v23 = vsel %vm12718_vm2, %v9945_v13, -1e+30  ;;  %v1275_v24 = vpop.f32.mrb[19].mxu1 }
 0x3a0   : > { %v1836_v27 = vsel %vm1826_vm4, %v12741_v23, -inf  ;;  %v12747_v14 = vsel %vm12723_vm3, %v1275_v24, -1e+30 }
 0x3a1   : > { %1837 = vmax.xlane.f32.xlu0 %v1836_v27  ;;  %v1833_v22 = vsel %vm1826_vm4, %v12747_v14, -inf }
 0x3a5   : > { %1834 = vmax.xlane.f32.xlu0 %v1833_v22 }
 0x3a6   : > { %v9952_v44 = vpop.f32.mrb[20].mxu1 }
 0x3a7   : > { %v12753_v6 = vsel %vm12718_vm2, %v9952_v44, -1e+30  ;;  %v1362_v9 = vpop.f32.mrb[21].mxu1 }
 0x3a8   : > { %v12757_v35 = vsel %vm12723_vm3, %v1362_v9, -1e+30  ;;  %v1842_v40 = vsel %vm1826_vm4, %v12753_v6, -inf }
 0x3a9   : > { %1843 = vmax.xlane.f32.xlu1 %v1842_v40  ;;  %v1839_v52 = vsel %vm1826_vm4, %v12757_v35, -inf }
 0x3aa   : > { %1840 = vmax.xlane.f32.xlu0 %v1839_v52 }
 0x3ae   : > { %v9959_v55 = vpop.f32.mrb[22].mxu1 }
 0x3af   : > { %v12765_v20 = vsel %vm12718_vm2, %v9959_v55, -1e+30  ;;  %v1449_v25 = vpop.f32.mrb[23].mxu1 }
 0x3b0   : > { %v12769_v53 = vsel %vm12723_vm3, %v1449_v25, -1e+30  ;;  %v1848_v62 = vsel %vm1826_vm4, %v12765_v20, -inf }
 0x3b1   : > { %1849 = vmax.xlane.f32.xlu1 %v1848_v62  ;;  %v1845_v12 = vsel %vm1826_vm4, %v12769_v53, -inf }
 0x3b2   : > { %1846 = vmax.xlane.f32.xlu0 %v1845_v12 }
 0x3b6   : > { %v9966_v3 = vpop.f32.mrb[32].mxu0 }
 0x3b7   : > { %v12777_v13 = vsel %vm12718_vm2, %v9966_v3, -1e+30  ;;  %v1536_v24 = vpop.f32.mrb[33].mxu0 }
 0x3b8   : > { %v1854_v27 = vsel %vm1826_vm4, %v12777_v13, -inf  ;;  %v12783_v22 = vsel %vm12723_vm3, %v1536_v24, -1e+30 }
 0x3b9   : > { %1855 = vmax.xlane.f32.xlu1 %v1854_v27  ;;  %v1851_v44 = vsel %vm1826_vm4, %v12783_v22, -inf }
 0x3bd   : > { %1852 = vmax.xlane.f32.xlu1 %v1851_v44 }
 0x3be   : > { %v9973_v9 = vpop.f32.mrb[24].mxu1 }
 0x3bf   : > { %v12789_v40 = vsel %vm12718_vm2, %v9973_v9, -1e+30  ;;  %v1623_v52 = vpop.f32.mrb[25].mxu1 }
 0x3c0   : > { %v12793_v55 = vsel %vm12723_vm3, %v1623_v52, -1e+30  ;;  %v1860_v25 = vsel %vm1826_vm4, %v12789_v40, -inf }
 0x3c1   : > { %1861 = vmax.xlane.f32.xlu1 %v1860_v25  ;;  %v1857_v62 = vsel %vm1826_vm4, %v12793_v55, -inf }
 0x3c2   : > { %1858 = vmax.xlane.f32.xlu0 %v1857_v62 }
 0x3c6   : > { %v9980_v12 = vpop.f32.mrb[34].mxu0 }
 0x3c7   : > { %v12801_v3 = vsel %vm12718_vm2, %v9980_v12, -1e+30  ;;  %v1710_v24 = vpop.f32.mrb[35].mxu0 }
 0x3c8   : > { %v12805_v27 = vsel %vm12723_vm3, %v1710_v24, -1e+30  ;;  %v1866_v44 = vsel %vm1826_vm4, %v12801_v3, -inf }
 0x3c9   : > { %1867 = vmax.xlane.f32.xlu1 %v1866_v44  ;;  %v1863_v9 = vsel %vm1826_vm4, %v12805_v27, -inf }
 0x3ca   : > { %1864 = vmax.xlane.f32.xlu0 %v1863_v9  ;;  %v12827_v9 = vpop.permute.xlu1 %2651 }
 0x3cb   : > { %14868 = vst [vmem:[#allocation35_spill] sm:$0xff] %v12827_v9 }
 0x3ce   : > { %v9987_v52 = vpop.f32.mrb[26].mxu1 }
 0x3cf   : > { %v12813_v25 = vsel %vm12718_vm2, %v9987_v52, -1e+30  ;;  %v1797_v62 = vpop.f32.mrb[27].mxu1  ;;  %v12829_v52 = vpop.permute.xlu1 %11101 }
 0x3d0   : > { %v12817_v12 = vsel %vm12723_vm3, %v1797_v62, -1e+30  ;;  %v1872_v24 = vsel %vm1826_vm4, %v12813_v25, -inf  ;;  %14869 = vst [vmem:[#allocation36_spill] sm:$0xff] %v12829_v52  ;;  %v12831_v62 = vpop.permute.xlu0 %11096 }
 0x3d1   : > { %1873 = vmax.xlane.f32.xlu1 %v1872_v24  ;;  %v1869_v44 = vsel %vm1826_vm4, %v12817_v12, -inf }
 0x3d2   : > { %1870 = vmax.xlane.f32.xlu0 %v1869_v44 }
 0x3d3   : > { %v12833_v42 = vpop.permute.xlu1 %11106 }
 0x3d4   : > { %14870 = vst [vmem:[#allocation37_spill] sm:$0xff] %v12833_v42  ;;  %v12837_v24 = vpop.permute.xlu0 %2653 }
 0x3d5   : > { %14872 = vst [vmem:[#allocation39_spill] sm:$0xff] %v12837_v24 }
 0x3d7   : > { %v12835_v19 = vpop.permute.xlu1 %11111 }
 0x3d8   : > { %14871 = vst [vmem:[#allocation38_spill] sm:$0xff] %v12835_v19 }
 0x3e2   : > { %2742 = vrot.lane.b32.xlu1 %v12585_v7, %s12021_s16 }
 0x3e8   : > { %11116 = vrot.lane.b32.xlu0 %v12655_v59, %s12021_s16 }
 0x426   : > { %v1832_v54 = vpop.xlane.xlu1 %1831 }
 0x427   : > { %v1876_v44 = vsub.f32 %v12729_v1, %v1832_v54  ;;  %v1829_v2 = vpop.xlane.xlu0 %1828 }
 0x428   : > { %v1875_v7 = vsub.f32 %v12733_v63, %v1829_v2 }
 0x429   : > { %v1893_v17 = vmul.f32 1.442695, %v1876_v44 }
 0x42a   : > { %v1891_v59 = vmul.f32 1.442695, %v1875_v7 }
 0x42b   : > { %11487 = vpow2.f32 %v1893_v17 }
 0x42c   : > { %11489 = vpow2.f32 %v1891_v59 }
 0x42e   : > { %v1838_v50 = vpop.xlane.xlu0 %1837 }
 0x42f   : > { %v1878_v58 = vsub.f32 %v12741_v23, %v1838_v50 }
 0x431   : > { %v1897_v9 = vmul.f32 1.442695, %v1878_v58 }
 0x432   : > { %v1835_v51 = vpop.xlane.xlu0 %1834 }
 0x433   : > { %11491 = vpow2.f32 %v1897_v9  ;;  %v1877_v19 = vsub.f32 %v12747_v14, %v1835_v51 }
 0x435   : > { %v12843_v42 = vpop.eup %11487  ;;  %v1895_v24 = vmul.f32 1.442695, %v1877_v19 }
 0x436   : > { %v12845_v52 = vpop.eup %11489  ;;  %v1844_v54 = vpop.xlane.xlu1 %1843  ;;  %v1926_v2 = vsel %vm1826_vm4, %v12843_v42, 0.0 }
 0x437   : > { %11493 = vpow2.f32 %v1895_v24  ;;  %v1880_v17 = vsub.f32 %v12753_v6, %v1844_v54  ;;  %1927 = vadd.xlane.f32.xlu1 %v1926_v2  ;;  %v1841_v7 = vpop.xlane.xlu0 %1840  ;;  %v1923_v59 = vsel %vm1826_vm4, %v12845_v52, 0.0 }
 0x438   : > { %v1879_v58 = vsub.f32 %v12757_v35, %v1841_v7  ;;  %1924 = vadd.xlane.f32.xlu0 %v1923_v59 }
 0x439   : > { %v1901_v51 = vmul.f32 1.442695, %v1880_v17 }
 0x43a   : > { %v1899_v50 = vmul.f32 1.442695, %v1879_v58 }
 0x43b   : > { %11495 = vpow2.f32 %v1901_v51 }
 0x43c   : > { %11497 = vpow2.f32 %v1899_v50 }
 0x43d   : > { %v12853_v19 = vpop.eup %11491 }
 0x43e   : > { %v1850_v1 = vpop.xlane.xlu1 %1849  ;;  %v1932_v63 = vsel %vm1826_vm4, %v12853_v19, 0.0 }
 0x43f   : > { %v1882_v23 = vsub.f32 %v12765_v20, %v1850_v1  ;;  %1933 = vadd.xlane.f32.xlu0 %v1932_v63  ;;  %v1847_v14 = vpop.xlane.xlu0 %1846 }
 0x440   : > { %v1881_v6 = vsub.f32 %v12769_v53, %v1847_v14 }
 0x441   : > { %v12859_v9 = vpop.eup %11493  ;;  %v1905_v35 = vmul.f32 1.442695, %v1882_v23 }
 0x442   : > { %v1903_v24 = vmul.f32 1.442695, %v1881_v6  ;;  %v1929_v44 = vsel %vm1826_vm4, %v12859_v9, 0.0 }
 0x443   : > { %11499 = vpow2.f32 %v1905_v35  ;;  %1930 = vadd.xlane.f32.xlu0 %v1929_v44 }
 0x444   : > { %11501 = vpow2.f32 %v1903_v24 }
 0x445   : > { %v12863_v54 = vpop.eup %11495 }
 0x446   : > { %v12865_v2 = vpop.eup %11497  ;;  %v1856_v17 = vpop.xlane.xlu1 %1855  ;;  %v1938_v20 = vsel %vm1826_vm4, %v12863_v54, 0.0 }
 0x447   : > { %v1884_v53 = vsub.f32 %v12777_v13, %v1856_v17  ;;  %1939 = vadd.xlane.f32.xlu1 %v1938_v20  ;;  %v1935_v7 = vsel %vm1826_vm4, %v12865_v2, 0.0 }
 0x448   : > { %1936 = vadd.xlane.f32.xlu0 %v1935_v7 }
 0x449   : > { %v1909_v59 = vmul.f32 1.442695, %v1884_v53 }
 0x44a   : > { %v1853_v58 = vpop.xlane.xlu1 %1852 }
 0x44b   : > { %11503 = vpow2.f32 %v1909_v59  ;;  %v1883_v51 = vsub.f32 %v12783_v22, %v1853_v58 }
 0x44d   : > { %v12873_v50 = vpop.eup %11499  ;;  %v1907_v1 = vmul.f32 1.442695, %v1883_v51 }
 0x44e   : > { %v12875_v63 = vpop.eup %11501  ;;  %v1862_v23 = vpop.xlane.xlu1 %1861  ;;  %v1944_v14 = vsel %vm1826_vm4, %v12873_v50, 0.0 }
 0x44f   : > { %11505 = vpow2.f32 %v1907_v1  ;;  %v1886_v13 = vsub.f32 %v12789_v40, %v1862_v23  ;;  %1945 = vadd.xlane.f32.xlu1 %v1944_v14  ;;  %v1859_v6 = vpop.xlane.xlu0 %1858  ;;  %v1941_v35 = vsel %vm1826_vm4, %v12875_v63, 0.0 }
 0x450   : > { %v1885_v24 = vsub.f32 %v12793_v55, %v1859_v6  ;;  %1942 = vadd.xlane.f32.xlu0 %v1941_v35 }
 0x451   : > { %v1913_v22 = vmul.f32 1.442695, %v1886_v13 }
 0x452   : > { %v1911_v44 = vmul.f32 1.442695, %v1885_v24 }
 0x453   : > { %11507 = vpow2.f32 %v1913_v22 }
 0x454   : > { %11509 = vpow2.f32 %v1911_v44 }
 0x455   : > { %v12883_v17 = vpop.eup %11503 }
 0x456   : > { %v1868_v20 = vpop.xlane.xlu1 %1867  ;;  %v1950_v53 = vsel %vm1826_vm4, %v12883_v17, 0.0 }
 0x457   : > { %v1888_v40 = vsub.f32 %v12801_v3, %v1868_v20  ;;  %1951 = vadd.xlane.f32.xlu1 %v1950_v53  ;;  %v1865_v7 = vpop.xlane.xlu0 %1864 }
 0x458   : > { %v1887_v59 = vsub.f32 %v12805_v27, %v1865_v7 }
 0x459   : > { %v12889_v58 = vpop.eup %11505  ;;  %v1917_v55 = vmul.f32 1.442695, %v1888_v40 }
 0x45a   : > { %v1915_v51 = vmul.f32 1.442695, %v1887_v59  ;;  %v1947_v1 = vsel %vm1826_vm4, %v12889_v58, 0.0 }
 0x45b   : > { %11511 = vpow2.f32 %v1917_v55  ;;  %1948 = vadd.xlane.f32.xlu1 %v1947_v1 }
 0x45c   : > { %11513 = vpow2.f32 %v1915_v51 }
 0x45d   : > { %v12893_v23 = vpop.eup %11507 }
 0x45e   : > { %v12895_v14 = vpop.eup %11509  ;;  %v1956_v3 = vsel %vm1826_vm4, %v12893_v23, 0.0  ;;  %v1874_v22 = vpop.xlane.xlu1 %1873 }
 0x45f   : > { %1957 = vadd.xlane.f32.xlu1 %v1956_v3  ;;  %v1953_v27 = vsel %vm1826_vm4, %v12895_v14, 0.0  ;;  %v1871_v44 = vpop.xlane.xlu0 %1870  ;;  %v1890_v20 = vsub.f32 %v12813_v25, %v1874_v22 }
 0x460   : > { %1954 = vadd.xlane.f32.xlu0 %v1953_v27  ;;  %v1889_v53 = vsub.f32 %v12817_v12, %v1871_v44 }
 0x461   : > { %v1921_v40 = vmul.f32 1.442695, %v1890_v20 }
 0x462   : > { %v1919_v7 = vmul.f32 1.442695, %v1889_v53  ;;  %v12941_v25 = vpop.permute.xlu1 %2742 }
 0x463   : > { %11515 = vpow2.f32 %v1921_v40  ;;  %v12943_v12 = vpop.permute.xlu0 %11116 }
 0x464   : > { %11517 = vpow2.f32 %v1919_v7 }
 0x465   : > { %v12901_v13 = vpop.eup %11511 }
 0x466   : > { %v12903_v6 = vpop.eup %11513  ;;  %v1962_v35 = vsel %vm1826_vm4, %v12901_v13, 0.0 }
 0x467   : > { %1963 = vadd.xlane.f32.xlu1 %v1962_v35  ;;  %v1959_v24 = vsel %vm1826_vm4, %v12903_v6, 0.0 }
 0x468   : > { %1960 = vadd.xlane.f32.xlu0 %v1959_v24 }
 0x46d   : > { %v12915_v59 = vpop.eup %11515 }
 0x46e   : > { %v12917_v55 = vpop.eup %11517  ;;  %v1968_v51 = vsel %vm1826_vm4, %v12915_v59, 0.0 }
 0x46f   : > { %v1965_v1 = vsel %vm1826_vm4, %v12917_v55, 0.0 }
 0x478   : > { %2744 = vrot.lane.b32.xlu1 %v12601_v15, %s12021_s16 }
 0x47e   : > { %2833 = vrot.lane.b32.xlu0 %v12609_v8, %s12021_s16 }
 0x49c   : > { %1969 = vadd.xlane.f32.xlu1 %v1968_v51 }
 0x49d   : > { %1966 = vadd.xlane.f32.xlu0 %v1965_v1 }
 0x4ad   : > { %11121 = vrot.lane.b32.xlu1 %v12669_v18, %s12021_s16 }
 0x4b1   : > { %11126 = vrot.lane.b32.xlu1 %v12683_v30, %s12021_s16 }
 0x4b3   : > { %2835 = vrot.lane.b32.xlu0 %v12625_v41, %s12021_s16 }
 0x4b5   : > { %3017 = vrot.lane.b32.xlu1 %v12667_v5, %s12021_s16 }
 0x4b7   : > { %3015 = vrot.lane.b32.xlu0 %v12641_v48, %s12021_s16 }
 0x4b9   : > { %3106 = vrot.lane.b32.xlu1 %v12661_v0, %s12021_s16 }
 0x4bb   : > { %2924 = vrot.lane.b32.xlu0 %v12633_v47, %s12021_s16 }
 0x4bd   : > { %3108 = vrot.lane.b32.xlu1 %v12681_v4, %s12021_s16 }
 0x4bf   : > { %2926 = vrot.lane.b32.xlu0 %v12653_v11, %s12021_s16 }
 0x4c1   : > { %3199 = vrot.lane.b32.xlu1 %v12696_v39, %s12021_s16 }
 0x4c3   : > { %11131 = vrot.lane.b32.xlu0 %v12698_v36, %s12021_s16 }
 0x4c4   : > { %v1928_v3 = vpop.xlane.xlu1 %1927 }
 0x4c5   : > { %11519 = vrcp.f32 %v1928_v3  ;;  %3290 = vrot.lane.b32.xlu1 %v12709_v43, %s12021_s16  ;;  %v1925_v27 = vpop.xlane.xlu0 %1924 }
 0x4c6   : > { %11521 = vrcp.f32 %v1925_v27 }
 0x4c7   : > { %3197 = vrot.lane.b32.xlu0 %v12675_v26, %s12021_s16 }
 0x4c9   : > { %11141 = vrot.lane.b32.xlu1 %v12581_v21, %s12021_s16 }
 0x4cb   : > { %3288 = vrot.lane.b32.xlu0 %v12689_v34, %s12021_s16 }
 0x4cc   : > { %v1934_v35 = vpop.xlane.xlu0 %1933 }
 0x4cd   : > { %11523 = vrcp.f32 %v1934_v35 }
 0x4cf   : > { %v11520_v24 = vpop.eup %11519  ;;  %11136 = vrot.lane.b32.xlu0 %v12561_v57, %s12021_s16 }
 0x4d0   : > { %v11522_v22 = vpop.eup %11521  ;;  %v1931_v44 = vpop.xlane.xlu0 %1930  ;;  %v1988_v53 = vmul.f32 %v11520_v24, %v12843_v42 }
 0x4d1   : > { %11525 = vrcp.f32 %v1931_v44  ;;  %v1987_v20 = vmul.f32 %v11522_v22, %v12845_v52 }
 0x4d3   : > { %11146 = vrot.lane.b32.xlu0 %v12571_v60, %s12021_s16  ;;  %9992 = vmatprep.mubr.msk.f32.mxu0 %vm1826_vm4, %v1987_v20 }
 0x4d4   : > { %v1940_v40 = vpop.xlane.xlu1 %1939  ;;  %9993 = vmatmul.mubr.msk.f32.vlgmr.msra.gmra.mrb[36].mxu0 %vm1826_vm4, %v1988_v53  ;;  %v11099_v53 = vunpack.i.h.bf16 %v12831_v62 }
 0x4d5   : > { %11527 = vrcp.f32 %v1940_v40  ;;  %10559 = vmatpush3.bf16.msra.mxu0 %v12583_v16  ;;  %v1937_v7 = vpop.xlane.xlu0 %1936  ;;  %v11098_v40 = vunpack.i.l.bf16 %v12831_v62 }
 0x4d6   : > { %10565 = vmatprep.subr.bf16.mxu0 %v12607_v33  ;;  %11529 = vrcp.f32 %v1937_v7 }
 0x4d7   : > { %11151 = vrot.lane.b32.xlu0 %v12605_v32, %s12021_s16  ;;  %v11524_v52 = vpop.eup %11523 }
 0x4d8   : > { %v1990_v27 = vmul.f32 %v11524_v52, %v12853_v19 }
 0x4db   : > { %v11526_v42 = vpop.eup %11525  ;;  %11156 = vrot.lane.b32.xlu0 %v12595_v28, %s12021_s16 }
 0x4dc   : > { %v1946_v51 = vpop.xlane.xlu1 %1945  ;;  %v1989_v1 = vmul.f32 %v11526_v42, %v12859_v9 }
 0x4dd   : > { %11531 = vrcp.f32 %v1946_v51  ;;  %v1943_v3 = vpop.xlane.xlu0 %1942 }
 0x4de   : > { %11533 = vrcp.f32 %v1943_v3  ;;  %9999 = vmatprep.mubr.msk.f32.mxu1 %vm1826_vm4, %v1989_v1  ;;  %v10580_v1 = vpack.c.bf16 %v11099_v53, %v11098_v40 }
 0x4df   : > { %v11528_v16 = vpop.eup %11527  ;;  %11161 = vrot.lane.b32.xlu0 %v12629_v46, %s12021_s16  ;;  %10000 = vmatmul.mubr.msk.f32.vlgmr.msra.gmra.mrb[28].mxu1 %vm1826_vm4, %v1990_v27  ;;  %v14873_v27 = vld [vmem:[#allocation36_spill] sm:$0xff] }
 0x4e0   : > { %v11530_v35 = vpop.eup %11529  ;;  %10563 = vmatpush3.bf16.msra.mxu1 %v12599_v29  ;;  %v1992_v24 = vmul.f32 %v11528_v16, %v12863_v54  ;;  %v11104_v62 = vunpack.i.h.bf16 %v14873_v27  ;;  %v11103_v16 = vunpack.i.l.bf16 %v14873_v27 }
 0x4e1   : > { %10569 = vmatprep.subr.bf16.mxu1 %v12623_v38  ;;  %v1991_v9 = vmul.f32 %v11530_v35, %v12865_v2 }
 0x4e3   : > { %11166 = vrot.lane.b32.xlu0 %v12619_v37, %s12021_s16  ;;  %10006 = vmatprep.mubr.msk.f32.mxu0 %vm1826_vm4, %v1991_v9  ;;  %v10586_v9 = vpack.c.bf16 %v11104_v62, %v11103_v16 }
 0x4e4   : > { %v1952_v19 = vpop.xlane.xlu1 %1951  ;;  %10007 = vmatmul.mubr.msk.f32.vlgmr.msra.gmra.mrb[38].mxu0 %vm1826_vm4, %v1992_v24 }
 0x4e5   : > { %10567 = vmatpush3.bf16.msra.mxu0 %v12607_v33  ;;  %11535 = vrcp.f32 %v1952_v19 }
 0x4e6   : > { %10573 = vmatprep.subr.bf16.mxu0 %v12631_v45 }
 0x4e7   : > { %v11532_v22 = vpop.eup %11531  ;;  %11171 = vrot.lane.b32.xlu0 %v12645_v10, %s12021_s16 }
 0x4e8   : > { %v11534_v29 = vpop.eup %11533  ;;  %v1949_v2 = vpop.xlane.xlu1 %1948  ;;  %v1994_v44 = vmul.f32 %v11532_v22, %v12873_v50 }
 0x4e9   : > { %11537 = vrcp.f32 %v1949_v2  ;;  %v1993_v54 = vmul.f32 %v11534_v29, %v12875_v63 }
 0x4eb   : > { %11176 = vrot.lane.b32.xlu0 %v12559_v56, %s12022_s3  ;;  %10013 = vmatprep.mubr.msk.f32.mxu1 %vm1826_vm4, %v1993_v54  ;;  %v11119_v54 = vunpack.i.h.bf16 %v12943_v12 }
 0x4ec   : > { %v1958_v33 = vpop.xlane.xlu1 %1957  ;;  %10014 = vmatmul.mubr.msk.f32.vlgmr.msra.gmra.mrb[30].mxu1 %vm1826_vm4, %v1994_v44 }
 0x4ed   : > { %11539 = vrcp.f32 %v1958_v33  ;;  %10571 = vmatpush3.bf16.msra.mxu1 %v12623_v38  ;;  %v1955_v20 = vpop.xlane.xlu0 %1954  ;;  %v14877_v33 = vld [vmem:[#allocation39_spill] sm:$0xff] }
 0x4ee   : > { %10577 = vmatprep.subr.bf16.mxu1 %v12649_v49  ;;  %11541 = vrcp.f32 %v1955_v20 }
 0x4ef   : > { %11181 = vrot.lane.b32.xlu0 %v12579_v61, %s12022_s3  ;;  %v11536_v50 = vpop.eup %11535 }
 0x4f0   : > { %v1996_v42 = vmul.f32 %v11536_v50, %v12883_v17 }
 0x4f3   : > { %v11538_v63 = vpop.eup %11537  ;;  %11186 = vrot.lane.b32.xlu0 %v12603_v31, %s12022_s3 }
 0x4f4   : > { %v1964_v7 = vpop.xlane.xlu1 %1963  ;;  %v1995_v52 = vmul.f32 %v11538_v63, %v12889_v58 }
 0x4f5   : > { %11543 = vrcp.f32 %v1964_v7  ;;  %v1961_v38 = vpop.xlane.xlu0 %1960 }
 0x4f6   : > { %11545 = vrcp.f32 %v1961_v38  ;;  %10020 = vmatprep.mubr.msk.f32.mxu0 %vm1826_vm4, %v1995_v52 }
 0x4f7   : > { %v11540_v51 = vpop.eup %11539  ;;  %10021 = vmatmul.mubr.msk.f32.vlgmr.msra.gmra.mrb[40].mxu0 %vm1826_vm4, %v1996_v42 }
 0x4f8   : > { %v11542_v3 = vpop.eup %11541  ;;  %10575 = vmatpush3.bf16.msra.mxu0 %v12631_v45  ;;  %v1998_v17 = vmul.f32 %v11540_v51, %v12893_v23  ;;  %v14875_v45 = vld [vmem:[#allocation37_spill] sm:$0xff]  ;;  %v2745_v20 = vpop.permute.xlu1 %2744 }
 0x4f9   : > { %10582 = vmatprep.subr.msk.bf16.mxu0 %vm12555_vm1, %v10580_v1  ;;  %v1997_v58 = vmul.f32 %v11542_v3, %v12895_v14  ;;  %v11109_v22 = vunpack.i.h.bf16 %v14875_v45  ;;  %v11108_v29 = vunpack.i.l.bf16 %v14875_v45  ;;  %v14878_v3 = vld [vmem:[#allocation38_spill] sm:$0xff] }
 0x4fa   : > { %v11114_v27 = vunpack.i.h.bf16 %v14878_v3  ;;  %v11113_v62 = vunpack.i.l.bf16 %v14878_v3 }
 0x4fb   : > { %10027 = vmatprep.mubr.msk.f32.mxu1 %vm1826_vm4, %v1997_v58  ;;  %v10592_v2 = vpack.c.bf16 %v11109_v22, %v11108_v29 }
 0x4fc   : > { %10028 = vmatmul.mubr.msk.f32.vlgmr.msra.gmra.mrb[32].mxu1 %vm1826_vm4, %v1998_v17 }
 0x4fd   : > { %10579 = vmatpush3.bf16.msra.mxu1 %v12649_v49  ;;  %v14876_v49 = vld [vmem:[#allocation35_spill] sm:$0xff] }
 0x4fe   : > { %10588 = vmatprep.subr.msk.bf16.mxu1 %vm12555_vm1, %v10586_v9 }
 0x4ff   : > { %v11544_v24 = vpop.eup %11543 }
 0x500   : > { %v11546_v19 = vpop.eup %11545  ;;  %v2000_v23 = vmul.f32 %v11544_v24, %v12901_v13  ;;  %v2834_v13 = vpop.permute.xlu0 %2833 }
 0x501   : > { %v1999_v14 = vmul.f32 %v11546_v19, %v12903_v6  ;;  %v11118_v6 = vunpack.i.l.bf16 %v12943_v12  ;;  %v10598_v19 = vpack.c.bf16 %v11114_v27, %v11113_v62 }
 0x503   : > { %10034 = vmatprep.mubr.msk.f32.mxu0 %vm1826_vm4, %v1999_v14  ;;  %v10604_v44 = vpack.c.bf16 %v11119_v54, %v11118_v6 }
 0x504   : > { %10035 = vmatmul.mubr.msk.f32.vlgmr.msra.gmra.mrb[42].mxu0 %vm1826_vm4, %v2000_v23 }
 0x505   : > { %10585 = vmatpush3.bf16.xpose.msk.msra.mxu0 %vm12555_vm1, %v10580_v1  ;;  %10048 = vmatprep.mubr.msk.f32.mxu0 %vm1109_vm0, %v14876_v49 }
 0x506   : > { %10594 = vmatprep.subr.msk.bf16.mxu0 %vm12555_vm1, %v10592_v2 }
 0x50c   : > { %10049 = vmatmul.mubr.msk.f32.vlgmr.msra.gmra.mrb[44].mxu0 %vm1109_vm0, %v14877_v33 }
 0x50d   : > { %10597 = vmatpush3.bf16.xpose.msk.msra.mxu0 %vm12555_vm1, %v10592_v2  ;;  %10062 = vmatprep.mubr.msk.f32.mxu0 %vm1109_vm0, %v2834_v13 }
 0x50e   : > { %10606 = vmatprep.subr.msk.bf16.mxu0 %vm12555_vm1, %v10604_v44 }
 0x529   : > { %v1970_v50 = vpop.xlane.xlu1 %1969 }
 0x52a   : > { %11547 = vrcp.f32 %v1970_v50  ;;  %v1967_v63 = vpop.xlane.xlu0 %1966 }
 0x52b   : > { %11549 = vrcp.f32 %v1967_v63 }
 0x52d   : > { %v11122_v53 = vpop.permute.xlu1 %11121 }
 0x52e   : > { %v2836_v12 = vpop.permute.xlu0 %2835  ;;  %v11123_v22 = vunpack.i.l.bf16 %v11122_v53 }
 0x52f   : > { %10063 = vmatmul.mubr.msk.f32.vlgmr.msra.gmra.mrb[46].mxu0 %vm1109_vm0, %v2836_v12 }
 0x530   : > { %10609 = vmatpush3.bf16.xpose.msk.msra.mxu0 %vm12555_vm1, %v10604_v44 }
 0x531   : > { %v11127_v40 = vpop.permute.xlu1 %11126 }
 0x532   : > { %v11129_v7 = vunpack.i.h.bf16 %v11127_v40  ;;  %v11128_v52 = vunpack.i.l.bf16 %v11127_v40  ;;  %v3016_v38 = vpop.permute.xlu0 %3015 }
 0x533   : > { %10076 = vmatprep.mubr.msk.f32.mxu0 %vm1109_vm0, %v3016_v38 }
 0x534   : > { %v11548_v42 = vpop.eup %11547  ;;  %v10616_v51 = vpack.c.bf16 %v11129_v7, %v11128_v52 }
 0x535   : > { %v11550_v1 = vpop.eup %11549  ;;  %v3018_v16 = vpop.permute.xlu1 %3017  ;;  %v2002_v24 = vmul.f32 %v11548_v42, %v12915_v59  ;;  %v11124_v59 = vunpack.i.h.bf16 %v11122_v53 }
 0x536   : > { %v2925_v58 = vpop.permute.xlu0 %2924  ;;  %10618 = vmatprep.subr.msk.bf16.mxu0 %vm12555_vm1, %v10616_v51  ;;  %v2001_v17 = vmul.f32 %v11550_v1, %v12917_v55 }
 0x537   : > { %10077 = vmatmul.mubr.msk.f32.vlgmr.msra.gmra.mrb[48].mxu0 %vm1109_vm0, %v3018_v16  ;;  %v10610_v23 = vpack.c.bf16 %v11124_v59, %v11123_v22 }
 0x538   : > { %10621 = vmatpush3.bf16.xpose.msk.msra.mxu0 %vm12555_vm1, %v10616_v51  ;;  %10041 = vmatprep.mubr.msk.f32.mxu1 %vm1826_vm4, %v2001_v17 }
 0x539   : > { %v3107_v45 = vpop.permute.xlu1 %3106  ;;  %10042 = vmatmul.mubr.msk.f32.vlgmr.msra.gmra.mrb[34].mxu1 %vm1826_vm4, %v2002_v24 }
 0x53a   : > { %10591 = vmatpush3.bf16.xpose.msk.msra.mxu1 %vm12555_vm1, %v10586_v9  ;;  %10055 = vmatprep.mubr.msk.f32.mxu1 %vm1109_vm0, %v12941_v25  ;;  %v2927_v55 = vpop.permute.xlu0 %2926 }
 0x53b   : > { %10600 = vmatprep.subr.msk.bf16.mxu1 %vm12555_vm1, %v10598_v19 }
 0x53d   : > { %v3109_v29 = vpop.permute.xlu1 %3108 }
 0x53e   : > { %v11132_v14 = vpop.permute.xlu0 %11131 }
 0x53f   : > { %v11134_v25 = vunpack.i.h.bf16 %v11132_v14  ;;  %v11133_v49 = vunpack.i.l.bf16 %v11132_v14 }
 0x541   : > { %10056 = vmatmul.mubr.msk.f32.vlgmr.msra.gmra.mrb[36].mxu1 %vm1109_vm0, %v2745_v20  ;;  %v3200_v2 = vpop.permute.xlu1 %3199  ;;  %v10622_v44 = vpack.c.bf16 %v11134_v25, %v11133_v49 }
 0x542   : > { %10603 = vmatpush3.bf16.xpose.msk.msra.mxu1 %vm12555_vm1, %v10598_v19  ;;  %10069 = vmatprep.mubr.msk.f32.mxu1 %vm1109_vm0, %v2925_v58  ;;  %v3198_v9 = vpop.permute.xlu0 %3197 }
 0x543   : > { %10612 = vmatprep.subr.msk.bf16.mxu1 %vm12555_vm1, %v10610_v23  ;;  %10090 = vmatprep.mubr.msk.f32.mxu0 %vm1109_vm0, %v3198_v9 }
 0x544   : > { %10091 = vmatmul.mubr.msk.f32.vlgmr.msra.gmra.mrb[50].mxu0 %vm1109_vm0, %v3200_v2 }
 0x545   : > { %v3291_v54 = vpop.permute.xlu1 %3290 }
 0x546   : > { %v3289_v6 = vpop.permute.xlu0 %3288 }
 0x549   : > { %10070 = vmatmul.mubr.msk.f32.vlgmr.msra.gmra.mrb[38].mxu1 %vm1109_vm0, %v2927_v55  ;;  %v11142_v13 = vpop.permute.xlu1 %11141 }
 0x54a   : > { %10615 = vmatpush3.bf16.xpose.msk.msra.mxu1 %vm12555_vm1, %v10610_v23  ;;  %10083 = vmatprep.mubr.msk.f32.mxu1 %vm1109_vm0, %v3107_v45  ;;  %v11137_v33 = vpop.permute.xlu0 %11136  ;;  %v11144_v20 = vunpack.i.h.bf16 %v11142_v13  ;;  %v11143_v50 = vunpack.i.l.bf16 %v11142_v13 }
 0x54b   : > { %v11139_v63 = vunpack.i.h.bf16 %v11137_v33  ;;  %v11138_v53 = vunpack.i.l.bf16 %v11137_v33  ;;  %10624 = vmatprep.subr.msk.bf16.mxu1 %vm12555_vm1, %v10622_v44 }
 0x54c   : > { %v13075_v38 = vpack.c.bf16 %v11144_v20, %v11143_v50 }
 0x54d   : > { %v10628_v12 = vpack.c.bf16 %v11139_v63, %v11138_v53 }
 0x54e   : > { %v11147_v40 = vpop.permute.xlu0 %11146 }
 0x54f   : > { %v11149_v7 = vunpack.i.h.bf16 %v11147_v40  ;;  %v11148_v52 = vunpack.i.l.bf16 %v11147_v40  ;;  %10629 = vmatprep.subr.bf16.mxu0 %v10628_v12 }
 0x550   : > { %10631 = vmatpush3.bf16.msra.mxu0 %v10628_v12 }
 0x551   : > { %10084 = vmatmul.mubr.msk.f32.vlgmr.msra.gmra.mrb[40].mxu1 %vm1109_vm0, %v3109_v29  ;;  %10637 = vmatprep.subr.bf16.mxu0 %v13075_v38  ;;  %v10632_v42 = vpack.c.bf16 %v11149_v7, %v11148_v52 }
 0x552   : > { %10627 = vmatpush3.bf16.xpose.msk.msra.mxu1 %vm12555_vm1, %v10622_v44  ;;  %10097 = vmatprep.mubr.msk.f32.mxu1 %vm1109_vm0, %v3289_v6  ;;  %v13082_v51 = vpop.permute.xlu0 %11151 }
 0x553   : > { %10633 = vmatprep.subr.bf16.mxu1 %v10632_v42 }
 0x556   : > { %v11157_v1 = vpop.permute.xlu0 %11156 }
 0x557   : > { %v11159_v3 = vunpack.i.h.bf16 %v11157_v1  ;;  %v11158_v27 = vunpack.i.l.bf16 %v11157_v1 }
 0x559   : > { %10098 = vmatmul.mubr.msk.f32.vlgmr.msra.gmra.mrb[42].mxu1 %vm1109_vm0, %v3291_v54  ;;  %v13085_v62 = vpack.c.bf16 %v11159_v3, %v11158_v27 }
 0x55a   : > { %10635 = vmatpush3.bf16.msra.mxu1 %v10632_v42 }
 0x55b   : > { %10641 = vmatprep.subr.bf16.mxu1 %v13085_v62 }
 0x5a7   : > { %v13088_v16 = vpop.f32.mrb[36].mxu0 }
 0x5a8   : > { %14879 = vst [vmem:[#allocation36_spill] sm:$0xff] %v13088_v16  ;;  %v13090_v58 = vpop.f32.mrb[37].mxu0 }
 0x5a9   : > { %14880 = vst [vmem:[#allocation19_spill] sm:$0xff] %v13090_v58  ;;  %v14900_v58 = vld [vmem:[#allocation27_spill] sm:$0xff] }
 0x5b2   : > { %v13092_v17 = vpop.f32.mrb[28].mxu1 }
 0x5b3   : > { %14881 = vst [vmem:[#allocation37_spill] sm:$0xff] %v13092_v17  ;;  %v13094_v24 = vpop.f32.mrb[29].mxu1 }
 0x5b4   : > { %14882 = vst [vmem:[#allocation35_spill] sm:$0xff] %v13094_v24  ;;  %v14899_v24 = vld [vmem:[#allocation25_spill] sm:$0xff] }
 0x5b7   : > { %v13096_v19 = vpop.f32.mrb[38].mxu0 }
 0x5b8   : > { %14883 = vst [vmem:[#allocation39_spill] sm:$0xff] %v13096_v19  ;;  %v13098_v45 = vpop.f32.mrb[39].mxu0 }
 0x5b9   : > { %14884 = vst [vmem:[#allocation38_spill] sm:$0xff] %v13098_v45 }
 0x5bf   : > { %v13100_v55 = vpop.f32.mrb[30].mxu1 }
 0x5c0   : > { %14885 = vst [vmem:[#allocation40_spill] sm:$0xff] %v13100_v55  ;;  %v13102_v59 = vpop.f32.mrb[31].mxu1 }
 0x5c1   : > { %14886 = vst [vmem:[#allocation41_spill] sm:$0xff] %v13102_v59 }
 0x5ca   : > { %v13104_v22 = vpop.f32.mrb[40].mxu0 }
 0x5cb   : > { %14887 = vst [vmem:[#allocation42_spill] sm:$0xff] %v13104_v22  ;;  %v13106_v29 = vpop.f32.mrb[41].mxu0  ;;  %v14897_v22 = vld [vmem:[#allocation18_spill] sm:$0xff] }
 0x5cc   : > { %14888 = vst [vmem:[#allocation43_spill] sm:$0xff] %v13106_v29  ;;  %v13216_v29 = vpop.permute.xlu0 %11161 }
 0x5cf   : > { %v13108_v14 = vpop.f32.mrb[32].mxu1 }
 0x5d0   : > { %14889 = vst [vmem:[#allocation44_spill] sm:$0xff] %v13108_v14  ;;  %v13110_v23 = vpop.f32.mrb[33].mxu1  ;;  %v13222_v55 = vpop.permute.xlu0 %11166 }
 0x5d1   : > { %14890 = vst [vmem:[#allocation45_spill] sm:$0xff] %v13110_v23 }
 0x5d4   : > { %v13224_v59 = vpop.permute.xlu0 %11171 }
 0x5d7   : > { %v13112_v2 = vpop.f32.mrb[42].mxu0 }
 0x5d8   : > { %14891 = vst [vmem:[#allocation46_spill] sm:$0xff] %v13112_v2  ;;  %v13114_v9 = vpop.f32.mrb[43].mxu0  ;;  %v13227_v45 = vpop.permute.xlu0 %11176 }
 0x5d9   : > { %14892 = vst [vmem:[#allocation47_spill] sm:$0xff] %v13114_v9 }
 0x5dc   : > { %v13229_v17 = vpop.permute.xlu0 %11181 }
 0x5df   : > { %v10050_v25 = vpop.f32.mrb[44].mxu0 }
 0x5e0   : > { %v13118_v54 = vsel %vm12718_vm2, %v10050_v25, -1e+30  ;;  %v2733_v6 = vpop.f32.mrb[45].mxu0 }
 0x5e1   : > { %v13122_v13 = vsel %vm12723_vm3, %v2733_v6, -1e+30  ;;  %v3398_v33 = vsel %vm1826_vm4, %v13118_v54, -inf }
 0x5e2   : > { %v3395_v20 = vsel %vm1826_vm4, %v13122_v13, -inf  ;;  %3399 = vmax.xlane.f32.xlu1 %v3398_v33 }
 0x5e3   : > { %3396 = vmax.xlane.f32.xlu0 %v3395_v20 }
 0x602   : > { %v10064_v50 = vpop.f32.mrb[46].mxu0 }
 0x603   : > { %v13130_v63 = vsel %vm12718_vm2, %v10064_v50, -1e+30  ;;  %v2915_v53 = vpop.f32.mrb[47].mxu0 }
 0x604   : > { %v3410_v12 = vsel %vm1826_vm4, %v13130_v63, -inf  ;;  %v13152_v20 = vsel %vm12723_vm3, %v2915_v53, -1e+30 }
 0x605   : > { %3411 = vmax.xlane.f32.xlu0 %v3410_v12 }
 0x60a   : > { %v10078_v40 = vpop.f32.mrb[48].mxu0 }
 0x60b   : > { %v13136_v7 = vsel %vm12718_vm2, %v10078_v40, -1e+30  ;;  %v3097_v52 = vpop.f32.mrb[49].mxu0  ;;  %v3407_v40 = vsel %vm1826_vm4, %v13152_v20, -inf }
 0x60c   : > { %v13138_v42 = vpop.f32.mrb[34].mxu1  ;;  %v3422_v1 = vsel %vm1826_vm4, %v13136_v7, -inf  ;;  %v13170_v2 = vsel %vm12723_vm3, %v3097_v52, -1e+30 }
 0x60d   : > { %14895 = vst [vmem:[#allocation33_spill] sm:$0xff] %v13138_v42  ;;  %3423 = vmax.xlane.f32.xlu1 %v3422_v1  ;;  %v13142_v3 = vpop.f32.mrb[35].mxu1 }
 0x60e   : > { %14896 = vst [vmem:[#allocation34_spill] sm:$0xff] %v13142_v3 }
 0x614   : > { %v10057_v27 = vpop.f32.mrb[36].mxu1 }
 0x615   : > { %v13146_v25 = vsel %vm12718_vm2, %v10057_v27, -1e+30  ;;  %v2824_v6 = vpop.f32.mrb[37].mxu1 }
 0x616   : > { %v3404_v33 = vsel %vm1826_vm4, %v13146_v25, -inf  ;;  %v13158_v1 = vsel %vm12723_vm3, %v2824_v6, -1e+30 }
 0x617   : > { %3405 = vmax.xlane.f32.xlu0 %v3404_v33  ;;  %v10092_v50 = vpop.f32.mrb[50].mxu0  ;;  %v3401_v53 = vsel %vm1826_vm4, %v13158_v1, -inf }
 0x618   : > { %v3279_v12 = vpop.f32.mrb[51].mxu0 }
 0x61b   : > { %3408 = vmax.xlane.f32.xlu0 %v3407_v40  ;;  %v3419_v40 = vsel %vm1826_vm4, %v13170_v2, -inf }
 0x61c   : > { %v10071_v27 = vpop.f32.mrb[38].mxu1 }
 0x61d   : > { %v13162_v42 = vsel %vm12718_vm2, %v10071_v27, -1e+30  ;;  %v3006_v3 = vpop.f32.mrb[39].mxu1 }
 0x61e   : > { %v3416_v33 = vsel %vm1826_vm4, %v13162_v42, -inf  ;;  %v13174_v6 = vsel %vm12723_vm3, %v3006_v3, -1e+30 }
 0x61f   : > { %3402 = vmax.xlane.f32.xlu0 %v3401_v53  ;;  %3417 = vmax.xlane.f32.xlu1 %v3416_v33  ;;  %v3413_v27 = vsel %vm1826_vm4, %v13174_v6, -inf  ;;  %v13192_v33 = vsel %vm12718_vm2, %v10092_v50, -1e+30 }
 0x623   : > { %3414 = vmax.xlane.f32.xlu0 %v3413_v27  ;;  %3420 = vmax.xlane.f32.xlu1 %v3419_v40  ;;  %v3434_v27 = vsel %vm1826_vm4, %v13192_v33, -inf }
 0x624   : > { %v10085_v9 = vpop.f32.mrb[40].mxu1 }
 0x625   : > { %v13182_v14 = vsel %vm12718_vm2, %v10085_v9, -1e+30  ;;  %v3188_v52 = vpop.f32.mrb[41].mxu1  ;;  %v13198_v9 = vsel %vm12723_vm3, %v3279_v12, -1e+30 }
 0x626   : > { %v3428_v3 = vsel %vm1826_vm4, %v13182_v14, -inf  ;;  %v13188_v53 = vsel %vm12723_vm3, %v3188_v52, -1e+30  ;;  %v3431_v52 = vsel %vm1826_vm4, %v13198_v9, -inf }
 0x627   : > { %v3425_v40 = vsel %vm1826_vm4, %v13188_v53, -inf  ;;  %3429 = vmax.xlane.f32.xlu1 %v3428_v3  ;;  %v14898_v3 = vld [vmem:[#allocation21_spill] sm:$0xff] }
 0x628   : > { %3426 = vmax.xlane.f32.xlu0 %v3425_v40 }
 0x62b   : > { %3435 = vmax.xlane.f32.xlu1 %v3434_v27 }
 0x62c   : > { %v10099_v23 = vpop.f32.mrb[42].mxu1  ;;  %3432 = vmax.xlane.f32.xlu0 %v3431_v52 }
 0x62d   : > { %v3370_v50 = vpop.f32.mrb[43].mxu1  ;;  %v13210_v12 = vsel %vm12718_vm2, %v10099_v23, -1e+30 }
 0x62e   : > { %v13214_v40 = vsel %vm12723_vm3, %v3370_v50, -1e+30  ;;  %v3440_v27 = vsel %vm1826_vm4, %v13210_v12, -inf }
 0x62f   : > { %v3437_v52 = vsel %vm1826_vm4, %v13214_v40, -inf }
 0x63c   : > { %4283 = vrot.lane.b32.xlu1 %v14897_v22, %s12022_s3 }
 0x642   : > { %4285 = vrot.lane.b32.xlu0 %v14898_v3, %s12022_s3 }
 0x660   : > { %3441 = vmax.xlane.f32.xlu1 %v3440_v27  ;;  %v13235_v27 = vpop.permute.xlu0 %11186 }
 0x661   : > { %3438 = vmax.xlane.f32.xlu0 %v3437_v52 }
 0x66f   : > { %v3400_v23 = vpop.xlane.xlu1 %3399 }
 0x670   : > { %v3444_v19 = vsub.f32 %v13118_v54, %v3400_v23  ;;  %v3397_v54 = vpop.xlane.xlu0 %3396 }
 0x672   : > { %v3461_v50 = vmul.f32 1.442695, %v3444_v19  ;;  %v3443_v19 = vsub.f32 %v13122_v13, %v3397_v54 }
 0x674   : > { %11551 = vpow2.f32 %v3461_v50  ;;  %v3459_v23 = vmul.f32 1.442695, %v3443_v19 }
 0x676   : > { %11553 = vpow2.f32 %v3459_v23 }
 0x677   : > { %11191 = vrot.lane.b32.xlu0 %v14899_v24, %s12022_s3 }
 0x67b   : > { %11196 = vrot.lane.b32.xlu0 %v14900_v58, %s12022_s3 }
 0x67e   : > { %v13237_v52 = vpop.eup %11551 }
 0x67f   : > { %v3494_v16 = vsel %vm1826_vm4, %v13237_v52, 0.0 }
 0x680   : > { %3495 = vadd.xlane.f32.xlu1 %v3494_v16  ;;  %v13243_v3 = vpop.eup %11553 }
 0x681   : > { %v3491_v58 = vsel %vm1826_vm4, %v13243_v3, 0.0 }
 0x692   : > { %v3412_v50 = vpop.xlane.xlu0 %3411 }
 0x693   : > { %v3448_v31 = vsub.f32 %v13130_v63, %v3412_v50 }
 0x695   : > { %v3469_v24 = vmul.f32 1.442695, %v3448_v31 }
 0x697   : > { %11555 = vpow2.f32 %v3469_v24 }
 0x69a   : > { %v3424_v22 = vpop.xlane.xlu1 %3423  ;;  %3492 = vadd.xlane.f32.xlu0 %v3491_v58 }
 0x69b   : > { %v3452_v61 = vsub.f32 %v13136_v7, %v3424_v22 }
 0x69d   : > { %v3477_v16 = vmul.f32 1.442695, %v3452_v61 }
 0x69f   : > { %11557 = vpow2.f32 %v3477_v16 }
 0x6a1   : > { %v13248_v56 = vpop.eup %11555 }
 0x6a2   : > { %v3506_v13 = vsel %vm1826_vm4, %v13248_v56, 0.0 }
 0x6a3   : > { %3507 = vadd.xlane.f32.xlu1 %v3506_v13 }
 0x6a4   : > { %v3406_v63 = vpop.xlane.xlu0 %3405 }
 0x6a5   : > { %v3446_v31 = vsub.f32 %v13146_v25, %v3406_v63 }
 0x6a7   : > { %v3465_v54 = vmul.f32 1.442695, %v3446_v31 }
 0x6a8   : > { %v3409_v24 = vpop.xlane.xlu0 %3408 }
 0x6a9   : > { %v13253_v19 = vpop.eup %11557  ;;  %11559 = vpow2.f32 %v3465_v54  ;;  %v3447_v58 = vsub.f32 %v13152_v20, %v3409_v24 }
 0x6aa   : > { %v3518_v61 = vsel %vm1826_vm4, %v13253_v19, 0.0 }
 0x6ab   : > { %v3467_v22 = vmul.f32 1.442695, %v3447_v58  ;;  %3519 = vadd.xlane.f32.xlu1 %v3518_v61 }
 0x6ac   : > { %v3403_v7 = vpop.xlane.xlu0 %3402  ;;  %v3418_v23 = vpop.xlane.xlu1 %3417 }
 0x6ad   : > { %11561 = vpow2.f32 %v3467_v22  ;;  %v3445_v50 = vsub.f32 %v13158_v1, %v3403_v7  ;;  %v3450_v16 = vsub.f32 %v13162_v42, %v3418_v23 }
 0x6af   : > { %v3463_v25 = vmul.f32 1.442695, %v3445_v50  ;;  %v3473_v13 = vmul.f32 1.442695, %v3450_v16 }
 0x6b0   : > { %v3415_v63 = vpop.xlane.xlu0 %3414  ;;  %v3421_v31 = vpop.xlane.xlu1 %3420 }
 0x6b1   : > { %11563 = vpow2.f32 %v3463_v25  ;;  %v3449_v54 = vsub.f32 %v13174_v6, %v3415_v63  ;;  %v3451_v20 = vsub.f32 %v13170_v2, %v3421_v31 }
 0x6b2   : > { %11565 = vpow2.f32 %v3473_v13 }
 0x6b3   : > { %v13262_v24 = vpop.eup %11559  ;;  %v3471_v58 = vmul.f32 1.442695, %v3449_v54  ;;  %v3475_v61 = vmul.f32 1.442695, %v3451_v20 }
 0x6b4   : > { %v3430_v10 = vpop.xlane.xlu1 %3429  ;;  %v3500_v1 = vsel %vm1826_vm4, %v13262_v24, 0.0 }
 0x6b5   : > { %11567 = vpow2.f32 %v3471_v58  ;;  %v3454_v42 = vsub.f32 %v13182_v14, %v3430_v10  ;;  %v3427_v22 = vpop.xlane.xlu0 %3426  ;;  %3501 = vadd.xlane.f32.xlu0 %v3500_v1 }
 0x6b6   : > { %11569 = vpow2.f32 %v3475_v61  ;;  %v3453_v7 = vsub.f32 %v13188_v53, %v3427_v22 }
 0x6b7   : > { %v13268_v6 = vpop.eup %11561  ;;  %v3481_v2 = vmul.f32 1.442695, %v3454_v42 }
 0x6b8   : > { %v3479_v23 = vmul.f32 1.442695, %v3453_v7  ;;  %v3436_v50 = vpop.xlane.xlu1 %3435  ;;  %v3503_v16 = vsel %vm1826_vm4, %v13268_v6, 0.0 }
 0x6b9   : > { %11571 = vpow2.f32 %v3481_v2  ;;  %v3456_v25 = vsub.f32 %v13192_v33, %v3436_v50  ;;  %3504 = vadd.xlane.f32.xlu0 %v3503_v16  ;;  %v3433_v13 = vpop.xlane.xlu0 %3432 }
 0x6ba   : > { %11573 = vpow2.f32 %v3479_v23  ;;  %v3455_v10 = vsub.f32 %v13198_v9, %v3433_v13 }
 0x6bb   : > { %v13274_v14 = vpop.eup %11563  ;;  %v3485_v63 = vmul.f32 1.442695, %v3456_v25  ;;  %v14901_v25 = vld [vmem:[#allocation23_spill] sm:$0xff] }
 0x6bc   : > { %v13276_v53 = vpop.eup %11565  ;;  %v3483_v31 = vmul.f32 1.442695, %v3455_v10  ;;  %v3497_v54 = vsel %vm1826_vm4, %v13274_v14, 0.0  ;;  %v13316_v13 = vpop.permute.xlu1 %4283 }
 0x6bd   : > { %11575 = vpow2.f32 %v3485_v63  ;;  %v3512_v20 = vsel %vm1826_vm4, %v13276_v53, 0.0  ;;  %3498 = vadd.xlane.f32.xlu0 %v3497_v54  ;;  %v13318_v10 = vpop.permute.xlu0 %4285 }
 0x6be   : > { %11577 = vpow2.f32 %v3483_v31  ;;  %3513 = vadd.xlane.f32.xlu1 %v3512_v20 }
 0x6bf   : > { %v13282_v33 = vpop.eup %11567 }
 0x6c0   : > { %v13284_v58 = vpop.eup %11569  ;;  %v3509_v9 = vsel %vm1826_vm4, %v13282_v33, 0.0 }
 0x6c1   : > { %v3515_v61 = vsel %vm1826_vm4, %v13284_v58, 0.0  ;;  %3510 = vadd.xlane.f32.xlu0 %v3509_v9 }
 0x6c2   : > { %3516 = vadd.xlane.f32.xlu1 %v3515_v61 }
 0x6c3   : > { %v13290_v1 = vpop.eup %11571 }
 0x6c4   : > { %v13292_v42 = vpop.eup %11573  ;;  %v3524_v22 = vsel %vm1826_vm4, %v13290_v1, 0.0 }
 0x6c5   : > { %v3521_v7 = vsel %vm1826_vm4, %v13292_v42, 0.0 }
 0x6c6   : > { %3525 = vadd.xlane.f32.xlu1 %v3524_v22  ;;  %3522 = vadd.xlane.f32.xlu0 %v3521_v7 }
 0x6c7   : > { %v13298_v2 = vpop.eup %11575 }
 0x6c8   : > { %v13300_v23 = vpop.eup %11577  ;;  %v3530_v50 = vsel %vm1826_vm4, %v13298_v2, 0.0 }
 0x6c9   : > { %v3527_v16 = vsel %vm1826_vm4, %v13300_v23, 0.0 }
 0x6ca   : > { %3531 = vadd.xlane.f32.xlu1 %v3530_v50  ;;  %3528 = vadd.xlane.f32.xlu0 %v3527_v16 }
 0x6db   : > { %4376 = vrot.lane.b32.xlu1 %v12601_v15, %s12022_s3 }
 0x6df   : > { %11201 = vrot.lane.b32.xlu1 %v12669_v18, %s12022_s3 }
 0x6e0   : > { %4374 = vrot.lane.b32.xlu0 %v14901_v25, %s12022_s3 }
 0x6e4   : > { %4465 = vrot.lane.b32.xlu0 %v12609_v8, %s12022_s3 }
 0x6e8   : > { %4467 = vrot.lane.b32.xlu0 %v12625_v41, %s12022_s3 }
 0x6ec   : > { %4647 = vrot.lane.b32.xlu0 %v12641_v48, %s12022_s3 }
 0x6ed   : > { %v3442_v63 = vpop.xlane.xlu1 %3441 }
 0x6ee   : > { %v3458_v31 = vsub.f32 %v13210_v12, %v3442_v63  ;;  %v3439_v54 = vpop.xlane.xlu0 %3438 }
 0x6ef   : > { %v3457_v9 = vsub.f32 %v13214_v40, %v3439_v54 }
 0x6f0   : > { %4556 = vrot.lane.b32.xlu0 %v12633_v47, %s12022_s3  ;;  %v3489_v20 = vmul.f32 1.442695, %v3458_v31 }
 0x6f1   : > { %v3487_v61 = vmul.f32 1.442695, %v3457_v9  ;;  %v11154_v9 = vunpack.i.h.bf16 %v13082_v51 }
 0x6f2   : > { %11579 = vpow2.f32 %v3489_v20  ;;  %v13346_v50 = vpop.permute.xlu0 %11191 }
 0x6f3   : > { %11581 = vpow2.f32 %v3487_v61  ;;  %v11153_v61 = vunpack.i.l.bf16 %v13082_v51 }
 0x6f4   : > { %4558 = vrot.lane.b32.xlu0 %v12653_v11, %s12022_s3 }
 0x6f6   : > { %v13350_v16 = vpop.permute.xlu0 %11196 }
 0x6f8   : > { %11211 = vrot.lane.b32.xlu0 %v12698_v36, %s12022_s3 }
 0x6fc   : > { %4829 = vrot.lane.b32.xlu0 %v12675_v26, %s12022_s3  ;;  %v13332_v12 = vpop.eup %11579 }
 0x6fd   : > { %v3536_v40 = vsel %vm1826_vm4, %v13332_v12, 0.0  ;;  %v13338_v22 = vpop.eup %11581 }
 0x6fe   : > { %v3533_v7 = vsel %vm1826_vm4, %v13338_v22, 0.0 }
 0x700   : > { %4920 = vrot.lane.b32.xlu0 %v12689_v34, %s12022_s3 }
 0x703   : > { %3537 = vadd.xlane.f32.xlu1 %v3536_v40 }
 0x707   : > { %3534 = vadd.xlane.f32.xlu1 %v3533_v7 }
 0x70d   : > { %v3496_v63 = vpop.xlane.xlu1 %3495 }
 0x70e   : > { %11583 = vrcp.f32 %v3496_v63  ;;  %v10644_v63 = vpack.c.bf16 %v11154_v9, %v11153_v61  ;;  %v11163_v9 = vunpack.i.l.bf16 %v13216_v29 }
 0x718   : > { %11206 = vrot.lane.b32.xlu1 %v12683_v30, %s12022_s3  ;;  %v11584_v54 = vpop.eup %11583 }
 0x719   : > { %v3556_v7 = vmul.f32 %v11584_v54, %v13237_v52 }
 0x71c   : > { %4649 = vrot.lane.b32.xlu1 %v12667_v5, %s12022_s3 }
 0x720   : > { %4738 = vrot.lane.b32.xlu1 %v12661_v0, %s12022_s3 }
 0x724   : > { %4740 = vrot.lane.b32.xlu1 %v12681_v4, %s12022_s3 }
 0x727   : > { %v3493_v31 = vpop.xlane.xlu0 %3492 }
 0x728   : > { %4831 = vrot.lane.b32.xlu1 %v12696_v39, %s12022_s3  ;;  %11585 = vrcp.f32 %v3493_v31 }
 0x72c   : > { %4922 = vrot.lane.b32.xlu1 %v12709_v43, %s12022_s3 }
 0x730   : > { %v3508_v43 = vpop.xlane.xlu1 %3507 }
 0x731   : > { %11587 = vrcp.f32 %v3508_v43 }
 0x732   : > { %v11586_v20 = vpop.eup %11585 }
 0x733   : > { %v3555_v40 = vmul.f32 %v11586_v20, %v13243_v3 }
 0x735   : > { %10104 = vmatprep.mubr.msk.f32.mxu0 %vm1826_vm4, %v3555_v40 }
 0x736   : > { %10105 = vmatmul.mubr.msk.f32.vlgmr.msra.gmra.mrb[52].mxu0 %vm1826_vm4, %v3556_v7 }
 0x737   : > { %10639 = vmatpush3.bf16.msra.mxu0 %v13075_v38  ;;  %v11164_v38 = vunpack.i.h.bf16 %v13216_v29 }
 0x738   : > { %10645 = vmatprep.subr.bf16.mxu0 %v10644_v63  ;;  %v3520_v36 = vpop.xlane.xlu1 %3519 }
 0x73b   : > { %v11588_v54 = vpop.eup %11587 }
 0x73c   : > { %v3560_v40 = vmul.f32 %v11588_v54, %v13248_v56 }
 0x742   : > { %v3502_v31 = vpop.xlane.xlu0 %3501 }
 0x746   : > { %v3505_v39 = vpop.xlane.xlu0 %3504 }
 0x747   : > { %11589 = vrcp.f32 %v3505_v39 }
 0x748   : > { %11591 = vrcp.f32 %v3502_v31  ;;  %v11168_v31 = vunpack.i.l.bf16 %v13222_v55 }
 0x74a   : > { %v3499_v51 = vpop.xlane.xlu0 %3498 }
 0x74b   : > { %v3514_v0 = vpop.xlane.xlu1 %3513  ;;  %11593 = vrcp.f32 %v3499_v51  ;;  %v10652_v51 = vpack.c.bf16 %v11164_v38, %v11163_v9  ;;  %v11179_v38 = vunpack.i.h.bf16 %v13227_v45  ;;  %v11178_v9 = vunpack.i.l.bf16 %v13227_v45 }
 0x74c   : > { %11595 = vrcp.f32 %v3520_v36  ;;  %v11169_v36 = vunpack.i.h.bf16 %v13222_v55  ;;  %v11174_v55 = vunpack.i.h.bf16 %v13224_v59 }
 0x74d   : > { %11597 = vrcp.f32 %v3514_v0  ;;  %v10660_v45 = vpack.c.bf16 %v11179_v38, %v11178_v9 }
 0x74e   : > { %v3511_v3 = vpop.xlane.xlu0 %3510 }
 0x74f   : > { %v3517_v52 = vpop.xlane.xlu1 %3516  ;;  %11599 = vrcp.f32 %v3511_v3 }
 0x750   : > { %11601 = vrcp.f32 %v3517_v52 }
 0x751   : > { %v11590_v20 = vpop.eup %11589 }
 0x752   : > { %v3559_v43 = vmul.f32 %v11590_v20, %v13268_v6  ;;  %v11592_v7 = vpop.eup %11591 }
 0x753   : > { %v3526_v61 = vpop.xlane.xlu1 %3525  ;;  %v3523_v39 = vpop.xlane.xlu0 %3522  ;;  %v3558_v52 = vmul.f32 %v11592_v7, %v13262_v24 }
 0x754   : > { %11603 = vrcp.f32 %v3526_v61  ;;  %10118 = vmatprep.mubr.msk.f32.mxu0 %vm1826_vm4, %v3559_v43  ;;  %v11173_v43 = vunpack.i.l.bf16 %v13224_v59 }
 0x755   : > { %v11594_v0 = vpop.eup %11593  ;;  %11605 = vrcp.f32 %v3523_v39  ;;  %10119 = vmatmul.mubr.msk.f32.vlgmr.msra.gmra.mrb[54].mxu0 %vm1826_vm4, %v3560_v40 }
 0x756   : > { %10647 = vmatpush3.bf16.msra.mxu0 %v10644_v63  ;;  %v3557_v29 = vmul.f32 %v11594_v0, %v13274_v14  ;;  %v11596_v6 = vpop.eup %11595  ;;  %v10648_v63 = vpack.c.bf16 %v11169_v36, %v11168_v31  ;;  %v10656_v40 = vpack.c.bf16 %v11174_v55, %v11173_v43 }
 0x757   : > { %v3532_v3 = vpop.xlane.xlu1 %3531  ;;  %10653 = vmatprep.subr.bf16.mxu0 %v10652_v51  ;;  %v3529_v56 = vpop.xlane.xlu0 %3528  ;;  %v3564_v59 = vmul.f32 %v11596_v6, %v13253_v19  ;;  %v11188_v6 = vunpack.i.l.bf16 %v13235_v27 }
 0x758   : > { %v11598_v54 = vpop.eup %11597  ;;  %11607 = vrcp.f32 %v3532_v3  ;;  %10111 = vmatprep.mubr.msk.f32.mxu1 %vm1826_vm4, %v3557_v29  ;;  %v11189_v29 = vunpack.i.h.bf16 %v13235_v27  ;;  %v11199_v27 = vunpack.i.h.bf16 %v13350_v16 }
 0x759   : > { %v11600_v20 = vpop.eup %11599  ;;  %11609 = vrcp.f32 %v3529_v56  ;;  %10112 = vmatmul.mubr.msk.f32.vlgmr.msra.gmra.mrb[44].mxu1 %vm1826_vm4, %v3558_v52  ;;  %v3562_v39 = vmul.f32 %v11598_v54, %v13276_v53 }
 0x75a   : > { %v11602_v14 = vpop.eup %11601  ;;  %10643 = vmatpush3.bf16.msra.mxu1 %v13085_v62  ;;  %v3561_v24 = vmul.f32 %v11600_v20, %v13282_v33  ;;  %v11184_v33 = vunpack.i.h.bf16 %v13229_v17 }
 0x75b   : > { %10649 = vmatprep.subr.bf16.mxu1 %v10648_v63  ;;  %v3563_v61 = vmul.f32 %v11602_v14, %v13284_v58  ;;  %v11183_v58 = vunpack.i.l.bf16 %v13229_v17 }
 0x75c   : > { %10125 = vmatprep.mubr.msk.f32.mxu1 %vm1826_vm4, %v3561_v24 }
 0x75d   : > { %10132 = vmatprep.mubr.msk.f32.mxu0 %vm1826_vm4, %v3563_v61  ;;  %10126 = vmatmul.mubr.msk.f32.vlgmr.msra.gmra.mrb[46].mxu1 %vm1826_vm4, %v3562_v39  ;;  %v10666_v31 = vpack.c.bf16 %v11184_v33, %v11183_v58 }
 0x75e   : > { %v11604_v7 = vpop.eup %11603  ;;  %10133 = vmatmul.mubr.msk.f32.vlgmr.msra.gmra.mrb[56].mxu0 %vm1826_vm4, %v3564_v59  ;;  %10651 = vmatpush3.bf16.msra.mxu1 %v10648_v63 }
 0x75f   : > { %v11606_v62 = vpop.eup %11605  ;;  %10655 = vmatpush3.bf16.msra.mxu0 %v10652_v51  ;;  %10657 = vmatprep.subr.bf16.mxu1 %v10656_v40  ;;  %v3566_v53 = vmul.f32 %v11604_v7, %v13290_v1  ;;  %v4375_v51 = vpop.permute.xlu0 %4374  ;;  %v11193_v7 = vunpack.i.l.bf16 %v13346_v50 }
 0x760   : > { %10662 = vmatprep.subr.msk.bf16.mxu0 %vm12555_vm1, %v10660_v45  ;;  %v3565_v19 = vmul.f32 %v11606_v62, %v13292_v42  ;;  %v10672_v42 = vpack.c.bf16 %v11189_v29, %v11188_v6 }
 0x762   : > { %v11608_v0 = vpop.eup %11607  ;;  %10139 = vmatprep.mubr.msk.f32.mxu1 %vm1826_vm4, %v3565_v19 }
 0x763   : > { %v11610_v36 = vpop.eup %11609  ;;  %10140 = vmatmul.mubr.msk.f32.vlgmr.msra.gmra.mrb[48].mxu1 %vm1826_vm4, %v3566_v53  ;;  %v3568_v1 = vmul.f32 %v11608_v0, %v13298_v2  ;;  %v4466_v3 = vpop.permute.xlu0 %4465 }
 0x764   : > { %10659 = vmatpush3.bf16.msra.mxu1 %v10656_v40  ;;  %v3567_v17 = vmul.f32 %v11610_v36, %v13300_v23  ;;  %v11198_v23 = vunpack.i.l.bf16 %v13350_v16  ;;  %v4377_v16 = vpop.permute.xlu1 %4376  ;;  %v11194_v40 = vunpack.i.h.bf16 %v13346_v50 }
 0x765   : > { %10668 = vmatprep.subr.msk.bf16.mxu1 %vm12555_vm1, %v10666_v31 }
 0x766   : > { %10146 = vmatprep.mubr.msk.f32.mxu0 %vm1826_vm4, %v3567_v17  ;;  %v10684_v2 = vpack.c.bf16 %v11199_v27, %v11198_v23  ;;  %v10678_v58 = vpack.c.bf16 %v11194_v40, %v11193_v7 }
 0x767   : > { %10147 = vmatmul.mubr.msk.f32.vlgmr.msra.gmra.mrb[58].mxu0 %vm1826_vm4, %v3568_v1  ;;  %v4468_v56 = vpop.permute.xlu0 %4467 }
 0x768   : > { %10665 = vmatpush3.bf16.xpose.msk.msra.mxu0 %vm12555_vm1, %v10660_v45  ;;  %10160 = vmatprep.mubr.msk.f32.mxu0 %vm1109_vm0, %v13316_v13 }
 0x769   : > { %10674 = vmatprep.subr.msk.bf16.mxu0 %vm12555_vm1, %v10672_v42 }
 0x76b   : > { %v4648_v13 = vpop.permute.xlu0 %4647 }
 0x76f   : > { %10161 = vmatmul.mubr.msk.f32.vlgmr.msra.gmra.mrb[60].mxu0 %vm1109_vm0, %v13318_v10  ;;  %v4557_v52 = vpop.permute.xlu0 %4556  ;;  %v11202_v10 = vpop.permute.xlu1 %11201 }
 0x770   : > { %10677 = vmatpush3.bf16.xpose.msk.msra.mxu0 %vm12555_vm1, %v10672_v42  ;;  %10174 = vmatprep.mubr.msk.f32.mxu0 %vm1109_vm0, %v4466_v3  ;;  %v11204_v50 = vunpack.i.h.bf16 %v11202_v10  ;;  %v11203_v53 = vunpack.i.l.bf16 %v11202_v10 }
 0x771   : > { %10686 = vmatprep.subr.msk.bf16.mxu0 %vm12555_vm1, %v10684_v2 }
 0x773   : > { %v4559_v20 = vpop.permute.xlu0 %4558 }
 0x777   : > { %10175 = vmatmul.mubr.msk.f32.vlgmr.msra.gmra.mrb[62].mxu0 %vm1109_vm0, %v4468_v56  ;;  %v11212_v43 = vpop.permute.xlu0 %11211 }
 0x778   : > { %10689 = vmatpush3.bf16.xpose.msk.msra.mxu0 %vm12555_vm1, %v10684_v2  ;;  %10188 = vmatprep.mubr.msk.f32.mxu0 %vm1109_vm0, %v4648_v13  ;;  %v11213_v36 = vunpack.i.l.bf16 %v11212_v43 }
 0x77b   : > { %v4830_v61 = vpop.permute.xlu0 %4829 }
 0x77f   : > { %v4921_v29 = vpop.permute.xlu0 %4920 }
 0x790   : > { %v3538_v54 = vpop.xlane.xlu1 %3537 }
 0x791   : > { %11611 = vrcp.f32 %v3538_v54 }
 0x794   : > { %v3535_v55 = vpop.xlane.xlu1 %3534 }
 0x795   : > { %11613 = vrcp.f32 %v3535_v55 }
 0x798   : > { %v11207_v63 = vpop.permute.xlu1 %11206 }
 0x799   : > { %v11209_v14 = vunpack.i.h.bf16 %v11207_v63  ;;  %v11208_v38 = vunpack.i.l.bf16 %v11207_v63 }
 0x79b   : > { %v10696_v9 = vpack.c.bf16 %v11209_v14, %v11208_v38  ;;  %v11612_v39 = vpop.eup %11611 }
 0x79c   : > { %v4650_v24 = vpop.permute.xlu1 %4649  ;;  %v3570_v33 = vmul.f32 %v11612_v39, %v13332_v12  ;;  %v10690_v12 = vpack.c.bf16 %v11204_v50, %v11203_v53 }
 0x79d   : > { %10189 = vmatmul.mubr.msk.f32.vlgmr.msra.gmra.mrb[64].mxu0 %vm1109_vm0, %v4650_v24  ;;  %10698 = vmatprep.subr.msk.bf16.mxu0 %vm12555_vm1, %v10696_v9 }
 0x79e   : > { %10701 = vmatpush3.bf16.xpose.msk.msra.mxu0 %vm12555_vm1, %v10696_v9  ;;  %10202 = vmatprep.mubr.msk.f32.mxu0 %vm1109_vm0, %v4830_v61 }
 0x79f   : > { %v11614_v59 = vpop.eup %11613 }
 0x7a0   : > { %v4739_v45 = vpop.permute.xlu1 %4738  ;;  %v3569_v62 = vmul.f32 %v11614_v59, %v13338_v22  ;;  %v11214_v22 = vunpack.i.h.bf16 %v11212_v43 }
 0x7a2   : > { %10153 = vmatprep.mubr.msk.f32.mxu1 %vm1826_vm4, %v3569_v62 }
 0x7a3   : > { %10154 = vmatmul.mubr.msk.f32.vlgmr.msra.gmra.mrb[50].mxu1 %vm1826_vm4, %v3570_v33 }
 0x7a4   : > { %10671 = vmatpush3.bf16.xpose.msk.msra.mxu1 %vm12555_vm1, %v10666_v31  ;;  %v4741_v19 = vpop.permute.xlu1 %4740  ;;  %10167 = vmatprep.mubr.msk.f32.mxu1 %vm1109_vm0, %v4375_v51  ;;  %v10702_v31 = vpack.c.bf16 %v11214_v22, %v11213_v36 }
 0x7a5   : > { %10680 = vmatprep.subr.msk.bf16.mxu1 %vm12555_vm1, %v10678_v58 }
 0x7a8   : > { %v4832_v0 = vpop.permute.xlu1 %4831 }
 0x7a9   : > { %10203 = vmatmul.mubr.msk.f32.vlgmr.msra.gmra.mrb[66].mxu0 %vm1109_vm0, %v4832_v0 }
 0x7ab   : > { %10168 = vmatmul.mubr.msk.f32.vlgmr.msra.gmra.mrb[52].mxu1 %vm1109_vm0, %v4377_v16 }
 0x7ac   : > { %10683 = vmatpush3.bf16.xpose.msk.msra.mxu1 %vm12555_vm1, %v10678_v58  ;;  %10181 = vmatprep.mubr.msk.f32.mxu1 %vm1109_vm0, %v4557_v52  ;;  %v4923_v6 = vpop.permute.xlu1 %4922 }
 0x7ad   : > { %10692 = vmatprep.subr.msk.bf16.mxu1 %vm12555_vm1, %v10690_v12 }
 0x7b3   : > { %10182 = vmatmul.mubr.msk.f32.vlgmr.msra.gmra.mrb[54].mxu1 %vm1109_vm0, %v4559_v20 }
 0x7b4   : > { %10695 = vmatpush3.bf16.xpose.msk.msra.mxu1 %vm12555_vm1, %v10690_v12  ;;  %10195 = vmatprep.mubr.msk.f32.mxu1 %vm1109_vm0, %v4739_v45 }
 0x7b5   : > { %10704 = vmatprep.subr.msk.bf16.mxu1 %vm12555_vm1, %v10702_v31 }
 0x7bb   : > { %10196 = vmatmul.mubr.msk.f32.vlgmr.msra.gmra.mrb[56].mxu1 %vm1109_vm0, %v4741_v19 }
 0x7bc   : > { %10707 = vmatpush3.bf16.xpose.msk.msra.mxu1 %vm12555_vm1, %v10702_v31  ;;  %10209 = vmatprep.mubr.msk.f32.mxu1 %vm1109_vm0, %v4921_v29 }
 0x7c3   : > { %10210 = vmatmul.mubr.msk.f32.vlgmr.msra.gmra.mrb[58].mxu1 %vm1109_vm0, %v4923_v6 }
 0x809   : > { %v13460_v17 = vpop.f32.mrb[52].mxu0 }
 0x80a   : > { %v13462_v51 = vpop.f32.mrb[53].mxu0 }
 0x828   : > { %v13466_v42 = vpop.f32.mrb[54].mxu0 }
 0x829   : > { %v13468_v27 = vpop.f32.mrb[55].mxu0 }
 0x82c   : > { %v13472_v3 = vpop.f32.mrb[44].mxu1 }
 0x82d   : > { %v13474_v2 = vpop.f32.mrb[45].mxu1 }
 0x830   : > { %v13478_v13 = vpop.f32.mrb[46].mxu1 }
 0x831   : > { %v13480_v16 = vpop.f32.mrb[56].mxu0  ;;  %v13482_v52 = vpop.f32.mrb[47].mxu1 }
 0x832   : > { %v13486_v54 = vpop.f32.mrb[57].mxu0 }
 0x833   : > { %14902 = vst [vmem:[#allocation23_spill] sm:$0xff] %v13486_v54 }
 0x836   : > { %v13490_v55 = vpop.f32.mrb[48].mxu1 }
 0x837   : > { %14903 = vst [vmem:[#allocation48_spill] sm:$0xff] %v13490_v55  ;;  %v13492_v43 = vpop.f32.mrb[49].mxu1 }
 0x838   : > { %14904 = vst [vmem:[#allocation49_spill] sm:$0xff] %v13492_v43 }
 0x83a   : > { %v13496_v14 = vpop.f32.mrb[58].mxu0 }
 0x83b   : > { %14905 = vst [vmem:[#allocation50_spill] sm:$0xff] %v13496_v14  ;;  %v13498_v38 = vpop.f32.mrb[59].mxu0 }
 0x83c   : > { %14906 = vst [vmem:[#allocation51_spill] sm:$0xff] %v13498_v38 }
 0x842   : > { %v10162_v24 = vpop.f32.mrb[60].mxu0 }
 0x843   : > { %v13504_v61 = vsel %vm12718_vm2, %v10162_v24, -1e+30  ;;  %v4365_v39 = vpop.f32.mrb[61].mxu0 }
 0x844   : > { %v5030_v59 = vsel %vm1826_vm4, %v13504_v61, -inf  ;;  %v13510_v40 = vsel %vm12723_vm3, %v4365_v39, -1e+30 }
 0x845   : > { %v5027_v7 = vsel %vm1826_vm4, %v13510_v40, -inf  ;;  %5031 = vmax.xlane.f32.xlu1 %v5030_v59 }
 0x846   : > { %5028 = vmax.xlane.f32.xlu0 %v5027_v7 }
 0x84a   : > { %v10176_v45 = vpop.f32.mrb[62].mxu0 }
 0x84b   : > { %v13516_v62 = vsel %vm12718_vm2, %v10176_v45, -1e+30  ;;  %v4547_v33 = vpop.f32.mrb[63].mxu0 }
 0x84c   : > { %v5042_v58 = vsel %vm1826_vm4, %v13516_v62, -inf  ;;  %v13522_v19 = vsel %vm12723_vm3, %v4547_v33, -1e+30 }
 0x84d   : > { %5043 = vmax.xlane.f32.xlu0 %v5042_v58  ;;  %v5039_v50 = vsel %vm1826_vm4, %v13522_v19, -inf }
 0x851   : > { %5040 = vmax.xlane.f32.xlu0 %v5039_v50 }
 0x870   : > { %v10190_v53 = vpop.f32.mrb[64].mxu0 }
 0x871   : > { %v13528_v0 = vsel %vm12718_vm2, %v10190_v53, -1e+30  ;;  %v4729_v12 = vpop.f32.mrb[65].mxu0 }
 0x872   : > { %v5054_v22 = vsel %vm1826_vm4, %v13528_v0, -inf }
 0x873   : > { %5055 = vmax.xlane.f32.xlu0 %v5054_v22 }
 0x876   : > { %v13532_v36 = vpop.f32.mrb[50].mxu1 }
 0x877   : > { %14907 = vst [vmem:[#allocation52_spill] sm:$0xff] %v13532_v36  ;;  %v13534_v31 = vpop.f32.mrb[51].mxu1 }
 0x878   : > { %14908 = vst [vmem:[#allocation53_spill] sm:$0xff] %v13534_v31 }
 0x87c   : > { %v10204_v6 = vpop.f32.mrb[66].mxu0 }
 0x87d   : > { %v4911_v24 = vpop.f32.mrb[67].mxu0 }
 0x87e   : > { %v10169_v39 = vpop.f32.mrb[52].mxu1 }
 0x87f   : > { %v13540_v59 = vsel %vm12718_vm2, %v10169_v39, -1e+30  ;;  %v4456_v7 = vpop.f32.mrb[53].mxu1 }
 0x880   : > { %v5036_v45 = vsel %vm1826_vm4, %v13540_v59, -inf  ;;  %v13546_v33 = vsel %vm12723_vm3, %v4456_v7, -1e+30  ;;  %v13562_v7 = vsel %vm12723_vm3, %v4729_v12, -1e+30 }
 0x881   : > { %5037 = vmax.xlane.f32.xlu1 %v5036_v45  ;;  %v5033_v58 = vsel %vm1826_vm4, %v13546_v33, -inf }
 0x885   : > { %5034 = vmax.xlane.f32.xlu1 %v5033_v58  ;;  %v5051_v58 = vsel %vm1826_vm4, %v13562_v7, -inf }
 0x886   : > { %v10183_v50 = vpop.f32.mrb[54].mxu1 }
 0x887   : > { %v13552_v53 = vsel %vm12718_vm2, %v10183_v50, -1e+30  ;;  %v4638_v22 = vpop.f32.mrb[55].mxu1 }
 0x888   : > { %v5048_v39 = vsel %vm1826_vm4, %v13552_v53, -inf  ;;  %v13558_v29 = vsel %vm12723_vm3, %v4638_v22, -1e+30 }
 0x889   : > { %v5045_v45 = vsel %vm1826_vm4, %v13558_v29, -inf  ;;  %5049 = vmax.xlane.f32.xlu0 %v5048_v39  ;;  %v13580_v39 = vsel %vm12718_vm2, %v10204_v6, -1e+30 }
 0x88a   : > { %5046 = vmax.xlane.f32.xlu1 %v5045_v45 }
 0x88d   : > { %5052 = vmax.xlane.f32.xlu0 %v5051_v58  ;;  %v13586_v58 = vsel %vm12723_vm3, %v4911_v24, -1e+30 }
 0x88e   : > { %v10197_v50 = vpop.f32.mrb[56].mxu1 }
 0x88f   : > { %v13570_v9 = vsel %vm12718_vm2, %v10197_v50, -1e+30  ;;  %v4820_v22 = vpop.f32.mrb[57].mxu1  ;;  %v5066_v50 = vsel %vm1826_vm4, %v13580_v39, -inf }
 0x890   : > { %v5060_v63 = vsel %vm1826_vm4, %v13570_v9, -inf  ;;  %v13576_v12 = vsel %vm12723_vm3, %v4820_v22, -1e+30  ;;  %v5063_v22 = vsel %vm1826_vm4, %v13586_v58, -inf }
 0x891   : > { %v5057_v45 = vsel %vm1826_vm4, %v13576_v12, -inf  ;;  %5061 = vmax.xlane.f32.xlu0 %v5060_v63 }
 0x892   : > { %5058 = vmax.xlane.f32.xlu1 %v5057_v45 }
 0x895   : > { %5067 = vmax.xlane.f32.xlu0 %v5066_v50 }
 0x896   : > { %5064 = vmax.xlane.f32.xlu1 %v5063_v22  ;;  %v10211_v20 = vpop.f32.mrb[58].mxu1 }
 0x897   : > { %v13594_v6 = vsel %vm12718_vm2, %v10211_v20, -1e+30  ;;  %v5002_v10 = vpop.f32.mrb[59].mxu1  ;;  %v14910_v20 = vld [vmem:[#allocation20_spill] sm:$0xff] }
 0x898   : > { %v5072_v63 = vsel %vm1826_vm4, %v13594_v6, -inf  ;;  %v13600_v24 = vsel %vm12723_vm3, %v5002_v10, -1e+30  ;;  %v14909_v10 = vld [vmem:[#allocation26_spill] sm:$0xff] }
 0x899   : > { %v5069_v45 = vsel %vm1826_vm4, %v13600_v24, -inf  ;;  %5073 = vmax.xlane.f32.xlu0 %v5072_v63 }
 0x89a   : > { %5070 = vmax.xlane.f32.xlu1 %v5069_v45 }
 0x8ab   : > { %11216 = vrot.lane.b32.xlu1 %v12561_v57, %s12022_s3 }
 0x8af   : > { %11221 = vrot.lane.b32.xlu0 %v12581_v21, %s12022_s3 }
 0x8b3   : > { %11226 = vrot.lane.b32.xlu0 %v12571_v60, %s12022_s3 }
 0x8b7   : > { %11231 = vrot.lane.b32.xlu0 %v12605_v32, %s12022_s3 }
 0x8bb   : > { %11236 = vrot.lane.b32.xlu0 %v12595_v28, %s12022_s3 }
 0x8bf   : > { %11241 = vrot.lane.b32.xlu0 %v12629_v46, %s12022_s3 }
 0x8c3   : > { %11246 = vrot.lane.b32.xlu0 %v12619_v37, %s12022_s3 }
 0x8c7   : > { %11251 = vrot.lane.b32.xlu0 %v14909_v10, %s12022_s3 }
 0x8cb   : > { %11256 = vrot.lane.b32.xlu0 %v14910_v20, %s12023_s14 }
 0x8d2   : > { %v5032_v50 = vpop.xlane.xlu1 %5031 }
 0x8d3   : > { %v5029_v22 = vpop.xlane.xlu0 %5028  ;;  %v5076_v63 = vsub.f32 %v13504_v61, %v5032_v50 }
 0x8d4   : > { %v5075_v45 = vsub.f32 %v13510_v40, %v5029_v22 }
 0x8d5   : > { %v5093_v56 = vmul.f32 1.442695, %v5076_v63 }
 0x8d6   : > { %v5091_v23 = vmul.f32 1.442695, %v5075_v45 }
 0x8d8   : > { %11615 = vpow2.f32 %v5091_v23 }
 0x8d9   : > { %11617 = vpow2.f32 %v5093_v56 }
 0x8da   : > { %v5044_v1 = vpop.xlane.xlu0 %5043 }
 0x8db   : > { %v5080_v31 = vsub.f32 %v13516_v62, %v5044_v1 }
 0x8dd   : > { %v5101_v36 = vmul.f32 1.442695, %v5080_v31 }
 0x8de   : > { %v5041_v23 = vpop.xlane.xlu0 %5040 }
 0x8df   : > { %11619 = vpow2.f32 %v5101_v36  ;;  %v5079_v31 = vsub.f32 %v13522_v19, %v5041_v23 }
 0x8e2   : > { %v13625_v38 = vpop.eup %11615 }
 0x8e3   : > { %v5123_v20 = vsel %vm1826_vm4, %v13625_v38, 0.0  ;;  %v13629_v14 = vpop.eup %11617 }
 0x8e4   : > { %5124 = vadd.xlane.f32.xlu1 %v5123_v20  ;;  %v5126_v61 = vsel %vm1826_vm4, %v13629_v14, 0.0  ;;  %v5099_v20 = vmul.f32 1.442695, %v5079_v31 }
 0x8e9   : > { %v13633_v40 = vpop.eup %11619 }
 0x8ea   : > { %5127 = vadd.xlane.f32.xlu0 %v5126_v61  ;;  %v5138_v1 = vsel %vm1826_vm4, %v13633_v40, 0.0 }
 0x8ee   : > { %5139 = vadd.xlane.f32.xlu0 %v5138_v1 }
 0x900   : > { %v5056_v56 = vpop.xlane.xlu0 %5055 }
 0x901   : > { %v5084_v62 = vsub.f32 %v13528_v0, %v5056_v56 }
 0x903   : > { %v5109_v36 = vmul.f32 1.442695, %v5084_v62 }
 0x905   : > { %11621 = vpow2.f32 %v5109_v36 }
 0x90e   : > { %v5038_v50 = vpop.xlane.xlu1 %5037 }
 0x90f   : > { %v13639_v22 = vpop.eup %11621  ;;  %v5078_v63 = vsub.f32 %v13540_v59, %v5038_v50 }
 0x910   : > { %v5150_v45 = vsel %vm1826_vm4, %v13639_v22, 0.0 }
 0x911   : > { %v5097_v61 = vmul.f32 1.442695, %v5078_v63  ;;  %5151 = vadd.xlane.f32.xlu0 %v5150_v45 }
 0x912   : > { %v5035_v1 = vpop.xlane.xlu1 %5034 }
 0x913   : > { %11623 = vpow2.f32 %v5097_v61  ;;  %v5077_v43 = vsub.f32 %v13546_v33, %v5035_v1 }
 0x914   : > { %11625 = vpow2.f32 %v5099_v20 }
 0x915   : > { %v5095_v0 = vmul.f32 1.442695, %v5077_v43 }
 0x916   : > { %v5050_v56 = vpop.xlane.xlu0 %5049 }
 0x917   : > { %v5082_v19 = vsub.f32 %v13552_v53, %v5050_v56  ;;  %v5047_v23 = vpop.xlane.xlu1 %5046  ;;  %11627 = vpow2.f32 %v5095_v0 }
 0x918   : > { %v5081_v62 = vsub.f32 %v13558_v29, %v5047_v23 }
 0x919   : > { %v5105_v59 = vmul.f32 1.442695, %v5082_v19 }
 0x91a   : > { %v5103_v36 = vmul.f32 1.442695, %v5081_v62  ;;  %v5053_v50 = vpop.xlane.xlu0 %5052 }
 0x91b   : > { %11629 = vpow2.f32 %v5105_v59  ;;  %v5083_v31 = vsub.f32 %v13562_v7, %v5053_v50 }
 0x91c   : > { %11631 = vpow2.f32 %v5103_v36 }
 0x91d   : > { %v13648_v63 = vpop.eup %11623  ;;  %v5107_v45 = vmul.f32 1.442695, %v5083_v31 }
 0x91e   : > { %v5062_v33 = vpop.xlane.xlu0 %5061  ;;  %v5132_v43 = vsel %vm1826_vm4, %v13648_v63, 0.0  ;;  %v13652_v20 = vpop.eup %11625 }
 0x91f   : > { %11633 = vpow2.f32 %v5107_v45  ;;  %v5086_v29 = vsub.f32 %v13570_v9, %v5062_v33  ;;  %v5059_v53 = vpop.xlane.xlu1 %5058  ;;  %5133 = vadd.xlane.f32.xlu1 %v5132_v43  ;;  %v5135_v56 = vsel %vm1826_vm4, %v13652_v20, 0.0 }
 0x920   : > { %v5085_v61 = vsub.f32 %v13576_v12, %v5059_v53 }
 0x921   : > { %v5113_v1 = vmul.f32 1.442695, %v5086_v29  ;;  %v13658_v19 = vpop.eup %11627 }
 0x922   : > { %v5111_v0 = vmul.f32 1.442695, %v5085_v61  ;;  %v5068_v7 = vpop.xlane.xlu0 %5067  ;;  %v5129_v45 = vsel %vm1826_vm4, %v13658_v19, 0.0 }
 0x923   : > { %11635 = vpow2.f32 %v5113_v1  ;;  %v5088_v23 = vsub.f32 %v13580_v39, %v5068_v7  ;;  %v5065_v62 = vpop.xlane.xlu1 %5064  ;;  %5136 = vadd.xlane.f32.xlu1 %v5135_v56 }
 0x924   : > { %11637 = vpow2.f32 %v5111_v0  ;;  %v5087_v9 = vsub.f32 %v13586_v58, %v5065_v62 }
 0x925   : > { %v13662_v59 = vpop.eup %11629  ;;  %v5117_v36 = vmul.f32 1.442695, %v5088_v23 }
 0x926   : > { %v5115_v12 = vmul.f32 1.442695, %v5087_v9  ;;  %v5074_v50 = vpop.xlane.xlu0 %5073  ;;  %v5144_v31 = vsel %vm1826_vm4, %v13662_v59, 0.0  ;;  %v13668_v33 = vpop.eup %11631 }
 0x927   : > { %11639 = vpow2.f32 %v5117_v36  ;;  %5145 = vadd.xlane.f32.xlu0 %v5144_v31  ;;  %5130 = vadd.xlane.f32.xlu1 %v5129_v45  ;;  %v5071_v39 = vpop.xlane.xlu1 %5070  ;;  %v5141_v53 = vsel %vm1826_vm4, %v13668_v33, 0.0 }
 0x928   : > { %11641 = vpow2.f32 %v5115_v12 }
 0x929   : > { %v13670_v43 = vpop.eup %11633 }
 0x92a   : > { %v11222_v58 = vpop.permute.xlu0 %11221  ;;  %v5147_v29 = vsel %vm1826_vm4, %v13670_v43, 0.0 }
 0x92b   : > { %5148 = vadd.xlane.f32.xlu0 %v5147_v29  ;;  %5142 = vadd.xlane.f32.xlu1 %v5141_v53  ;;  %v11217_v61 = vpop.permute.xlu1 %11216  ;;  %v11224_v1 = vunpack.i.h.bf16 %v11222_v58  ;;  %v11223_v0 = vunpack.i.l.bf16 %v11222_v58 }
 0x92c   : > { %v11219_v7 = vunpack.i.h.bf16 %v11217_v61  ;;  %v11218_v56 = vunpack.i.l.bf16 %v11217_v61 }
 0x92d   : > { %v13676_v23 = vpop.eup %11635  ;;  %v10716_v58 = vpack.c.bf16 %v11224_v1, %v11223_v0 }
 0x92e   : > { %v13678_v62 = vpop.eup %11637  ;;  %v11227_v9 = vpop.permute.xlu0 %11226  ;;  %v5156_v36 = vsel %vm1826_vm4, %v13676_v23, 0.0  ;;  %v10708_v12 = vpack.c.bf16 %v11219_v7, %v11218_v56 }
 0x92f   : > { %v11229_v31 = vunpack.i.h.bf16 %v11227_v9  ;;  %v11228_v45 = vunpack.i.l.bf16 %v11227_v9  ;;  %5157 = vadd.xlane.f32.xlu0 %v5156_v36  ;;  %v5153_v29 = vsel %vm1826_vm4, %v13678_v62, 0.0 }
 0x930   : > { %5154 = vadd.xlane.f32.xlu1 %v5153_v29  ;;  %10709 = vmatprep.subr.bf16.mxu0 %v10708_v12  ;;  %v5090_v29 = vsub.f32 %v13594_v6, %v5074_v50 }
 0x931   : > { %v13684_v53 = vpop.eup %11639  ;;  %10711 = vmatpush3.bf16.msra.mxu0 %v10708_v12  ;;  %v10712_v61 = vpack.c.bf16 %v11229_v31, %v11228_v45  ;;  %v14911_v12 = vld [vmem:[#allocation22_spill] sm:$0xff]  ;;  %v14913_v45 = vld [vmem:[#allocation21_spill] sm:$0xff] }
 0x932   : > { %v13686_v55 = vpop.eup %11641  ;;  %v11232_v54 = vpop.permute.xlu0 %11231  ;;  %10717 = vmatprep.subr.bf16.mxu0 %v10716_v58  ;;  %v5162_v7 = vsel %vm1826_vm4, %v13684_v53, 0.0  ;;  %v14912_v31 = vld [vmem:[#allocation18_spill] sm:$0xff] }
 0x933   : > { %5163 = vadd.xlane.f32.xlu0 %v5162_v7  ;;  %10713 = vmatprep.subr.bf16.mxu1 %v10712_v61  ;;  %v5159_v56 = vsel %vm1826_vm4, %v13686_v55, 0.0  ;;  %v5121_v7 = vmul.f32 1.442695, %v5090_v29 }
 0x934   : > { %10715 = vmatpush3.bf16.msra.mxu1 %v10712_v61  ;;  %5160 = vadd.xlane.f32.xlu1 %v5159_v56  ;;  %v5089_v61 = vsub.f32 %v13600_v24, %v5071_v39 }
 0x935   : > { %11643 = vpow2.f32 %v5121_v7  ;;  %v11234_v7 = vunpack.i.h.bf16 %v11232_v54 }
 0x936   : > { %v11237_v9 = vpop.permute.xlu0 %11236  ;;  %v5119_v56 = vmul.f32 1.442695, %v5089_v61 }
 0x937   : > { %v11239_v1 = vunpack.i.h.bf16 %v11237_v9  ;;  %v11238_v0 = vunpack.i.l.bf16 %v11237_v9 }
 0x938   : > { %11645 = vpow2.f32 %v5119_v56  ;;  %v11233_v56 = vunpack.i.l.bf16 %v11232_v54 }
 0x939   : > { %v13692_v36 = vpack.c.bf16 %v11239_v1, %v11238_v0 }
 0x93a   : > { %v13703_v9 = vpop.permute.xlu0 %11241 }
 0x93b   : > { %10721 = vmatprep.subr.bf16.mxu1 %v13692_v36 }
 0x93e   : > { %v13707_v0 = vpop.permute.xlu0 %11246 }
 0x93f   : > { %v13705_v1 = vpop.eup %11643 }
 0x942   : > { %v13715_v24 = vpop.permute.xlu0 %11251 }
 0x945   : > { %11261 = vrot.lane.b32.xlu1 %v14911_v12, %s12023_s14  ;;  %v13709_v12 = vpop.eup %11645 }
 0x946   : > { %v5165_v6 = vsel %vm1826_vm4, %v13709_v12, 0.0  ;;  %v13717_v39 = vpop.permute.xlu0 %11256 }
 0x949   : > { %5899 = vrot.lane.b32.xlu0 %v14912_v31, %s12023_s14  ;;  %v5168_v31 = vsel %vm1826_vm4, %v13705_v1, 0.0 }
 0x94d   : > { %5901 = vrot.lane.b32.xlu0 %v14913_v45, %s12023_s14 }
 0x969   : > { %5169 = vadd.xlane.f32.xlu1 %v5168_v31 }
 0x96c   : > { %5166 = vadd.xlane.f32.xlu0 %v5165_v6  ;;  %v14914_v6 = vld [vmem:[#allocation27_spill] sm:$0xff] }
 0x971   : > { %v5125_v50 = vpop.xlane.xlu1 %5124 }
 0x972   : > { %11647 = vrcp.f32 %v5125_v50  ;;  %v14915_v50 = vld [vmem:[#allocation24_spill] sm:$0xff] }
 0x977   : > { %v5128_v45 = vpop.xlane.xlu0 %5127 }
 0x978   : > { %11649 = vrcp.f32 %v5128_v45 }
 0x97a   : > { %5992 = vrot.lane.b32.xlu1 %v12601_v15, %s12023_s14  ;;  %v10724_v15 = vpack.c.bf16 %v11234_v7, %v11233_v56 }
 0x97c   : > { %v11648_v29 = vpop.eup %11647 }
 0x97d   : > { %v5187_v61 = vmul.f32 %v11648_v29, %v13625_v38  ;;  %v11244_v38 = vunpack.i.h.bf16 %v13703_v9 }
 0x97e   : > { %6081 = vrot.lane.b32.xlu1 %v12609_v8, %s12023_s14  ;;  %v14916_v8 = vld [vmem:[#allocation25_spill] sm:$0xff] }
 0x97f   : > { %10216 = vmatprep.mubr.msk.f32.mxu0 %vm1826_vm4, %v5187_v61 }
 0x982   : > { %v11650_v31 = vpop.eup %11649  ;;  %11276 = vrot.lane.b32.xlu1 %v14914_v6, %s12023_s14  ;;  %11266 = vrot.lane.b32.xlu0 %v14915_v50, %s12023_s14  ;;  %v11249_v50 = vunpack.i.h.bf16 %v13707_v0 }
 0x983   : > { %v5188_v45 = vmul.f32 %v11650_v31, %v13629_v14 }
 0x985   : > { %10217 = vmatmul.mubr.msk.f32.vlgmr.msra.gmra.mrb[68].mxu0 %vm1826_vm4, %v5188_v45  ;;  %v11248_v45 = vunpack.i.l.bf16 %v13707_v0 }
 0x986   : > { %10719 = vmatpush3.bf16.msra.mxu0 %v10716_v58  ;;  %6174 = vrot.lane.b32.xlu1 %v12653_v11, %s12023_s14  ;;  %v14920_v11 = vld [vmem:[#allocation31_spill] sm:$0xff] }
 0x987   : > { %5990 = vrot.lane.b32.xlu0 %v14901_v25, %s12023_s14  ;;  %10725 = vmatprep.subr.bf16.mxu0 %v10724_v15 }
 0x98a   : > { %6263 = vrot.lane.b32.xlu1 %v12641_v48, %s12023_s14  ;;  %v14919_v48 = vld [vmem:[#allocation29_spill] sm:$0xff] }
 0x98b   : > { %11271 = vrot.lane.b32.xlu0 %v14916_v8, %s12023_s14 }
 0x98e   : > { %11286 = vrot.lane.b32.xlu1 %v12683_v30, %s12023_s14 }
 0x98f   : > { %6083 = vrot.lane.b32.xlu0 %v12625_v41, %s12023_s14  ;;  %v14917_v41 = vld [vmem:[#allocation28_spill] sm:$0xff] }
 0x992   : > { %6356 = vrot.lane.b32.xlu1 %v12681_v4, %s12023_s14 }
 0x993   : > { %6172 = vrot.lane.b32.xlu0 %v12633_v47, %s12023_s14  ;;  %v14918_v47 = vld [vmem:[#allocation30_spill] sm:$0xff] }
 0x996   : > { %6445 = vrot.lane.b32.xlu1 %v12675_v26, %s12023_s14 }
 0x997   : > { %11281 = vrot.lane.b32.xlu0 %v12669_v18, %s12023_s14  ;;  %v5140_v18 = vpop.xlane.xlu0 %5139 }
 0x998   : > { %11651 = vrcp.f32 %v5140_v18  ;;  %v11258_v18 = vunpack.i.l.bf16 %v13717_v39 }
 0x99a   : > { %6536 = vrot.lane.b32.xlu1 %v12689_v34, %s12023_s14 }
 0x99b   : > { %6265 = vrot.lane.b32.xlu0 %v12667_v5, %s12023_s14 }
 0x99e   : > { %11301 = vrot.lane.b32.xlu1 %v12571_v60, %s12023_s14  ;;  %v5152_v5 = vpop.xlane.xlu0 %5151 }
 0x99f   : > { %6354 = vrot.lane.b32.xlu0 %v14917_v41, %s12023_s14 }
 0x9a2   : > { %v11652_v54 = vpop.eup %11651 }
 0x9a3   : > { %11291 = vrot.lane.b32.xlu0 %v14918_v47, %s12023_s14  ;;  %v5192_v7 = vmul.f32 %v11652_v54, %v13633_v40 }
 0x9a7   : > { %6447 = vrot.lane.b32.xlu0 %v14919_v48, %s12023_s14 }
 0x9ab   : > { %6538 = vrot.lane.b32.xlu0 %v14920_v11, %s12023_s14  ;;  %v11259_v11 = vunpack.i.h.bf16 %v13717_v39 }
 0x9ac   : > { %v5134_v26 = vpop.xlane.xlu1 %5133 }
 0x9af   : > { %11296 = vrot.lane.b32.xlu0 %v12561_v57, %s12023_s14  ;;  %v11243_v57 = vunpack.i.l.bf16 %v13703_v9 }
 0x9b0   : > { %v5137_v60 = vpop.xlane.xlu1 %5136 }
 0x9b1   : > { %11653 = vrcp.f32 %v5137_v60  ;;  %v10732_v31 = vpack.c.bf16 %v11244_v38, %v11243_v57 }
 0x9b2   : > { %11655 = vrcp.f32 %v5134_v26  ;;  %v11253_v26 = vunpack.i.l.bf16 %v13715_v24 }
 0x9b4   : > { %v5146_v4 = vpop.xlane.xlu0 %5145  ;;  %v5131_v30 = vpop.xlane.xlu1 %5130 }
 0x9b5   : > { %11657 = vrcp.f32 %v5131_v30 }
 0x9b6   : > { %11659 = vrcp.f32 %v5152_v5  ;;  %v10728_v5 = vpack.c.bf16 %v11249_v50, %v11248_v45 }
 0x9b7   : > { %11661 = vrcp.f32 %v5146_v4 }
 0x9b8   : > { %v5149_v34 = vpop.xlane.xlu0 %5148  ;;  %v5143_v25 = vpop.xlane.xlu1 %5142 }
 0x9b9   : > { %11663 = vrcp.f32 %v5149_v34  ;;  %v10740_v34 = vpack.c.bf16 %v11259_v11, %v11258_v18 }
 0x9ba   : > { %11665 = vrcp.f32 %v5143_v25 }
 0x9bb   : > { %v11654_v14 = vpop.eup %11653 }
 0x9bc   : > { %v5158_v58 = vpop.xlane.xlu0 %5157  ;;  %v5191_v29 = vmul.f32 %v11654_v14, %v13652_v20  ;;  %v11656_v56 = vpop.eup %11655 }
 0x9bd   : > { %11667 = vrcp.f32 %v5158_v58  ;;  %v5155_v61 = vpop.xlane.xlu1 %5154  ;;  %v5190_v47 = vmul.f32 %v11656_v56, %v13648_v63 }
 0x9be   : > { %11669 = vrcp.f32 %v5155_v61  ;;  %10230 = vmatprep.mubr.msk.f32.mxu0 %vm1826_vm4, %v5191_v29 }
 0x9bf   : > { %10231 = vmatmul.mubr.msk.f32.vlgmr.msra.gmra.mrb[70].mxu0 %vm1826_vm4, %v5192_v7  ;;  %v11658_v6 = vpop.eup %11657 }
 0x9c0   : > { %10727 = vmatpush3.bf16.msra.mxu0 %v10724_v15  ;;  %v5164_v9 = vpop.xlane.xlu0 %5163  ;;  %v11660_v8 = vpop.eup %11659  ;;  %v5189_v40 = vmul.f32 %v11658_v6, %v13658_v19  ;;  %v11254_v15 = vunpack.i.h.bf16 %v13715_v24 }
 0x9c1   : > { %11671 = vrcp.f32 %v5164_v9  ;;  %10733 = vmatprep.subr.bf16.mxu0 %v10732_v31  ;;  %v5161_v20 = vpop.xlane.xlu1 %5160  ;;  %v11662_v41 = vpop.eup %11661  ;;  %v5196_v4 = vmul.f32 %v11660_v8, %v13639_v22 }
 0x9c2   : > { %11673 = vrcp.f32 %v5161_v20  ;;  %10223 = vmatprep.mubr.msk.f32.mxu1 %vm1826_vm4, %v5189_v40  ;;  %v5194_v39 = vmul.f32 %v11662_v41, %v13662_v59 }
 0x9c3   : > { %v11664_v48 = vpop.eup %11663  ;;  %10224 = vmatmul.mubr.msk.f32.vlgmr.msra.gmra.mrb[60].mxu1 %vm1826_vm4, %v5190_v47 }
 0x9c4   : > { %v11666_v0 = vpop.eup %11665  ;;  %v5195_v19 = vmul.f32 %v11664_v48, %v13670_v43  ;;  %10723 = vmatpush3.bf16.msra.mxu1 %v13692_v36 }
 0x9c5   : > { %v11262_v63 = vpop.permute.xlu1 %11261  ;;  %v5193_v60 = vmul.f32 %v11666_v0, %v13668_v33  ;;  %10729 = vmatprep.subr.bf16.mxu1 %v10728_v5  ;;  %v10736_v33 = vpack.c.bf16 %v11254_v15, %v11253_v26 }
 0x9c6   : > { %10244 = vmatprep.mubr.msk.f32.mxu0 %vm1826_vm4, %v5195_v19  ;;  %v11264_v43 = vunpack.i.h.bf16 %v11262_v63  ;;  %v11263_v25 = vunpack.i.l.bf16 %v11262_v63 }
 0x9c7   : > { %v11668_v30 = vpop.eup %11667  ;;  %10237 = vmatprep.mubr.msk.f32.mxu1 %vm1826_vm4, %v5193_v60  ;;  %10245 = vmatmul.mubr.msk.f32.vlgmr.msra.gmra.mrb[72].mxu0 %vm1826_vm4, %v5196_v4 }
 0x9c8   : > { %v11670_v24 = vpop.eup %11669  ;;  %10238 = vmatmul.mubr.msk.f32.vlgmr.msra.gmra.mrb[62].mxu1 %vm1826_vm4, %v5194_v39  ;;  %10735 = vmatpush3.bf16.msra.mxu0 %v10732_v31  ;;  %v5198_v59 = vmul.f32 %v11668_v30, %v13676_v23  ;;  %v10746_v14 = vpack.c.bf16 %v11264_v43, %v11263_v25 }
 0x9c9   : > { %10731 = vmatpush3.bf16.msra.mxu1 %v10728_v5  ;;  %10742 = vmatprep.subr.msk.bf16.mxu0 %vm12555_vm1, %v10740_v34  ;;  %v5197_v22 = vmul.f32 %v11670_v24, %v13678_v62  ;;  %v5900_v62 = vpop.permute.xlu0 %5899 }
 0x9ca   : > { %10737 = vmatprep.subr.bf16.mxu1 %v10736_v33 }
 0x9cb   : > { %v11672_v36 = vpop.eup %11671  ;;  %10251 = vmatprep.mubr.msk.f32.mxu1 %vm1826_vm4, %v5197_v22 }
 0x9cc   : > { %v11674_v54 = vpop.eup %11673  ;;  %10252 = vmatmul.mubr.msk.f32.vlgmr.msra.gmra.mrb[64].mxu1 %vm1826_vm4, %v5198_v59  ;;  %v5200_v57 = vmul.f32 %v11672_v36, %v13684_v53 }
 0x9cd   : > { %10739 = vmatpush3.bf16.msra.mxu1 %v10736_v33  ;;  %v5199_v38 = vmul.f32 %v11674_v54, %v13686_v55  ;;  %v5902_v23 = vpop.permute.xlu0 %5901 }
 0x9ce   : > { %10748 = vmatprep.subr.msk.bf16.mxu1 %vm12555_vm1, %v10746_v14 }
 0x9cf   : > { %10258 = vmatprep.mubr.msk.f32.mxu0 %vm1826_vm4, %v5199_v38 }
 0x9d0   : > { %10259 = vmatmul.mubr.msk.f32.vlgmr.msra.gmra.mrb[74].mxu0 %vm1826_vm4, %v5200_v57 }
 0x9d1   : > { %10745 = vmatpush3.bf16.xpose.msk.msra.mxu0 %vm12555_vm1, %v10740_v34  ;;  %10272 = vmatprep.mubr.msk.f32.mxu0 %vm1109_vm0, %v5900_v62 }
 0x9d8   : > { %10273 = vmatmul.mubr.msk.f32.vlgmr.msra.gmra.mrb[76].mxu0 %vm1109_vm0, %v5902_v23 }
 0x9f6   : > { %v5170_v58 = vpop.xlane.xlu1 %5169 }
 0x9f7   : > { %11675 = vrcp.f32 %v5170_v58 }
 0x9f9   : > { %v5167_v55 = vpop.xlane.xlu0 %5166 }
 0x9fa   : > { %11677 = vrcp.f32 %v5167_v55  ;;  %v5993_v29 = vpop.permute.xlu1 %5992 }
 0x9fd   : > { %v11267_v61 = vpop.permute.xlu0 %11266 }
 0x9fe   : > { %v11269_v53 = vunpack.i.h.bf16 %v11267_v61  ;;  %v11268_v7 = vunpack.i.l.bf16 %v11267_v61  ;;  %v6082_v56 = vpop.permute.xlu1 %6081 }
 0x9ff   : > { %10286 = vmatprep.mubr.msk.f32.mxu0 %vm1109_vm0, %v6082_v56 }
 0xa00   : > { %v10752_v31 = vpack.c.bf16 %v11269_v53, %v11268_v7 }
 0xa01   : > { %v5991_v6 = vpop.permute.xlu0 %5990  ;;  %v11676_v45 = vpop.eup %11675 }
 0xa02   : > { %v11277_v50 = vpop.permute.xlu1 %11276  ;;  %10754 = vmatprep.subr.msk.bf16.mxu0 %vm12555_vm1, %v10752_v31  ;;  %v5202_v0 = vmul.f32 %v11676_v45, %v13705_v1 }
 0xa03   : > { %v11279_v9 = vunpack.i.h.bf16 %v11277_v50  ;;  %v11278_v8 = vunpack.i.l.bf16 %v11277_v50  ;;  %10757 = vmatpush3.bf16.xpose.msk.msra.mxu0 %vm12555_vm1, %v10752_v31 }
 0xa04   : > { %v11678_v20 = vpop.eup %11677 }
 0xa05   : > { %v10764_v40 = vpack.c.bf16 %v11279_v9, %v11278_v8  ;;  %v11272_v41 = vpop.permute.xlu0 %11271  ;;  %v5201_v47 = vmul.f32 %v11678_v20, %v13709_v12 }
 0xa06   : > { %v11274_v48 = vunpack.i.h.bf16 %v11272_v41  ;;  %v11273_v11 = vunpack.i.l.bf16 %v11272_v41  ;;  %v6175_v18 = vpop.permute.xlu1 %6174 }
 0xa07   : > { %10265 = vmatprep.mubr.msk.f32.mxu1 %vm1826_vm4, %v5201_v47  ;;  %10766 = vmatprep.subr.msk.bf16.mxu0 %vm12555_vm1, %v10764_v40 }
 0xa08   : > { %v10758_v15 = vpack.c.bf16 %v11274_v48, %v11273_v11  ;;  %10266 = vmatmul.mubr.msk.f32.vlgmr.msra.gmra.mrb[66].mxu1 %vm1826_vm4, %v5202_v0 }
 0xa09   : > { %10751 = vmatpush3.bf16.xpose.msk.msra.mxu1 %vm12555_vm1, %v10746_v14  ;;  %v6084_v26 = vpop.permute.xlu0 %6083  ;;  %10279 = vmatprep.mubr.msk.f32.mxu1 %vm1109_vm0, %v5991_v6 }
 0xa0a   : > { %v6264_v12 = vpop.permute.xlu1 %6263  ;;  %10287 = vmatmul.mubr.msk.f32.vlgmr.msra.gmra.mrb[78].mxu0 %vm1109_vm0, %v6084_v26  ;;  %10760 = vmatprep.subr.msk.bf16.mxu1 %vm12555_vm1, %v10758_v15 }
 0xa0b   : > { %10769 = vmatpush3.bf16.xpose.msk.msra.mxu0 %vm12555_vm1, %v10764_v40  ;;  %10300 = vmatprep.mubr.msk.f32.mxu0 %vm1109_vm0, %v6264_v12 }
 0xa0d   : > { %v6173_v1 = vpop.permute.xlu0 %6172 }
 0xa0e   : > { %v11287_v5 = vpop.permute.xlu1 %11286 }
 0xa0f   : > { %v11289_v19 = vunpack.i.h.bf16 %v11287_v5  ;;  %v11288_v63 = vunpack.i.l.bf16 %v11287_v5 }
 0xa10   : > { %10280 = vmatmul.mubr.msk.f32.vlgmr.msra.gmra.mrb[68].mxu1 %vm1109_vm0, %v5993_v29 }
 0xa11   : > { %v10776_v60 = vpack.c.bf16 %v11289_v19, %v11288_v63  ;;  %10763 = vmatpush3.bf16.xpose.msk.msra.mxu1 %vm12555_vm1, %v10758_v15  ;;  %10293 = vmatprep.mubr.msk.f32.mxu1 %vm1109_vm0, %v6173_v1  ;;  %v11282_v4 = vpop.permute.xlu0 %11281 }
 0xa12   : > { %v11284_v39 = vunpack.i.h.bf16 %v11282_v4  ;;  %v11283_v30 = vunpack.i.l.bf16 %v11282_v4  ;;  %v6357_v34 = vpop.permute.xlu1 %6356 }
 0xa13   : > { %10778 = vmatprep.subr.msk.bf16.mxu0 %vm12555_vm1, %v10776_v60 }
 0xa14   : > { %v10770_v24 = vpack.c.bf16 %v11284_v39, %v11283_v30 }
 0xa15   : > { %v6266_v43 = vpop.permute.xlu0 %6265 }
 0xa16   : > { %v6446_v25 = vpop.permute.xlu1 %6445  ;;  %10301 = vmatmul.mubr.msk.f32.vlgmr.msra.gmra.mrb[80].mxu0 %vm1109_vm0, %v6266_v43  ;;  %10772 = vmatprep.subr.msk.bf16.mxu1 %vm12555_vm1, %v10770_v24 }
 0xa17   : > { %10781 = vmatpush3.bf16.xpose.msk.msra.mxu0 %vm12555_vm1, %v10776_v60  ;;  %10314 = vmatprep.mubr.msk.f32.mxu0 %vm1109_vm0, %v6446_v25 }
 0xa18   : > { %10294 = vmatmul.mubr.msk.f32.vlgmr.msra.gmra.mrb[70].mxu1 %vm1109_vm0, %v6175_v18 }
 0xa19   : > { %10775 = vmatpush3.bf16.xpose.msk.msra.mxu1 %vm12555_vm1, %v10770_v24  ;;  %v6355_v33 = vpop.permute.xlu0 %6354 }
 0xa1a   : > { %v6537_v22 = vpop.permute.xlu1 %6536  ;;  %10307 = vmatprep.mubr.msk.f32.mxu1 %vm1109_vm0, %v6355_v33 }
 0xa1d   : > { %v11292_v59 = vpop.permute.xlu0 %11291 }
 0xa1e   : > { %v11294_v36 = vunpack.i.h.bf16 %v11292_v59  ;;  %v11293_v54 = vunpack.i.l.bf16 %v11292_v59  ;;  %v11302_v14 = vpop.permute.xlu1 %11301 }
 0xa1f   : > { %v11304_v38 = vunpack.i.h.bf16 %v11302_v14  ;;  %v11303_v57 = vunpack.i.l.bf16 %v11302_v14 }
 0xa20   : > { %v10782_v62 = vpack.c.bf16 %v11294_v36, %v11293_v54  ;;  %10308 = vmatmul.mubr.msk.f32.vlgmr.msra.gmra.mrb[72].mxu1 %vm1109_vm0, %v6357_v34 }
 0xa21   : > { %10321 = vmatprep.mubr.msk.f32.mxu1 %vm1109_vm0, %v6537_v22  ;;  %v6448_v23 = vpop.permute.xlu0 %6447  ;;  %v10792_v58 = vpack.c.bf16 %v11304_v38, %v11303_v57 }
 0xa22   : > { %10315 = vmatmul.mubr.msk.f32.vlgmr.msra.gmra.mrb[82].mxu0 %vm1109_vm0, %v6448_v23  ;;  %10784 = vmatprep.subr.msk.bf16.mxu1 %vm12555_vm1, %v10782_v62 }
 0xa23   : > { %10787 = vmatpush3.bf16.xpose.msk.msra.mxu1 %vm12555_vm1, %v10782_v62 }
 0xa24   : > { %10793 = vmatprep.subr.bf16.mxu1 %v10792_v58 }
 0xa25   : > { %v6539_v55 = vpop.permute.xlu0 %6538 }
 0xa29   : > { %v11297_v29 = vpop.permute.xlu0 %11296 }
 0xa2a   : > { %v11299_v61 = vunpack.i.h.bf16 %v11297_v29  ;;  %v11298_v53 = vunpack.i.l.bf16 %v11297_v29  ;;  %10322 = vmatmul.mubr.msk.f32.vlgmr.msra.gmra.mrb[74].mxu1 %vm1109_vm0, %v6539_v55 }
 0xa2b   : > { %10795 = vmatpush3.bf16.msra.mxu1 %v10792_v58 }
 0xa2c   : > { %v10788_v7 = vpack.c.bf16 %v11299_v61, %v11298_v53 }
 0xa2e   : > { %10789 = vmatprep.subr.bf16.mxu0 %v10788_v7 }
 0xa2f   : > { %10791 = vmatpush3.bf16.msra.mxu0 %v10788_v7 }
 0xa58   : > { %v13852_v56 = vpop.f32.mrb[68].mxu0 }
 0xa59   : > { %v13854_v31 = vpop.f32.mrb[69].mxu0 }
 0xa5a   : > { %v11340_v6 = vpack.i.bf16 %v13852_v56, %v13854_v31 }
 0xa92   : > { %v13858_v35 = vpop.f32.mrb[70].mxu0 }
 0xa93   : > { %v13860_v50 = vpop.f32.mrb[71].mxu0 }
 0xa94   : > { %v11370_v45 = vpack.i.bf16 %v13858_v35, %v13860_v50 }
 0xa96   : > { %v13864_v9 = vpop.f32.mrb[60].mxu1 }
 0xa97   : > { %v13866_v8 = vpop.f32.mrb[61].mxu1 }
 0xa98   : > { %v11355_v20 = vpack.i.bf16 %v13864_v9, %v13866_v8 }
 0xa9a   : > { %v13870_v40 = vpop.f32.mrb[72].mxu0 }
 0xa9b   : > { %v13872_v41 = vpop.f32.mrb[62].mxu1  ;;  %v13874_v47 = vpop.f32.mrb[73].mxu0 }
 0xa9c   : > { %v13876_v48 = vpop.f32.mrb[63].mxu1  ;;  %v11400_v11 = vpack.i.bf16 %v13870_v40, %v13874_v47 }
 0xa9d   : > { %v11385_v18 = vpack.i.bf16 %v13872_v41, %v13876_v48  ;;  %v14930_v41 = vld [vmem:[#allocation49_spill] sm:$0xff] }
 0xa9f   : > { %v13882_v0 = vpop.f32.mrb[64].mxu1 }
 0xaa0   : > { %v13884_v15 = vpop.f32.mrb[65].mxu1 }
 0xaa3   : > { %v13888_v12 = vpop.f32.mrb[74].mxu0 }
 0xaa4   : > { %v13890_v1 = vpop.f32.mrb[75].mxu0 }
 0xaab   : > { %v10274_v19 = vpop.f32.mrb[76].mxu0 }
 0xaac   : > { %v13896_v63 = vsel %vm12718_vm2, %v10274_v19, -1e+30  ;;  %v5981_v60 = vpop.f32.mrb[77].mxu0 }
 0xaad   : > { %v6646_v4 = vsel %vm1826_vm4, %v13896_v63, -inf  ;;  %v13902_v39 = vsel %vm12723_vm3, %v5981_v60, -1e+30 }
 0xaae   : > { %v6643_v30 = vsel %vm1826_vm4, %v13902_v39, -inf  ;;  %6647 = vmax.xlane.f32.xlu0 %v6646_v4 }
 0xaaf   : > { %6644 = vmax.xlane.f32.xlu1 %v6643_v30 }
 0xadb   : > { %v13906_v34 = vpop.f32.mrb[66].mxu1 }
 0xadc   : > { %v13908_v24 = vpop.f32.mrb[67].mxu1 }
 0xadd   : > { %v10288_v25 = vpop.f32.mrb[78].mxu0 }
 0xade   : > { %v6163_v33 = vpop.f32.mrb[79].mxu0  ;;  %v13924_v38 = vsel %vm12718_vm2, %v10288_v25, -1e+30 }
 0xadf   : > { %v13930_v62 = vsel %vm12723_vm3, %v6163_v33, -1e+30  ;;  %v6658_v23 = vsel %vm1826_vm4, %v13924_v38, -inf }
 0xae0   : > { %v6655_v55 = vsel %vm1826_vm4, %v13930_v62, -inf }
 0xae3   : > { %v10281_v22 = vpop.f32.mrb[68].mxu1 }
 0xae4   : > { %v13914_v59 = vsel %vm12718_vm2, %v10281_v22, -1e+30  ;;  %v6072_v36 = vpop.f32.mrb[69].mxu1 }
 0xae5   : > { %v6652_v54 = vsel %vm1826_vm4, %v13914_v59, -inf  ;;  %v13920_v14 = vsel %vm12723_vm3, %v6072_v36, -1e+30 }
 0xae6   : > { %v6649_v57 = vsel %vm1826_vm4, %v13920_v14, -inf  ;;  %6653 = vmax.xlane.f32.xlu1 %v6652_v54 }
 0xae7   : > { %6650 = vmax.xlane.f32.xlu0 %v6649_v57 }
 0xae9   : > { %v10302_v58 = vpop.f32.mrb[80].mxu0 }
 0xaea   : > { %6659 = vmax.xlane.f32.xlu1 %v6658_v23  ;;  %v6345_v29 = vpop.f32.mrb[81].mxu0  ;;  %v13948_v4 = vsel %vm12718_vm2, %v10302_v58, -1e+30 }
 0xaeb   : > { %v10295_v61 = vpop.f32.mrb[70].mxu1  ;;  %6656 = vmax.xlane.f32.xlu0 %v6655_v55  ;;  %v13954_v25 = vsel %vm12723_vm3, %v6345_v29, -1e+30  ;;  %v6670_v33 = vsel %vm1826_vm4, %v13948_v4, -inf }
 0xaec   : > { %v13938_v53 = vsel %vm12718_vm2, %v10295_v61, -1e+30  ;;  %v6254_v7 = vpop.f32.mrb[71].mxu1  ;;  %v6667_v22 = vsel %vm1826_vm4, %v13954_v25, -inf }
 0xaed   : > { %v6664_v19 = vsel %vm1826_vm4, %v13938_v53, -inf  ;;  %v13944_v60 = vsel %vm12723_vm3, %v6254_v7, -1e+30 }
 0xaee   : > { %v6661_v30 = vsel %vm1826_vm4, %v13944_v60, -inf  ;;  %6665 = vmax.xlane.f32.xlu1 %v6664_v19 }
 0xaef   : > { %6662 = vmax.xlane.f32.xlu0 %v6661_v30 }
 0xaf2   : > { %6671 = vmax.xlane.f32.xlu1 %v6670_v33 }
 0xaf3   : > { %v10309_v36 = vpop.f32.mrb[72].mxu1  ;;  %6668 = vmax.xlane.f32.xlu0 %v6667_v22 }
 0xaf4   : > { %v13962_v54 = vsel %vm12718_vm2, %v10309_v36, -1e+30  ;;  %v6436_v57 = vpop.f32.mrb[73].mxu1 }
 0xaf5   : > { %v6676_v23 = vsel %vm1826_vm4, %v13962_v54, -inf  ;;  %v13968_v58 = vsel %vm12723_vm3, %v6436_v57, -1e+30  ;;  %v10316_v55 = vpop.f32.mrb[82].mxu0 }
 0xaf6   : > { %v6673_v29 = vsel %vm1826_vm4, %v13968_v58, -inf  ;;  %6677 = vmax.xlane.f32.xlu1 %v6676_v23  ;;  %v13974_v61 = vsel %vm12718_vm2, %v10316_v55, -1e+30  ;;  %v6527_v7 = vpop.f32.mrb[83].mxu0 }
 0xaf7   : > { %v6682_v19 = vsel %vm1826_vm4, %v13974_v61, -inf  ;;  %6674 = vmax.xlane.f32.xlu0 %v6673_v29  ;;  %v13980_v30 = vsel %vm12723_vm3, %v6527_v7, -1e+30 }
 0xaf8   : > { %v6679_v33 = vsel %vm1826_vm4, %v13980_v30, -inf }
 0xafa   : > { %6683 = vmax.xlane.f32.xlu1 %v6682_v19 }
 0xafb   : > { %6680 = vmax.xlane.f32.xlu0 %v6679_v33 }
 0xafd   : > { %v10323_v22 = vpop.f32.mrb[74].mxu1 }
 0xafe   : > { %v13986_v36 = vsel %vm12718_vm2, %v10323_v22, -1e+30  ;;  %v6618_v57 = vpop.f32.mrb[75].mxu1 }
 0xaff   : > { %v6688_v23 = vsel %vm1826_vm4, %v13986_v36, -inf  ;;  %v13992_v55 = vsel %vm12723_vm3, %v6618_v57, -1e+30 }
 0xb00   : > { %v6685_v29 = vsel %vm1826_vm4, %v13992_v55, -inf  ;;  %6689 = vmax.xlane.f32.xlu1 %v6688_v23 }
 0xb01   : > { %6686 = vmax.xlane.f32.xlu0 %v6685_v29 }
 0xb11   : > { %11311 = vrot.lane.b32.xlu1 %v12595_v28, %s12023_s14 }
 0xb17   : > { %11306 = vrot.lane.b32.xlu0 %v12581_v21, %s12023_s14 }
 0xb3b   : > { %v6648_v49 = vpop.xlane.xlu0 %6647 }
 0xb3c   : > { %v6692_v7 = vsub.f32 %v13896_v63, %v6648_v49  ;;  %v6645_v19 = vpop.xlane.xlu1 %6644 }
 0xb3d   : > { %v6691_v33 = vsub.f32 %v13902_v39, %v6645_v19 }
 0xb3e   : > { %v6709_v44 = vmul.f32 1.442695, %v6692_v7 }
 0xb3f   : > { %v6707_v22 = vmul.f32 1.442695, %v6691_v33 }
 0xb40   : > { %11679 = vpow2.f32 %v6709_v44 }
 0xb41   : > { %11681 = vpow2.f32 %v6707_v22 }
 0xb4a   : > { %v14002_v57 = vpop.eup %11679 }
 0xb4b   : > { %v14004_v23 = vpop.eup %11681  ;;  %v6742_v28 = vsel %vm1826_vm4, %v14002_v57, 0.0 }
 0xb4c   : > { %6743 = vadd.xlane.f32.xlu1 %v6742_v28  ;;  %v6739_v21 = vsel %vm1826_vm4, %v14004_v23, 0.0 }
 0xb4d   : > { %6740 = vadd.xlane.f32.xlu0 %v6739_v21 }
 0xb73   : > { %v6654_v63 = vpop.xlane.xlu1 %6653 }
 0xb74   : > { %v6694_v29 = vsub.f32 %v13914_v59, %v6654_v63  ;;  %v6651_v39 = vpop.xlane.xlu0 %6650 }
 0xb75   : > { %v6693_v49 = vsub.f32 %v13920_v14, %v6651_v39 }
 0xb76   : > { %v6713_v7 = vmul.f32 1.442695, %v6694_v29 }
 0xb77   : > { %v6711_v19 = vmul.f32 1.442695, %v6693_v49  ;;  %v6660_v33 = vpop.xlane.xlu1 %6659 }
 0xb78   : > { %11683 = vpow2.f32 %v6713_v7  ;;  %v6696_v44 = vsub.f32 %v13924_v38, %v6660_v33  ;;  %v6657_v22 = vpop.xlane.xlu0 %6656 }
 0xb79   : > { %11685 = vpow2.f32 %v6711_v19  ;;  %v6695_v28 = vsub.f32 %v13930_v62, %v6657_v22 }
 0xb7a   : > { %v6717_v43 = vmul.f32 1.442695, %v6696_v44 }
 0xb7b   : > { %v6715_v5 = vmul.f32 1.442695, %v6695_v28  ;;  %v6666_v26 = vpop.xlane.xlu1 %6665 }
 0xb7c   : > { %11687 = vpow2.f32 %v6717_v43  ;;  %v6698_v21 = vsub.f32 %v13938_v53, %v6666_v26  ;;  %v6663_v59 = vpop.xlane.xlu0 %6662 }
 0xb7d   : > { %11689 = vpow2.f32 %v6715_v5  ;;  %v6697_v14 = vsub.f32 %v13944_v60, %v6663_v59 }
 0xb7e   : > { %v6721_v63 = vmul.f32 1.442695, %v6698_v21 }
 0xb7f   : > { %v6672_v29 = vpop.xlane.xlu1 %6671  ;;  %v6719_v62 = vmul.f32 1.442695, %v6697_v14 }
 0xb80   : > { %11691 = vpow2.f32 %v6721_v63  ;;  %v6700_v39 = vsub.f32 %v13948_v4, %v6672_v29  ;;  %v6669_v38 = vpop.xlane.xlu0 %6668 }
 0xb81   : > { %v6699_v49 = vsub.f32 %v13954_v25, %v6669_v38 }
 0xb82   : > { %v14018_v7 = vpop.eup %11683  ;;  %v6725_v19 = vmul.f32 1.442695, %v6700_v39 }
 0xb83   : > { %v14020_v33 = vpop.eup %11685  ;;  %v6723_v43 = vmul.f32 1.442695, %v6699_v49  ;;  %v6678_v26 = vpop.xlane.xlu1 %6677  ;;  %v6748_v5 = vsel %vm1826_vm4, %v14018_v7, 0.0 }
 0xb84   : > { %11693 = vpow2.f32 %v6725_v19  ;;  %v6702_v53 = vsub.f32 %v13962_v54, %v6678_v26  ;;  %v6675_v60 = vpop.xlane.xlu0 %6674  ;;  %6749 = vadd.xlane.f32.xlu1 %v6748_v5  ;;  %v6745_v4 = vsel %vm1826_vm4, %v14020_v33, 0.0 }
 0xb85   : > { %11695 = vpow2.f32 %v6723_v43  ;;  %6746 = vadd.xlane.f32.xlu0 %v6745_v4  ;;  %v6701_v39 = vsub.f32 %v13968_v58, %v6675_v60 }
 0xb86   : > { %v14027_v25 = vpop.eup %11687  ;;  %11697 = vpow2.f32 %v6719_v62  ;;  %v6729_v44 = vmul.f32 1.442695, %v6702_v53 }
 0xb87   : > { %v14029_v22 = vpop.eup %11689  ;;  %v6684_v28 = vpop.xlane.xlu1 %6683  ;;  %v6754_v21 = vsel %vm1826_vm4, %v14027_v25, 0.0  ;;  %v6727_v43 = vmul.f32 1.442695, %v6701_v39 }
 0xb88   : > { %v6704_v59 = vsub.f32 %v13974_v61, %v6684_v28  ;;  %6755 = vadd.xlane.f32.xlu1 %v6754_v21  ;;  %v6681_v54 = vpop.xlane.xlu0 %6680  ;;  %v6751_v63 = vsel %vm1826_vm4, %v14029_v22, 0.0  ;;  %11699 = vpow2.f32 %v6729_v44 }
 0xb89   : > { %v6703_v14 = vsub.f32 %v13980_v30, %v6681_v54  ;;  %6752 = vadd.xlane.f32.xlu0 %v6751_v63 }
 0xb8a   : > { %v14037_v29 = vpop.eup %11691  ;;  %v6733_v38 = vmul.f32 1.442695, %v6704_v59 }
 0xb8b   : > { %v6731_v49 = vmul.f32 1.442695, %v6703_v14  ;;  %v6760_v62 = vsel %vm1826_vm4, %v14037_v29, 0.0 }
 0xb8c   : > { %6761 = vadd.xlane.f32.xlu1 %v6760_v62 }
 0xb8d   : > { %11701 = vpow2.f32 %v6731_v49  ;;  %v6690_v61 = vpop.xlane.xlu1 %6689 }
 0xb8e   : > { %v14042_v19 = vpop.eup %11693  ;;  %11703 = vpow2.f32 %v6733_v38  ;;  %v6687_v26 = vpop.xlane.xlu0 %6686 }
 0xb8f   : > { %v14044_v30 = vpop.eup %11695  ;;  %v6766_v5 = vsel %vm1826_vm4, %v14042_v19, 0.0  ;;  %11705 = vpow2.f32 %v6727_v43 }
 0xb90   : > { %v14048_v53 = vpop.eup %11697  ;;  %6767 = vadd.xlane.f32.xlu1 %v6766_v5  ;;  %v6763_v58 = vsel %vm1826_vm4, %v14044_v30, 0.0 }
 0xb91   : > { %6764 = vadd.xlane.f32.xlu0 %v6763_v58  ;;  %v11312_v60 = vpop.permute.xlu1 %11311  ;;  %v6757_v54 = vsel %vm1826_vm4, %v14048_v53, 0.0 }
 0xb92   : > { %v11314_v4 = vunpack.i.h.bf16 %v11312_v60  ;;  %v11313_v44 = vunpack.i.l.bf16 %v11312_v60  ;;  %v11307_v28 = vpop.permute.xlu0 %11306  ;;  %v14054_v63 = vpop.eup %11699 }
 0xb93   : > { %v11309_v21 = vunpack.i.h.bf16 %v11307_v28  ;;  %v11308_v59 = vunpack.i.l.bf16 %v11307_v28  ;;  %v6772_v49 = vsel %vm1826_vm4, %v14054_v63, 0.0  ;;  %v6705_v28 = vsub.f32 %v13992_v55, %v6687_v26 }
 0xb94   : > { %v14056_v14 = vpack.c.bf16 %v11314_v4, %v11313_v44  ;;  %6758 = vadd.xlane.f32.xlu1 %v6757_v54  ;;  %v6706_v4 = vsub.f32 %v13986_v36, %v6690_v61 }
 0xb95   : > { %v10796_v39 = vpack.c.bf16 %v11309_v21, %v11308_v59  ;;  %v6735_v21 = vmul.f32 1.442695, %v6705_v28 }
 0xb96   : > { %10801 = vmatprep.subr.bf16.mxu1 %v14056_v14  ;;  %v6737_v44 = vmul.f32 1.442695, %v6706_v4 }
 0xb97   : > { %v14059_v38 = vpop.eup %11701  ;;  %10797 = vmatprep.subr.bf16.mxu0 %v10796_v39 }
 0xb98   : > { %v14063_v62 = vpop.eup %11703  ;;  %6773 = vadd.xlane.f32.xlu1 %v6772_v49  ;;  %v6775_v43 = vsel %vm1826_vm4, %v14059_v38, 0.0  ;;  %11707 = vpow2.f32 %v6737_v44 }
 0xb99   : > { %6776 = vadd.xlane.f32.xlu0 %v6775_v43  ;;  %v6778_v5 = vsel %vm1826_vm4, %v14063_v62, 0.0  ;;  %v14069_v58 = vpop.eup %11705  ;;  %11709 = vpow2.f32 %v6735_v21  ;;  %v14921_v43 = vpack.i.bf16 %v13460_v17, %v13462_v51 }
 0xb9a   : > { %v6769_v60 = vsel %vm1826_vm4, %v14069_v58, 0.0 }
 0xb9c   : > { %6779 = vadd.xlane.f32.xlu1 %v6778_v5 }
 0xba0   : > { %6770 = vadd.xlane.f32.xlu1 %v6769_v60 }
 0xba2   : > { %v14081_v59 = vpop.eup %11707 }
 0xba3   : > { %v6784_v54 = vsel %vm1826_vm4, %v14081_v59, 0.0 }
 0xbaf   : > { %11316 = vrot.lane.b32.xlu0 %v12605_v32, %s12023_s14  ;;  %v14085_v32 = vpop.eup %11709 }
 0xbb1   : > { %11321 = vrot.lane.b32.xlu1 %v12619_v37, %s12023_s14  ;;  %v6781_v37 = vsel %vm1826_vm4, %v14085_v32, 0.0 }
 0xbb5   : > { %11326 = vrot.lane.b32.xlu1 %v12629_v46, %s12023_s14 }
 0xbce   : > { %6785 = vadd.xlane.f32.xlu0 %v6784_v54 }
 0xbd9   : > { %v6744_v46 = vpop.xlane.xlu1 %6743  ;;  %6782 = vadd.xlane.f32.xlu1 %v6781_v37 }
 0xbda   : > { %11711 = vrcp.f32 %v6744_v46  ;;  %v6741_v36 = vpop.xlane.xlu0 %6740 }
 0xbdb   : > { %11713 = vrcp.f32 %v6741_v36 }
 0xbe4   : > { %v11712_v61 = vpop.eup %11711 }
 0xbe5   : > { %v11714_v55 = vpop.eup %11713  ;;  %v6804_v49 = vmul.f32 %v11712_v61, %v14002_v57  ;;  %v14922_v57 = vpack.i.bf16 %v13472_v3, %v13474_v2 }
 0xbe6   : > { %v6803_v26 = vmul.f32 %v11714_v55, %v14004_v23 }
 0xbe8   : > { %10328 = vmatprep.mubr.msk.f32.mxu0 %vm1826_vm4, %v6803_v26 }
 0xbe9   : > { %10329 = vmatmul.mubr.msk.f32.vlgmr.msra.gmra.mrb[84].mxu0 %vm1826_vm4, %v6804_v49 }
 0xbea   : > { %10799 = vmatpush3.bf16.msra.mxu0 %v10796_v39  ;;  %11331 = vrot.lane.b32.xlu1 %v14909_v10, %s12023_s14 }
 0xbee   : > { %11336 = vrot.lane.b32.xlu1 %v14921_v43, %s12023_s14 }
 0xbf2   : > { %11341 = vrot.lane.b32.xlu1 %v11340_v6, %s12022_s3 }
 0xbf6   : > { %11351 = vrot.lane.b32.xlu1 %v14922_v57, %s12023_s14 }
 0xbfa   : > { %11356 = vrot.lane.b32.xlu1 %v11355_v20, %s12022_s3 }
 0xc11   : > { %v6750_v10 = vpop.xlane.xlu1 %6749 }
 0xc12   : > { %11715 = vrcp.f32 %v6750_v10  ;;  %v6747_v23 = vpop.xlane.xlu0 %6746 }
 0xc13   : > { %11717 = vrcp.f32 %v6747_v23 }
 0xc15   : > { %v6756_v17 = vpop.xlane.xlu1 %6755 }
 0xc16   : > { %11719 = vrcp.f32 %v6756_v17  ;;  %v6753_v51 = vpop.xlane.xlu0 %6752 }
 0xc17   : > { %11721 = vrcp.f32 %v6753_v51 }
 0xc19   : > { %v6762_v56 = vpop.xlane.xlu1 %6761 }
 0xc1c   : > { %v11716_v31 = vpop.eup %11715 }
 0xc1d   : > { %v11718_v6 = vpop.eup %11717  ;;  %v6768_v39 = vpop.xlane.xlu1 %6767  ;;  %v6806_v2 = vmul.f32 %v11716_v31, %v14018_v7 }
 0xc1e   : > { %v6765_v5 = vpop.xlane.xlu0 %6764  ;;  %v6805_v3 = vmul.f32 %v11718_v6, %v14020_v33 }
 0xc1f   : > { %11723 = vrcp.f32 %v6765_v5 }
 0xc20   : > { %v11720_v9 = vpop.eup %11719  ;;  %10335 = vmatprep.mubr.msk.f32.mxu1 %vm1826_vm4, %v6805_v3  ;;  %11725 = vrcp.f32 %v6762_v56 }
 0xc21   : > { %v11722_v8 = vpop.eup %11721  ;;  %v6759_v20 = vpop.xlane.xlu1 %6758  ;;  %10336 = vmatmul.mubr.msk.f32.vlgmr.msra.gmra.mrb[76].mxu1 %vm1826_vm4, %v6806_v2  ;;  %v6808_v4 = vmul.f32 %v11720_v9, %v14027_v25 }
 0xc22   : > { %11727 = vrcp.f32 %v6759_v20  ;;  %10803 = vmatpush3.bf16.msra.mxu1 %v14056_v14  ;;  %v6807_v60 = vmul.f32 %v11722_v8, %v14029_v22 }
 0xc23   : > { %11729 = vrcp.f32 %v6768_v39 }
 0xc24   : > { %10342 = vmatprep.mubr.msk.f32.mxu0 %vm1826_vm4, %v6807_v60 }
 0xc25   : > { %v6774_v7 = vpop.xlane.xlu1 %6773  ;;  %10343 = vmatmul.mubr.msk.f32.vlgmr.msra.gmra.mrb[86].mxu0 %vm1826_vm4, %v6808_v4 }
 0xc26   : > { %v6777_v33 = vpop.xlane.xlu0 %6776 }
 0xc27   : > { %11731 = vrcp.f32 %v6777_v33  ;;  %v7757_v33 = vld [vmem:[#allocation7] sm:$0xff] }
 0xc28   : > { %11733 = vrcp.f32 %v6774_v7  ;;  %v14923_v7 = vmov 0.0  }
 0xc29   : > { %v11724_v44 = vpop.eup %11723  ;;  %v6780_v28 = vpop.xlane.xlu1 %6779 }
 0xc2a   : > { %v11317_v21 = vpop.permute.xlu0 %11316  ;;  %v6811_v54 = vmul.f32 %v11724_v44, %v14044_v30  ;;  %v11726_v37 = vpop.eup %11725  ;;  %v7758_v44 = vld [vmem:[#allocation7 + $0x8] sm:$0xff] }
 0xc2b   : > { %v11319_v46 = vunpack.i.h.bf16 %v11317_v21  ;;  %v11318_v14 = vunpack.i.l.bf16 %v11317_v21  ;;  %v6810_v26 = vmul.f32 %v11726_v37, %v14037_v29  ;;  %v7759_v21 = vld [vmem:[#allocation7 + $0x10] sm:$0xff] }
 0xc2c   : > { %v11728_v36 = vpop.eup %11727  ;;  %10356 = vmatprep.mubr.msk.f32.mxu0 %vm1826_vm4, %v6811_v54  ;;  %v7760_v54 = vld [vmem:[#allocation7 + $0x18] sm:$0xff] }
 0xc2d   : > { %v10804_v25 = vpack.c.bf16 %v11319_v46, %v11318_v14  ;;  %v6771_v22 = vpop.xlane.xlu1 %6770  ;;  %v6809_v61 = vmul.f32 %v11728_v36, %v14048_v53  ;;  %v11730_v55 = vpop.eup %11729  ;;  %v10824_v37 = vpack.c.bf16 %v7760_v54, %v7759_v21  ;;  %v7761_v46 = vld [vmem:[#allocation7 + $0x20] sm:$0xff]  ;;  %v7762_v14 = vld [vmem:[#allocation7 + $0x28] sm:$0xff]  ;;  %v7764_v36 = vld [vmem:[#allocation7 + $0x38] sm:$0xff] }
 0xc2e   : > { %11735 = vrcp.f32 %v6771_v22  ;;  %v6812_v49 = vmul.f32 %v11730_v55, %v14042_v19  ;;  %v7765_v22 = vld [vmem:[#allocation7 + $0x40] sm:$0xff] }
 0xc2f   : > { %11737 = vrcp.f32 %v6780_v28  ;;  %10349 = vmatprep.mubr.msk.f32.mxu1 %vm1826_vm4, %v6809_v61  ;;  %10805 = vmatprep.subr.bf16.mxu0 %v10804_v25  ;;  %v10820_v28 = vpack.c.bf16 %v7758_v44, %v7757_v33  ;;  %v7766_v61 = vld [vmem:[#allocation7 + $0x48] sm:$0xff]  ;;  %v14938_v33 = vld [vmem:[#allocation53_spill] sm:$0xff] }
 0xc30   : > { %10350 = vmatmul.mubr.msk.f32.vlgmr.msra.gmra.mrb[78].mxu1 %vm1826_vm4, %v6810_v26  ;;  %10807 = vmatpush3.bf16.msra.mxu0 %v10804_v25  ;;  %v10836_v55 = vpack.c.bf16 %v7766_v61, %v7765_v22  ;;  %v7767_v26 = vld [vmem:[#allocation7 + $0x50] sm:$0xff] }
 0xc31   : > { %v11732_v30 = vpop.eup %11731  ;;  %v11322_v43 = vpop.permute.xlu1 %11321 }
 0xc32   : > { %v11324_v57 = vunpack.i.h.bf16 %v11322_v43  ;;  %v11323_v10 = vunpack.i.l.bf16 %v11322_v43  ;;  %v6815_v23 = vmul.f32 %v11732_v30, %v14059_v38  ;;  %v11734_v56 = vpop.eup %11733  ;;  %v7768_v30 = vld [vmem:[#allocation7 + $0x58] sm:$0xff]  ;;  %v7769_v43 = vld [vmem:[#allocation7 + $0x60] sm:$0xff] }
 0xc33   : > { %10357 = vmatmul.mubr.msk.f32.vlgmr.msra.gmra.mrb[88].mxu0 %vm1826_vm4, %v6812_v49  ;;  %v6814_v5 = vmul.f32 %v11734_v56, %v14054_v63  ;;  %v10840_v49 = vpack.c.bf16 %v7768_v30, %v7767_v26 }
 0xc34   : > { %v10808_v53 = vpack.c.bf16 %v11324_v57, %v11323_v10  ;;  %10370 = vmatprep.mubr.msk.f32.mxu0 %vm1826_vm4, %v6815_v23  ;;  %v7770_v57 = vld [vmem:[#allocation7 + $0x68] sm:$0xff]  ;;  %v7771_v23 = vld [vmem:[#allocation7 + $0x70] sm:$0xff] }
 0xc35   : > { %v11327_v29 = vpop.permute.xlu1 %11326  ;;  %v10844_v10 = vpack.c.bf16 %v7770_v57, %v7769_v43 }
 0xc36   : > { %v11329_v17 = vunpack.i.h.bf16 %v11327_v29  ;;  %v11328_v51 = vunpack.i.l.bf16 %v11327_v29  ;;  %10809 = vmatprep.subr.bf16.mxu1 %v10808_v53 }
 0xc37   : > { %10811 = vmatpush3.bf16.msra.mxu1 %v10808_v53  ;;  %v7772_v53 = vld [vmem:[#allocation7 + $0x78] sm:$0xff] }
 0xc38   : > { %v11736_v31 = vpop.eup %11735  ;;  %v10812_v6 = vpack.c.bf16 %v11329_v17, %v11328_v51  ;;  %v10848_v29 = vpack.c.bf16 %v7772_v53, %v7771_v23 }
 0xc39   : > { %v11738_v39 = vpop.eup %11737  ;;  %v6813_v19 = vmul.f32 %v11736_v31, %v14069_v58 }
 0xc3a   : > { %10813 = vmatprep.subr.bf16.mxu0 %v10812_v6  ;;  %v6816_v38 = vmul.f32 %v11738_v39, %v14063_v62 }
 0xc3b   : > { %10363 = vmatprep.mubr.msk.f32.mxu1 %vm1826_vm4, %v6813_v19  ;;  %10815 = vmatpush3.bf16.msra.mxu0 %v10812_v6 }
 0xc3c   : > { %10364 = vmatmul.mubr.msk.f32.vlgmr.msra.gmra.mrb[80].mxu1 %vm1826_vm4, %v6814_v5  ;;  %10821 = vmatprep.subr.bf16.mxu0 %v10820_v28 }
 0xc3e   : > { %10371 = vmatmul.mubr.msk.f32.vlgmr.msra.gmra.mrb[90].mxu0 %vm1826_vm4, %v6816_v38 }
 0xc3f   : > { %10823 = vmatpush3.bf16.msra.mxu0 %v10820_v28 }
 0xc40   : > { %10825 = vmatprep.subr.bf16.mxu0 %v10824_v37 }
 0xc43   : > { %10827 = vmatpush3.bf16.msra.mxu0 %v10824_v37 }
 0xc5b   : > { %v6786_v3 = vpop.xlane.xlu0 %6785 }
 0xc5c   : > { %11739 = vrcp.f32 %v6786_v3  ;;  %v14924_v3 = vpack.i.bf16 %v13466_v42, %v13468_v27  ;;  %v14926_v27 = vld [vmem:[#allocation23_spill] sm:$0xff] }
 0xc66   : > { %v6783_v2 = vpop.xlane.xlu1 %6782  ;;  %v11740_v63 = vpop.eup %11739 }
 0xc67   : > { %11741 = vrcp.f32 %v6783_v2  ;;  %v6818_v62 = vmul.f32 %v11740_v63, %v14081_v59  ;;  %v10828_v59 = vpack.c.bf16 %v7762_v14, %v7761_v46 }
 0xc69   : > { %10829 = vmatprep.subr.bf16.mxu0 %v10828_v59 }
 0xc6a   : > { %v11332_v9 = vpop.permute.xlu1 %11331  ;;  %10831 = vmatpush3.bf16.msra.mxu0 %v10828_v59 }
 0xc6b   : > { %v11334_v8 = vunpack.i.h.bf16 %v11332_v9  ;;  %v11333_v20 = vunpack.i.l.bf16 %v11332_v9  ;;  %v14925_v9 = vpack.i.bf16 %v13478_v13, %v13482_v52  ;;  %v14928_v13 = vpack.i.bf16 %v13882_v0, %v13884_v15  ;;  %v14929_v52 = vld [vmem:[#allocation48_spill] sm:$0xff] }
 0xc6c   : > { %v14931_v48 = vpack.i.bf16 %v14929_v52, %v14930_v41  ;;  %v14936_v0 = vpack.i.bf16 %v13906_v34, %v13908_v24  ;;  %v14937_v15 = vld [vmem:[#allocation52_spill] sm:$0xff]  ;;  %v14941_v24 = vld [vmem:[#allocation19_spill] sm:$0xff]  ;;  %v14944_v52 = vld [vmem:[#allocation38_spill] sm:$0xff] }
 0xc6d   : > { %v10816_v58 = vpack.c.bf16 %v11334_v8, %v11333_v20  ;;  %v14927_v8 = vpack.i.bf16 %v13480_v16, %v14926_v27  ;;  %v14939_v44 = vpack.i.bf16 %v14937_v15, %v14938_v33  ;;  %v14947_v33 = vld [vmem:[#allocation40_spill] sm:$0xff] }
 0xc6e   : > { %v11337_v28 = vpop.permute.xlu1 %11336 }
 0xc6f   : > { %10817 = vmatprep.subr.bf16.mxu1 %v10816_v58  ;;  %v11339_v54 = vunpack.i.h.bf16 %v11337_v28  ;;  %v11338_v37 = vunpack.i.l.bf16 %v11337_v28 }
 0xc70   : > { %10819 = vmatpush3.bf16.msra.mxu1 %v10816_v58 }
 0xc71   : > { %v11742_v60 = vpop.eup %11741 }
 0xc72   : > { %v6817_v4 = vmul.f32 %v11742_v60, %v14085_v32  ;;  %v7763_v32 = vld [vmem:[#allocation7 + $0x30] sm:$0xff]  ;;  %v14932_v60 = vld [vmem:[#allocation50_spill] sm:$0xff]  ;;  %v11342_v21 = vpop.permute.xlu1 %11341 }
 0xc73   : > { %v10832_v25 = vpack.c.bf16 %v7764_v36, %v7763_v32  ;;  %v11344_v46 = vunpack.i.h.bf16 %v11342_v21  ;;  %v11343_v14 = vunpack.i.l.bf16 %v11342_v21  ;;  %v7707_v36 = vsel %vm1109_vm0, %v14941_v24, %v11338_v37 }
 0xc74   : > { %10377 = vmatprep.mubr.msk.f32.mxu1 %vm1826_vm4, %v6817_v4  ;;  %v14933_v4 = vld [vmem:[#allocation51_spill] sm:$0xff] }
 0xc75   : > { %10378 = vmatmul.mubr.msk.f32.vlgmr.msra.gmra.mrb[82].mxu1 %vm1826_vm4, %v6818_v62  ;;  %10833 = vmatprep.subr.bf16.mxu0 %v10832_v25  ;;  %v14934_v62 = vpack.i.bf16 %v14932_v60, %v14933_v4 }
 0xc76   : > { %8329 = vmatprep.mubr.f32.mxu1 %v14923_v7  ;;  %10835 = vmatpush3.bf16.msra.mxu0 %v10832_v25  ;;  %v7724_v25 = vsel %vm7723_vm5, %v7707_v36, %v11343_v14  ;;  %v11352_v43 = vpop.permute.xlu1 %11351 }
 0xc77   : > { %10837 = vmatprep.subr.bf16.mxu0 %v10836_v55  ;;  %v11353_v23 = vunpack.i.l.bf16 %v11352_v43 }
 0xc7a   : > { %10839 = vmatpush3.bf16.msra.mxu0 %v10836_v55  ;;  %v11357_v57 = vpop.permute.xlu1 %11356 }
 0xc7b   : > { %10841 = vmatprep.subr.bf16.mxu0 %v10840_v49  ;;  %v11359_v53 = vunpack.i.h.bf16 %v11357_v57 }
 0xc7e   : > { %10843 = vmatpush3.bf16.msra.mxu0 %v10840_v49 }
 0xc7f   : > { %10845 = vmatprep.subr.bf16.mxu0 %v10844_v10 }
 0xc82   : > { %10847 = vmatpush3.bf16.msra.mxu0 %v10844_v10  ;;  %v11354_v10 = vunpack.i.h.bf16 %v11352_v43  ;;  %v14949_v43 = vld [vmem:[#allocation42_spill] sm:$0xff] }
 0xc83   : > { %10849 = vmatprep.subr.bf16.mxu0 %v10848_v29 }
 0xc86   : > { %10851 = vmatpush3.bf16.msra.mxu0 %v10848_v29  ;;  %v11358_v29 = vunpack.i.l.bf16 %v11357_v57 }
 0xcbc   : > { %v10330_v17 = vpop.f32.mrb[84].mxu0 }
 0xcbd   : > { %v6897_v51 = vpop.f32.mrb[85].mxu0 }
 0xcbe   : > { %v11345_v56 = vpack.i.bf16 %v10330_v17, %v6897_v51 }
 0xcc0   : > { %11346 = vrot.lane.b32.xlu0 %v11345_v56, %s12021_s16 }
 0xcf4   : > { %v10337_v31 = vpop.f32.mrb[76].mxu1 }
 0xcf5   : > { %v6984_v6 = vpop.f32.mrb[77].mxu1 }
 0xcf6   : > { %v11360_v39 = vpack.i.bf16 %v10337_v31, %v6984_v6  ;;  %v14942_v31 = vld [vmem:[#allocation35_spill] sm:$0xff] }
 0xcf7   : > { %v7709_v6 = vsel %vm1109_vm0, %v14942_v31, %v11353_v23 }
 0xcf8   : > { %11361 = vrot.lane.b32.xlu1 %v11360_v39, %s12021_s16  ;;  %v10344_v19 = vpop.f32.mrb[86].mxu0  ;;  %v14943_v39 = vld [vmem:[#allocation37_spill] sm:$0xff] }
 0xcf9   : > { %v7071_v5 = vpop.f32.mrb[87].mxu0 }
 0xcfa   : > { %v11375_v38 = vpack.i.bf16 %v10344_v19, %v7071_v5  ;;  %v7710_v19 = vsel %vm1109_vm0, %v14943_v39, %v11354_v10  ;;  %v7726_v5 = vsel %vm7723_vm5, %v7709_v6, %v11358_v29  ;;  %v14950_v6 = vld [vmem:[#allocation45_spill] sm:$0xff] }
 0xcfc   : > { %11366 = vrot.lane.b32.xlu1 %v14924_v3, %s12023_s14  ;;  %11376 = vrot.lane.b32.xlu0 %v11375_v38, %s12021_s16  ;;  %v7727_v38 = vsel %vm7723_vm5, %v7710_v19, %v11359_v53  ;;  %v14951_v19 = vld [vmem:[#allocation44_spill] sm:$0xff] }
 0xd00   : > { %11371 = vrot.lane.b32.xlu1 %v11370_v45, %s12022_s3  ;;  %11386 = vrot.lane.b32.xlu0 %v11385_v18, %s12022_s3 }
 0xd03   : > { %v10351_v2 = vpop.f32.mrb[78].mxu1 }
 0xd04   : > { %11381 = vrot.lane.b32.xlu1 %v14925_v9, %s12023_s14  ;;  %v7158_v42 = vpop.f32.mrb[79].mxu1  ;;  %11396 = vrot.lane.b32.xlu0 %v14927_v8, %s12023_s14 }
 0xd05   : > { %v11390_v20 = vpack.i.bf16 %v10351_v2, %v7158_v42 }
 0xd06   : > { %v10358_v35 = vpop.f32.mrb[88].mxu0 }
 0xd07   : > { %v7245_v50 = vpop.f32.mrb[89].mxu0 }
 0xd08   : > { %v11405_v45 = vpack.i.bf16 %v10358_v35, %v7245_v50  ;;  %11391 = vrot.lane.b32.xlu1 %v11390_v20, %s12021_s16 }
 0xd0a   : > { %11406 = vrot.lane.b32.xlu0 %v11405_v45, %s12021_s16 }
 0xd0c   : > { %11401 = vrot.lane.b32.xlu1 %v11400_v11, %s12022_s3  ;;  %v14935_v11 = vpack.i.bf16 %v13888_v12, %v13890_v1  ;;  %v14940_v12 = vld [vmem:[#allocation36_spill] sm:$0xff] }
 0xd0d   : > { %v7708_v1 = vsel %vm1109_vm0, %v14940_v12, %v11339_v54 }
 0xd0e   : > { %11416 = vrot.lane.b32.xlu0 %v14928_v13, %s12022_s3  ;;  %v7725_v22 = vsel %vm7723_vm5, %v7708_v1, %v11344_v46 }
 0xd0f   : > { %v10365_v16 = vpop.f32.mrb[80].mxu1 }
 0xd10   : > { %11411 = vrot.lane.b32.xlu1 %v14931_v48, %s12023_s14  ;;  %v7332_v18 = vpop.f32.mrb[81].mxu1  ;;  %v14945_v48 = vld [vmem:[#allocation39_spill] sm:$0xff] }
 0xd11   : > { %v11420_v58 = vpack.i.bf16 %v10365_v16, %v7332_v18  ;;  %v10372_v63 = vpop.f32.mrb[90].mxu0 }
 0xd12   : > { %11426 = vrot.lane.b32.xlu0 %v14934_v62, %s12023_s14  ;;  %v7419_v40 = vpop.f32.mrb[91].mxu0 }
 0xd13   : > { %v11435_v47 = vpack.i.bf16 %v10372_v63, %v7419_v40 }
 0xd14   : > { %11421 = vrot.lane.b32.xlu1 %v11420_v58, %s12021_s16 }
 0xd16   : > { %11436 = vrot.lane.b32.xlu0 %v11435_v47, %s12021_s16 }
 0xd18   : > { %11431 = vrot.lane.b32.xlu1 %v14935_v11, %s12022_s3 }
 0xd1a   : > { %11446 = vrot.lane.b32.xlu0 %v14936_v0, %s12022_s3  ;;  %v14946_v0 = vld [vmem:[#allocation41_spill] sm:$0xff]  ;;  %s14958_s3 = sld [smem:[#allocation56_spill]] }
 0xd1c   : > { %11441 = vrot.lane.b32.xlu1 %v14939_v44, %s12023_s14  ;;  %s14668_s14 = scalar_lea.vmem [#allocation11], %s9182_s17  ;;  %s9395_s17 = sshll.u32 %s12113_s25, 11 }
 0xd1d   : > { %s9059_s26 = sshll.u32 %s14668_s14, 4  ;;  %s14718_s28 = scalar_lea.hbm %s14959_s13, %s9395_s17  ;;  %s14720_s26 = int_to_ptr.vmem [resolvable:$true] %s9059_s26 }
 0xd1e   : > { %s11933_s27 = scalar_lea.vmem %s14720_s26, 2048  ;;  %s12024_s25 = smov [#allocation11]  }
 0xd1f   : > { %p11934_p3 = scmp.ne.s32.totalorder %s14720_s26, %s11933_s27  ;;  %s11937_s29 = sshll.u32 %s12024_s25, 4  ;;  %s11938_s29 = int_to_ptr.vmem [resolvable:$false] %s11937_s29 }
 0xd20   : > { %p11940_p12 = scmp.lt.s32.totalorder %s14720_s26, %s11938_s29 }
 0xd21   : > { %p11935_p5 = pnand %p11934_p3, %p12254_p10 }
 0xd23   : > { %p11936_p7 = pneg %p11935_p5 }
 0xd32   : > { %v11347_v32 = vpop.permute.xlu0 %11346 }
 0xd33   : > { %v11349_v59 = vunpack.i.h.bf16 %v11347_v32  ;;  %v11348_v34 = vunpack.i.l.bf16 %v11347_v32 }
 0xd35   : > { %v7741_v61 = vsel %vm7740_vm6, %v7724_v25, %v11348_v34  ;;  %v7742_v55 = vsel %vm7740_vm6, %v7725_v22, %v11349_v59 }
 0xd36   : > { %10412 = vmatprep.mubr.f32.mxu0 %v7741_v61 }
 0xd37   : > { %10413 = vmatmul.mubr.f32.vlgmr.msra.gmra.mrb[92].mxu0 %v7742_v55 }
 0xd48   : > { %v10379_v26 = vpop.f32.mrb[82].mxu1 }
 0xd49   : > { %v7506_v30 = vpop.f32.mrb[83].mxu1 }
 0xd4a   : > { %v11450_v49 = vpack.i.bf16 %v10379_v26, %v7506_v30  ;;  %v14948_v30 = vld [vmem:[#allocation43_spill] sm:$0xff] }
 0xd4c   : > { %11451 = vrot.lane.b32.xlu1 %v11450_v49, %s12021_s16 }
 0xd6a   : > { %v11362_v17 = vpop.permute.xlu1 %11361 }
 0xd6b   : > { %v11364_v51 = vunpack.i.h.bf16 %v11362_v17  ;;  %v11363_v56 = vunpack.i.l.bf16 %v11362_v17 }
 0xd6d   : > { %v7743_v3 = vsel %vm7740_vm6, %v7726_v5, %v11363_v56  ;;  %v7744_v2 = vsel %vm7740_vm6, %v7727_v38, %v11364_v51 }
 0xd6e   : > { %v11367_v9 = vpop.permute.xlu1 %11366  ;;  %10415 = vmatprep.mubr.f32.mxu0 %v7743_v3  ;;  %v11377_v42 = vpop.permute.xlu0 %11376 }
 0xd6f   : > { %10416 = vmatmul.mubr.f32.gmra.mrb[94].mxu0 %v7744_v2  ;;  %v11369_v27 = vunpack.i.h.bf16 %v11367_v9  ;;  %v11368_v8 = vunpack.i.l.bf16 %v11367_v9  ;;  %v11379_v13 = vunpack.i.h.bf16 %v11377_v42  ;;  %v11378_v16 = vunpack.i.l.bf16 %v11377_v42 }
 0xd71   : > { %v7711_v41 = vsel %vm1109_vm0, %v14944_v52, %v11368_v8  ;;  %v7712_v18 = vsel %vm1109_vm0, %v14945_v48, %v11369_v27 }
 0xd72   : > { %v11372_v20 = vpop.permute.xlu1 %11371  ;;  %v11387_v35 = vpop.permute.xlu0 %11386 }
 0xd73   : > { %v11374_v50 = vunpack.i.h.bf16 %v11372_v20  ;;  %v11373_v45 = vunpack.i.l.bf16 %v11372_v20  ;;  %v11389_v28 = vunpack.i.h.bf16 %v11387_v35  ;;  %v11388_v21 = vunpack.i.l.bf16 %v11387_v35 }
 0xd75   : > { %v7728_v58 = vsel %vm7723_vm5, %v7711_v41, %v11373_v45  ;;  %v7729_v63 = vsel %vm7723_vm5, %v7712_v18, %v11374_v50 }
 0xd76   : > { %v11382_v60 = vpop.permute.xlu1 %11381  ;;  %v7745_v4 = vsel %vm7740_vm6, %v7728_v58, %v11378_v16  ;;  %v7746_v62 = vsel %vm7740_vm6, %v7729_v63, %v11379_v13  ;;  %v11397_v11 = vpop.permute.xlu0 %11396  ;;  %v14952_v58 = vld [vmem:[#allocation47_spill] sm:$0xff] }
 0xd77   : > { %v11384_v40 = vunpack.i.h.bf16 %v11382_v60  ;;  %v11383_v47 = vunpack.i.l.bf16 %v11382_v60  ;;  %10418 = vmatprep.mubr.f32.mxu0 %v7745_v4  ;;  %v11399_v14 = vunpack.i.h.bf16 %v11397_v11  ;;  %v11398_v32 = vunpack.i.l.bf16 %v11397_v11  ;;  %v14953_v60 = vld [vmem:[#allocation46_spill] sm:$0xff] }
 0xd78   : > { %10419 = vmatmul.mubr.f32.gmra.mrb[96].mxu0 %v7746_v62 }
 0xd79   : > { %v7713_v15 = vsel %vm1109_vm0, %v14946_v0, %v11383_v47  ;;  %v7714_v44 = vsel %vm1109_vm0, %v14947_v33, %v11384_v40  ;;  %v7715_v49 = vsel %vm1109_vm0, %v14948_v30, %v11398_v32  ;;  %v7716_v57 = vsel %vm1109_vm0, %v14949_v43, %v11399_v14  ;;  %v11776_v30 = vld [vmem:[%s12315_s12] sm:$0xff] }
 0xd7a   : > { %v11392_v54 = vpop.permute.xlu1 %11391  ;;  %v7730_v1 = vsel %vm7723_vm5, %v7713_v15, %v11388_v21  ;;  %v7731_v59 = vsel %vm7723_vm5, %v7714_v44, %v11389_v28  ;;  %v14954_v28 = vld [vmem:[#allocation34_spill] sm:$0xff] }
 0xd7b   : > { %v11394_v37 = vunpack.i.h.bf16 %v11392_v54  ;;  %v11393_v46 = vunpack.i.l.bf16 %v11392_v54  ;;  %v14955_v54 = vld [vmem:[#allocation33_spill] sm:$0xff] }
 0xd7c   : > { %v11407_v12 = vpop.permute.xlu0 %11406 }
 0xd7d   : > { %v7747_v34 = vsel %vm7740_vm6, %v7730_v1, %v11393_v46  ;;  %v7748_v24 = vsel %vm7740_vm6, %v7731_v59, %v11394_v37  ;;  %v11409_v61 = vunpack.i.h.bf16 %v11407_v12  ;;  %v11408_v55 = vunpack.i.l.bf16 %v11407_v12 }
 0xd7e   : > { %v11402_v36 = vpop.permute.xlu1 %11401  ;;  %10421 = vmatprep.mubr.f32.mxu0 %v7747_v34 }
 0xd7f   : > { %v11404_v25 = vunpack.i.h.bf16 %v11402_v36  ;;  %v11403_v22 = vunpack.i.l.bf16 %v11402_v36  ;;  %10422 = vmatmul.mubr.f32.gmra.mrb[98].mxu0 %v7748_v24 }
 0xd80   : > { %v11417_v26 = vpop.permute.xlu0 %11416 }
 0xd81   : > { %v7732_v10 = vsel %vm7723_vm5, %v7715_v49, %v11403_v22  ;;  %v7733_v23 = vsel %vm7723_vm5, %v7716_v57, %v11404_v25  ;;  %v11419_v38 = vunpack.i.h.bf16 %v11417_v26  ;;  %v11418_v3 = vunpack.i.l.bf16 %v11417_v26  ;;  %v14265_v22 = vld [vmem:[%s14771_s5] ss:$0 sm:$0xff] }
 0xd82   : > { %v11412_v53 = vpop.permute.xlu1 %11411  ;;  %v7749_v29 = vsel %vm7740_vm6, %v7732_v10, %v11408_v55  ;;  %v7750_v17 = vsel %vm7740_vm6, %v7733_v23, %v11409_v61  ;;  %v11775_v61 = vld [vmem:[%s12315_s12 + $0x8] sm:$0xff] }
 0xd83   : > { %v11414_v51 = vunpack.i.h.bf16 %v11412_v53  ;;  %v11413_v56 = vunpack.i.l.bf16 %v11412_v53  ;;  %10424 = vmatprep.mubr.f32.mxu0 %v7749_v29  ;;  %v11777_v53 = vld [vmem:[%s12315_s12 + $0x10] sm:$0xff] }
 0xd84   : > { %v11427_v31 = vpop.permute.xlu0 %11426  ;;  %10425 = vmatmul.mubr.f32.gmra.mrb[100].mxu0 %v7750_v17  ;;  %v11778_v17 = vld [vmem:[%s12315_s12 + $0x18] sm:$0xff] }
 0xd85   : > { %v7717_v39 = vsel %vm1109_vm0, %v14950_v6, %v11413_v56  ;;  %v7718_v5 = vsel %vm1109_vm0, %v14951_v19, %v11414_v51  ;;  %v11429_v27 = vunpack.i.h.bf16 %v11427_v31  ;;  %v11428_v8 = vunpack.i.l.bf16 %v11427_v31 }
 0xd86   : > { %v11422_v2 = vpop.permute.xlu1 %11421  ;;  %v7734_v20 = vsel %vm7723_vm5, %v7717_v39, %v11418_v3  ;;  %v7735_v35 = vsel %vm7723_vm5, %v7718_v5, %v11419_v38  ;;  %v11779_v39 = vld [vmem:[%s12315_s12 + $0x28] sm:$0xff]  ;;  %v11780_v38 = vld [vmem:[%s12315_s12 + $0x20] sm:$0xff] }
 0xd87   : > { %v11424_v9 = vunpack.i.h.bf16 %v11422_v2  ;;  %v11423_v42 = vunpack.i.l.bf16 %v11422_v2  ;;  %v7719_v63 = vsel %vm1109_vm0, %v14952_v58, %v11428_v8  ;;  %v7720_v4 = vsel %vm1109_vm0, %v14953_v60, %v11429_v27  ;;  %v11781_v27 = vld [vmem:[%s12315_s12 + $0x38] sm:$0xff] }
 0xd88   : > { %v11437_v50 = vpop.permute.xlu0 %11436 }
 0xd89   : > { %v7751_v45 = vsel %vm7740_vm6, %v7734_v20, %v11423_v42  ;;  %v7752_v13 = vsel %vm7740_vm6, %v7735_v35, %v11424_v9  ;;  %v11439_v48 = vunpack.i.h.bf16 %v11437_v50  ;;  %v11438_v18 = vunpack.i.l.bf16 %v11437_v50  ;;  %v11782_v35 = vld [vmem:[%s12315_s12 + $0x30] sm:$0xff] }
 0xd8a   : > { %v11432_v16 = vpop.permute.xlu1 %11431  ;;  %10427 = vmatprep.mubr.f32.mxu0 %v7751_v45 }
 0xd8b   : > { %v11434_v52 = vunpack.i.h.bf16 %v11432_v16  ;;  %v11433_v41 = vunpack.i.l.bf16 %v11432_v16  ;;  %10428 = vmatmul.mubr.f32.gmra.mrb[102].mxu0 %v7752_v13 }
 0xd8c   : > { %v11447_v44 = vpop.permute.xlu0 %11446 }
 0xd8d   : > { %v7736_v62 = vsel %vm7723_vm5, %v7719_v63, %v11433_v41  ;;  %v7737_v40 = vsel %vm7723_vm5, %v7720_v4, %v11434_v52  ;;  %v11449_v46 = vunpack.i.h.bf16 %v11447_v44  ;;  %v11448_v14 = vunpack.i.l.bf16 %v11447_v44  ;;  %v11783_v52 = vld [vmem:[%s12315_s12 + $0x48] sm:$0xff] }
 0xd8e   : > { %v7753_v47 = vsel %vm7740_vm6, %v7736_v62, %v11438_v18  ;;  %v7754_v11 = vsel %vm7740_vm6, %v7737_v40, %v11439_v48  ;;  %v11442_v0 = vpop.permute.xlu1 %11441  ;;  %v11784_v18 = vld [vmem:[%s12315_s12 + $0x40] sm:$0xff]  ;;  %v11785_v62 = vld [vmem:[%s12315_s12 + $0x58] sm:$0xff] }
 0xd8f   : > { %10430 = vmatprep.mubr.f32.mxu0 %v7753_v47  ;;  %v11444_v15 = vunpack.i.h.bf16 %v11442_v0  ;;  %v11443_v33 = vunpack.i.l.bf16 %v11442_v0 }
 0xd90   : > { %10431 = vmatmul.mubr.f32.gmra.mrb[104].mxu0 %v7754_v11  ;;  %v11786_v11 = vld [vmem:[%s12315_s12 + $0x50] sm:$0xff] }
 0xd91   : > { %v7721_v21 = vsel %vm1109_vm0, %v14954_v28, %v11443_v33  ;;  %v7722_v37 = vsel %vm1109_vm0, %v14955_v54, %v11444_v15  ;;  %v11787_v28 = vld [vmem:[%s12315_s12 + $0x68] sm:$0xff] }
 0xd92   : > { %v7738_v59 = vsel %vm7723_vm5, %v7721_v21, %v11448_v14  ;;  %v7739_v34 = vsel %vm7723_vm5, %v7722_v37, %v11449_v46  ;;  %v11788_v37 = vld [vmem:[%s12315_s12 + $0x60] sm:$0xff] }
 0xdbe   : > { %v11452_v32 = vpop.permute.xlu1 %11451 }
 0xdbf   : > { %v11454_v12 = vunpack.i.h.bf16 %v11452_v32  ;;  %v11453_v1 = vunpack.i.l.bf16 %v11452_v32 }
 0xdc1   : > { %v7755_v24 = vsel %vm7740_vm6, %v7738_v59, %v11453_v1  ;;  %v7756_v36 = vsel %vm7740_vm6, %v7739_v34, %v11454_v12  ;;  %v8180_v12 = vld [vmem:[#allocation8 + $0x8] sm:$0xff]  ;;  %v8182_v59 = vld [vmem:[#allocation8 + $0x18] sm:$0xff] }
 0xdc2   : > { %10433 = vmatprep.mubr.f32.mxu0 %v7755_v24  ;;  %v8184_v1 = vld [vmem:[#allocation8 + $0x28] sm:$0xff]  ;;  %v8186_v24 = vld [vmem:[#allocation8 + $0x38] sm:$0xff] }
 0xdc3   : > { %10434 = vmatmul.mubr.f32.gmra.mrb[106].mxu0 %v7756_v36  ;;  %v10852_v34 = vpack.c.bf16 %v8184_v1, %v8180_v12  ;;  %v8179_v36 = vld [vmem:[#allocation8] sm:$0xff]  ;;  %v8201_v1 = vld [vmem:[#allocation8 + $0xb0] sm:$0xff] }
 0xdc4   : > { %8490 = vmatprep.mubr.f32.mxu0 %v14923_v7 }
 0xdc5   : > { %10853 = vmatprep.subr.bf16.mxu1 %v10852_v34  ;;  %v8204_v34 = vld [vmem:[#allocation8 + $0xc8] sm:$0xff] }
 0xe0a   : > { %v10414_v25 = vpop.f32.mrb[92].mxu0 }
 0xe0b   : > { %v7919_v55 = vadd.f32 %v11775_v61, %v10414_v25  ;;  %v7839_v26 = vpop.f32.mrb[93].mxu0  ;;  %v8183_v25 = vld [vmem:[#allocation8 + $0x20] sm:$0xff]  ;;  %v10884_v61 = vpack.c.bf16 %v8186_v24, %v8182_v59  ;;  %v8208_v24 = vld [vmem:[#allocation8 + $0xe8] sm:$0xff] }
 0xe0c   : > { %v7918_v49 = vadd.f32 %v11776_v30, %v7839_v26  ;;  %v8181_v26 = vld [vmem:[#allocation8 + $0x10] sm:$0xff] }
 0xe0d   : > { %v14270_v43 = vadd.f32 %v14265_v22, %v7919_v55  ;;  %v10854_v55 = vpack.c.bf16 %v8183_v25, %v8179_v36  ;;  %v8185_v30 = vld [vmem:[#allocation8 + $0x30] sm:$0xff]  ;;  %10885 = vmatprep.subr.bf16.mxu0 %v10884_v61  ;;  %v8206_v36 = vld [vmem:[#allocation8 + $0xd8] sm:$0xff]  ;;  %v10864_v25 = vpack.c.bf16 %v8208_v24, %v8204_v34 }
 0xe0e   : > { %v14273_v57 = vadd.f32 %v14265_v22, %v7918_v49  ;;  %v10886_v49 = vpack.c.bf16 %v8185_v30, %v8181_v26  ;;  %v8210_v61 = vld [vmem:[#allocation8 + $0xf8] sm:$0xff]  ;;  %v8207_v26 = vld [vmem:[#allocation8 + $0xe0] sm:$0xff]  ;;  %v8233_v34 = vld [vmem:[#allocation8 + $0x1b0] sm:$0xff] }
 0xe0f   : > { %7959 = vadd.xlane.f32.xlu1 %v14270_v43  ;;  %10855 = vmatpush1.bf16.msra.mxu1 %v10854_v55  ;;  %v8203_v55 = vld [vmem:[#allocation8 + $0xc0] sm:$0xff]  ;;  %v10896_v30 = vpack.c.bf16 %v8210_v61, %v8206_v36  ;;  %v8236_v36 = vld [vmem:[#allocation8 + $0x1c8] sm:$0xff]  ;;  %v8238_v61 = vld [vmem:[#allocation8 + $0x1d8] sm:$0xff] }
 0xe10   : > { %7957 = vadd.xlane.f32.xlu0 %v14273_v57  ;;  %10887 = vmatpush1.bf16.msra.mxu0 %v10886_v49  ;;  %v10866_v49 = vpack.c.bf16 %v8207_v26, %v8203_v55 }
 0xe42   : > { %v10417_v10 = vpop.f32.mrb[94].mxu0 }
 0xe43   : > { %v7849_v23 = vpop.f32.mrb[95].mxu0  ;;  %v7921_v51 = vadd.f32 %v11778_v17, %v10417_v10  ;;  %v11790_v17 = vld [vmem:[%s12315_s12 + $0x70] sm:$0xff] }
 0xe44   : > { %v7920_v29 = vadd.f32 %v11777_v53, %v7849_v23  ;;  %v11789_v23 = vld [vmem:[%s12315_s12 + $0x78] sm:$0xff]  ;;  %s9045_s12 = scalar_lea.sflag [#allocation4], %s12309_s21 }
 0xe45   : > { %v14284_v31 = vadd.f32 %v14265_v22, %v7921_v51 }
 0xe46   : > { %v14280_v56 = vadd.f32 %v14265_v22, %v7920_v29 }
 0xe48   : > { %7961 = vadd.xlane.f32.xlu0 %v14280_v56 }
 0xe4b   : > { %v10420_v6 = vpop.f32.mrb[96].mxu0 }
 0xe4c   : > { %v7923_v19 = vadd.f32 %v11779_v39, %v10420_v6  ;;  %7963 = vadd.xlane.f32.xlu0 %v14284_v31  ;;  %v7859_v5 = vpop.f32.mrb[97].mxu0 }
 0xe4d   : > { %v7922_v3 = vadd.f32 %v11780_v38, %v7859_v5 }
 0xe4e   : > { %v14290_v2 = vadd.f32 %v14265_v22, %v7923_v19 }
 0xe4f   : > { %v14293_v9 = vadd.f32 %v14265_v22, %v7922_v3 }
 0xe50   : > { %7967 = vadd.xlane.f32.xlu0 %v14290_v2 }
 0xe51   : > { %7965 = vadd.xlane.f32.xlu1 %v14293_v9 }
 0xe52   : > { %v10423_v42 = vpop.f32.mrb[98].mxu0 }
 0xe53   : > { %v7925_v8 = vadd.f32 %v11781_v27, %v10423_v42  ;;  %v7869_v20 = vpop.f32.mrb[99].mxu0 }
 0xe54   : > { %v7924_v50 = vadd.f32 %v11782_v35, %v7869_v20  ;;  %v8188_v20 = vld [vmem:[#allocation8 + $0x48] sm:$0xff] }
 0xe55   : > { %v14300_v45 = vadd.f32 %v14265_v22, %v7925_v8  ;;  %v8192_v35 = vld [vmem:[#allocation8 + $0x68] sm:$0xff] }
 0xe56   : > { %v14303_v13 = vadd.f32 %v14265_v22, %v7924_v50  ;;  %v8190_v50 = vld [vmem:[#allocation8 + $0x58] sm:$0xff] }
 0xe57   : > { %7971 = vadd.xlane.f32.xlu0 %v14300_v45  ;;  %v10426_v16 = vpop.f32.mrb[100].mxu0 }
 0xe58   : > { %v7927_v41 = vadd.f32 %v11783_v52, %v10426_v16  ;;  %7969 = vadd.xlane.f32.xlu1 %v14303_v13  ;;  %v7879_v48 = vpop.f32.mrb[101].mxu0  ;;  %v10856_v16 = vpack.c.bf16 %v8192_v35, %v8188_v20  ;;  %v8194_v52 = vld [vmem:[#allocation8 + $0x78] sm:$0xff]  ;;  %v8213_v20 = vld [vmem:[#allocation8 + $0x110] sm:$0xff] }
 0xe59   : > { %v7926_v58 = vadd.f32 %v11784_v18, %v7879_v48  ;;  %v8191_v48 = vld [vmem:[#allocation8 + $0x60] sm:$0xff]  ;;  %v10888_v18 = vpack.c.bf16 %v8194_v52, %v8190_v50  ;;  %v8217_v35 = vld [vmem:[#allocation8 + $0x130] sm:$0xff]  ;;  %v8220_v50 = vld [vmem:[#allocation8 + $0x148] sm:$0xff] }
 0xe5a   : > { %v14310_v63 = vadd.f32 %v14265_v22, %v7927_v41  ;;  %v8187_v41 = vld [vmem:[#allocation8 + $0x40] sm:$0xff]  ;;  %10857 = vmatprep.subr.bf16.mxu1 %v10856_v16  ;;  %v10902_v16 = vpack.c.bf16 %v8217_v35, %v8213_v20  ;;  %v8224_v52 = vld [vmem:[#allocation8 + $0x168] sm:$0xff] }
 0xe5b   : > { %v14313_v60 = vadd.f32 %v14265_v22, %v7926_v58  ;;  %v10858_v58 = vpack.c.bf16 %v8191_v48, %v8187_v41  ;;  %10889 = vmatprep.subr.bf16.mxu0 %v10888_v18  ;;  %v8222_v41 = vld [vmem:[#allocation8 + $0x158] sm:$0xff]  ;;  %v10872_v18 = vpack.c.bf16 %v8224_v52, %v8220_v50 }
 0xe5c   : > { %7975 = vadd.xlane.f32.xlu0 %v14310_v63  ;;  %v8226_v48 = vld [vmem:[#allocation8 + $0x178] sm:$0xff] }
 0xe5d   : > { %7973 = vadd.xlane.f32.xlu1 %v14313_v60  ;;  %10859 = vmatpush1.bf16.msra.mxu1 %v10858_v58  ;;  %v10904_v58 = vpack.c.bf16 %v8226_v48, %v8222_v41 }
 0xe5e   : > { %v10429_v4 = vpop.f32.mrb[102].mxu0 }
 0xe5f   : > { %v7929_v40 = vadd.f32 %v11785_v62, %v10429_v4  ;;  %v7889_v47 = vpop.f32.mrb[103].mxu0  ;;  %v8189_v4 = vld [vmem:[#allocation8 + $0x50] sm:$0xff] }
 0xe60   : > { %v7928_v0 = vadd.f32 %v11786_v11, %v7889_v47  ;;  %v8193_v62 = vld [vmem:[#allocation8 + $0x70] sm:$0xff]  ;;  %v8196_v47 = vld [vmem:[#allocation8 + $0x88] sm:$0xff] }
 0xe61   : > { %v14320_v15 = vadd.f32 %v14265_v22, %v7929_v40  ;;  %v10890_v40 = vpack.c.bf16 %v8193_v62, %v8189_v4  ;;  %v8200_v11 = vld [vmem:[#allocation8 + $0xa8] sm:$0xff]  ;;  %v8219_v4 = vld [vmem:[#allocation8 + $0x140] sm:$0xff] }
 0xe62   : > { %v14323_v33 = vadd.f32 %v14265_v22, %v7928_v0  ;;  %v8198_v0 = vld [vmem:[#allocation8 + $0x98] sm:$0xff]  ;;  %v8223_v62 = vld [vmem:[#allocation8 + $0x160] sm:$0xff] }
 0xe63   : > { %7979 = vadd.xlane.f32.xlu0 %v14320_v15  ;;  %v10432_v44 = vpop.f32.mrb[104].mxu0  ;;  %10891 = vmatpush1.bf16.msra.mxu0 %v10890_v40  ;;  %v8221_v40 = vld [vmem:[#allocation8 + $0x150] sm:$0xff] }
 0xe64   : > { %v7931_v21 = vadd.f32 %v11787_v28, %v10432_v44  ;;  %7977 = vadd.xlane.f32.xlu1 %v14323_v33  ;;  %v7899_v54 = vpop.f32.mrb[105].mxu0  ;;  %v10860_v44 = vpack.c.bf16 %v8200_v11, %v8196_v47  ;;  %v8202_v28 = vld [vmem:[#allocation8 + $0xb8] sm:$0xff]  ;;  %v10874_v47 = vpack.c.bf16 %v8223_v62, %v8219_v4  ;;  %v8225_v11 = vld [vmem:[#allocation8 + $0x170] sm:$0xff] }
 0xe65   : > { %v7930_v46 = vadd.f32 %v11788_v37, %v7899_v54  ;;  %v8195_v54 = vld [vmem:[#allocation8 + $0x80] sm:$0xff] }
 0xe66   : > { %v14330_v14 = vadd.f32 %v14265_v22, %v7931_v21  ;;  %v10892_v21 = vpack.c.bf16 %v8202_v28, %v8198_v0  ;;  %v8199_v37 = vld [vmem:[#allocation8 + $0xa0] sm:$0xff]  ;;  %10861 = vmatprep.subr.bf16.mxu1 %v10860_v44  ;;  %v8228_v0 = vld [vmem:[#allocation8 + $0x188] sm:$0xff]  ;;  %v10906_v28 = vpack.c.bf16 %v8225_v11, %v8221_v40 }
 0xe67   : > { %v14333_v32 = vadd.f32 %v14265_v22, %v7930_v46  ;;  %v8197_v46 = vld [vmem:[#allocation8 + $0x90] sm:$0xff]  ;;  %v10862_v12 = vpack.c.bf16 %v8199_v37, %v8195_v54  ;;  %v8232_v44 = vld [vmem:[#allocation8 + $0x1a8] sm:$0xff]  ;;  %v8230_v54 = vld [vmem:[#allocation8 + $0x198] sm:$0xff] }
 0xe68   : > { %7983 = vadd.xlane.f32.xlu0 %v14330_v14  ;;  %10893 = vmatprep.subr.bf16.mxu0 %v10892_v21  ;;  %v10894_v59 = vpack.c.bf16 %v8201_v1, %v8197_v46  ;;  %v10876_v21 = vpack.c.bf16 %v8232_v44, %v8228_v0  ;;  %v8234_v37 = vld [vmem:[#allocation8 + $0x1b8] sm:$0xff]  ;;  %v8227_v46 = vld [vmem:[#allocation8 + $0x180] sm:$0xff] }
 0xe69   : > { %7981 = vadd.xlane.f32.xlu1 %v14333_v32  ;;  %10863 = vmatpush1.bf16.msra.mxu1 %v10862_v12  ;;  %v10908_v12 = vpack.c.bf16 %v8234_v37, %v8230_v54  ;;  %v8231_v1 = vld [vmem:[#allocation8 + $0x1a0] sm:$0xff] }
 0xe6a   : > { %10895 = vmatpush1.bf16.msra.mxu0 %v10894_v59  ;;  %10865 = vmatprep.subr.bf16.mxu1 %v10864_v25  ;;  %v8229_v59 = vld [vmem:[#allocation8 + $0x190] sm:$0xff]  ;;  %v10878_v24 = vpack.c.bf16 %v8231_v1, %v8227_v46  ;;  %v8240_v25 = vld [vmem:[#allocation8 + $0x1e8] sm:$0xff] }
 0xe6b   : > { %10897 = vmatprep.subr.bf16.mxu0 %v10896_v30  ;;  %v10910_v55 = vpack.c.bf16 %v8233_v34, %v8229_v59  ;;  %v10880_v26 = vpack.c.bf16 %v8240_v25, %v8236_v36  ;;  %v8242_v30 = vld [vmem:[#allocation8 + $0x1f8] sm:$0xff] }
 0xe6d   : > { %10867 = vmatpush1.bf16.msra.mxu1 %v10866_v49  ;;  %v8235_v49 = vld [vmem:[#allocation8 + $0x1c0] sm:$0xff] }
 0xe96   : > { %v10435_v10 = vpop.f32.mrb[106].mxu0 }
 0xe97   : > { %v7933_v53 = vadd.f32 %v11789_v23, %v10435_v10  ;;  %v7909_v29 = vpop.f32.mrb[107].mxu0  ;;  %v8205_v10 = vld [vmem:[#allocation8 + $0xd0] sm:$0xff] }
 0xe98   : > { %v7932_v51 = vadd.f32 %v11790_v17, %v7909_v29  ;;  %v8209_v23 = vld [vmem:[#allocation8 + $0xf0] sm:$0xff]  ;;  %v8212_v29 = vld [vmem:[#allocation8 + $0x108] sm:$0xff] }
 0xe99   : > { %v14340_v6 = vadd.f32 %v14265_v22, %v7933_v53  ;;  %v10898_v53 = vpack.c.bf16 %v8209_v23, %v8205_v10  ;;  %v8216_v17 = vld [vmem:[#allocation8 + $0x128] sm:$0xff]  ;;  %v8239_v10 = vld [vmem:[#allocation8 + $0x1e0] sm:$0xff]  ;;  %v10912_v23 = vpack.c.bf16 %v8242_v30, %v8238_v61 }
 0xe9a   : > { %v14343_v39 = vadd.f32 %v14265_v22, %v7932_v51  ;;  %v8214_v51 = vld [vmem:[#allocation8 + $0x118] sm:$0xff] }
 0xe9b   : > { %7987 = vadd.xlane.f32.xlu0 %v14340_v6  ;;  %10899 = vmatpush1.bf16.msra.mxu0 %v10898_v53  ;;  %v8237_v53 = vld [vmem:[#allocation8 + $0x1d0] sm:$0xff] }
 0xe9c   : > { %v7960_v19 = vpop.xlane.xlu1 %7959  ;;  %7985 = vadd.xlane.f32.xlu1 %v14343_v39 }
 0xe9d   : > { %v7990_v5 = vmul.f32 0.0078125, %v7960_v19  ;;  %v7958_v38 = vpop.xlane.xlu0 %7957  ;;  %v10868_v19 = vpack.c.bf16 %v8216_v17, %v8212_v29  ;;  %v8241_v29 = vld [vmem:[#allocation8 + $0x1f0] sm:$0xff]  ;;  %v10882_v17 = vpack.c.bf16 %v8239_v10, %v8235_v49 }
 0xe9e   : > { %v7989_v3 = vmul.f32 0.0078125, %v7958_v38  ;;  %v8211_v38 = vld [vmem:[#allocation8 + $0x100] sm:$0xff] }
 0xe9f   : > { %v14348_v42 = vsub.f32 %v14270_v43, %v7990_v5  ;;  %v8218_v5 = vld [vmem:[#allocation8 + $0x138] sm:$0xff]  ;;  %10869 = vmatprep.subr.bf16.mxu1 %v10868_v19 }
 0xea0   : > { %v14351_v27 = vsub.f32 %v14273_v57, %v7989_v3  ;;  %v8215_v3 = vld [vmem:[#allocation8 + $0x120] sm:$0xff] }
 0xea1   : > { %v8022_v8 = vmul.f32 %v14348_v42, %v14348_v42 }
 0xea2   : > { %v8021_v22 = vmul.f32 %v14351_v27, %v14351_v27 }
 0xea3   : > { %8039 = vadd.xlane.f32.xlu0 %v8022_v8  ;;  %v10900_v8 = vpack.c.bf16 %v8218_v5, %v8214_v51  ;;  %v10914_v51 = vpack.c.bf16 %v8241_v29, %v8237_v53 }
 0xea4   : > { %8037 = vadd.xlane.f32.xlu1 %v8021_v22  ;;  %v10870_v22 = vpack.c.bf16 %v8215_v3, %v8211_v38 }
 0xea5   : > { %10901 = vmatprep.subr.bf16.mxu0 %v10900_v8 }
 0xea6   : > { %10871 = vmatpush1.bf16.msra.mxu1 %v10870_v22  ;;  %10903 = vmatpush1.bf16.msra.mxu0 %v10902_v16 }
 0xea7   : > { %10873 = vmatprep.subr.bf16.mxu1 %v10872_v18  ;;  %10905 = vmatprep.subr.bf16.mxu0 %v10904_v58 }
 0xeaa   : > { %10875 = vmatpush1.bf16.msra.mxu1 %v10874_v47  ;;  %10907 = vmatpush1.bf16.msra.mxu0 %v10906_v28 }
 0xeab   : > { %10877 = vmatprep.subr.bf16.mxu1 %v10876_v21  ;;  %10909 = vmatprep.subr.bf16.mxu0 %v10908_v12 }
 0xeae   : > { %10879 = vmatpush1.bf16.msra.mxu1 %v10878_v24  ;;  %10911 = vmatpush1.bf16.msra.mxu0 %v10910_v55 }
 0xeaf   : > { %10881 = vmatprep.subr.bf16.mxu1 %v10880_v26  ;;  %10913 = vmatprep.subr.bf16.mxu0 %v10912_v23 }
 0xeb2   : > { %10883 = vmatpush1.bf16.msra.mxu1 %v10882_v17  ;;  %10915 = vmatpush1.bf16.msra.mxu0 %v10914_v51 }
 0xed5   : > { %v7962_v19 = vpop.xlane.xlu0 %7961 }
 0xed6   : > { %v7991_v5 = vmul.f32 0.0078125, %v7962_v19 }
 0xed8   : > { %v14358_v38 = vsub.f32 %v14280_v56, %v7991_v5 }
 0xed9   : > { %v7964_v3 = vpop.xlane.xlu0 %7963 }
 0xeda   : > { %v7992_v8 = vmul.f32 0.0078125, %v7964_v3  ;;  %v8023_v22 = vmul.f32 %v14358_v38, %v14358_v38 }
 0xedc   : > { %v14363_v20 = vsub.f32 %v14284_v31, %v7992_v8  ;;  %8041 = vadd.xlane.f32.xlu1 %v8023_v22 }
 0xedd   : > { %v7968_v35 = vpop.xlane.xlu0 %7967 }
 0xede   : > { %v7994_v50 = vmul.f32 0.0078125, %v7968_v35  ;;  %v7966_v16 = vpop.xlane.xlu1 %7965  ;;  %v8024_v52 = vmul.f32 %v14363_v20, %v14363_v20 }
 0xedf   : > { %v7993_v41 = vmul.f32 0.0078125, %v7966_v16 }
 0xee0   : > { %v14368_v48 = vsub.f32 %v14290_v2, %v7994_v50  ;;  %8043 = vadd.xlane.f32.xlu0 %v8024_v52 }
 0xee1   : > { %v14371_v18 = vsub.f32 %v14293_v9, %v7993_v41 }
 0xee2   : > { %v8026_v58 = vmul.f32 %v14368_v48, %v14368_v48 }
 0xee3   : > { %v8025_v4 = vmul.f32 %v14371_v18, %v14371_v18 }
 0xee4   : > { %v7972_v62 = vpop.xlane.xlu0 %7971  ;;  %8047 = vadd.xlane.f32.xlu0 %v8026_v58 }
 0xee5   : > { %v7996_v40 = vmul.f32 0.0078125, %v7972_v62  ;;  %v7970_v47 = vpop.xlane.xlu1 %7969  ;;  %8045 = vadd.xlane.f32.xlu1 %v8025_v4 }
 0xee6   : > { %v7995_v11 = vmul.f32 0.0078125, %v7970_v47 }
 0xee7   : > { %v14378_v0 = vsub.f32 %v14300_v45, %v7996_v40 }
 0xee8   : > { %v14381_v44 = vsub.f32 %v14303_v13, %v7995_v11 }
 0xee9   : > { %v7976_v28 = vpop.xlane.xlu0 %7975  ;;  %v8028_v21 = vmul.f32 %v14378_v0, %v14378_v0 }
 0xeea   : > { %v7998_v54 = vmul.f32 0.0078125, %v7976_v28  ;;  %v7974_v37 = vpop.xlane.xlu1 %7973  ;;  %v8027_v46 = vmul.f32 %v14381_v44, %v14381_v44 }
 0xeeb   : > { %v7997_v12 = vmul.f32 0.0078125, %v7974_v37  ;;  %8051 = vadd.xlane.f32.xlu0 %v8028_v21  ;;  %v14430_v37 = vld [vmem:[%s14772_s6] ss:$0 sm:$0xff] }
 0xeec   : > { %v14388_v1 = vsub.f32 %v14310_v63, %v7998_v54  ;;  %8049 = vadd.xlane.f32.xlu1 %v8027_v46 }
 0xeed   : > { %v14391_v59 = vsub.f32 %v14313_v60, %v7997_v12 }
 0xeee   : > { %v8030_v34 = vmul.f32 %v14388_v1, %v14388_v1 }
 0xeef   : > { %v8029_v24 = vmul.f32 %v14391_v59, %v14391_v59 }
 0xef0   : > { %v7980_v36 = vpop.xlane.xlu0 %7979  ;;  %8055 = vadd.xlane.f32.xlu0 %v8030_v34  ;;  %v14437_v34 = vld [vmem:[%s14773_s7] ss:$0 sm:$0xff] }
 0xef1   : > { %v8000_v25 = vmul.f32 0.0078125, %v7980_v36  ;;  %v7978_v61 = vpop.xlane.xlu1 %7977  ;;  %8053 = vadd.xlane.f32.xlu1 %v8029_v24 }
 0xef2   : > { %v7999_v55 = vmul.f32 0.0078125, %v7978_v61  ;;  %v8668_v61 = vld [vmem:[#allocation10 + $0x88] sm:$0xff] }
 0xef3   : > { %v14398_v26 = vsub.f32 %v14320_v15, %v8000_v25 }
 0xef4   : > { %v14401_v30 = vsub.f32 %v14323_v33, %v7999_v55  ;;  %v8699_v55 = vld [vmem:[#allocation10 + $0x180] sm:$0xff] }
 0xef5   : > { %v7984_v49 = vpop.xlane.xlu0 %7983  ;;  %v8032_v10 = vmul.f32 %v14398_v26, %v14398_v26 }
 0xef6   : > { %v8002_v23 = vmul.f32 0.0078125, %v7984_v49  ;;  %v7982_v53 = vpop.xlane.xlu1 %7981  ;;  %v8031_v29 = vmul.f32 %v14401_v30, %v14401_v30 }
 0xef7   : > { %v8001_v17 = vmul.f32 0.0078125, %v7982_v53  ;;  %8059 = vadd.xlane.f32.xlu0 %v8032_v10  ;;  %v8700_v10 = vld [vmem:[#allocation10 + $0x188] sm:$0xff] }
 0xef8   : > { %v14408_v51 = vsub.f32 %v14330_v14, %v8002_v23  ;;  %8057 = vadd.xlane.f32.xlu1 %v8031_v29  ;;  %v8651_v23 = vld [vmem:[#allocation10] sm:$0xff]  ;;  %v8652_v53 = vld [vmem:[#allocation10 + $0x8] sm:$0xff]  ;;  %v14447_v29 = vpack.c.bf16 %v8700_v10, %v8699_v55  ;;  %v8673_v10 = vld [vmem:[#allocation10 + $0xb0] sm:$0xff] }
 0xef9   : > { %v14411_v19 = vsub.f32 %v14333_v32, %v8001_v17  ;;  %v10918_v17 = vpack.c.bf16 %v8652_v53, %v8651_v23  ;;  %v8688_v55 = vld [vmem:[#allocation10 + $0x128] sm:$0xff]  ;;  %v8674_v23 = vld [vmem:[#allocation10 + $0xb8] sm:$0xff]  ;;  %v8705_v53 = vld [vmem:[#allocation10 + $0x1b0] sm:$0xff] }
 0xefa   : > { %v8034_v5 = vmul.f32 %v14408_v51, %v14408_v51  ;;  %10949 = vmatprep.subr.bf16.mxu0 %v14447_v29 }
 0xefb   : > { %v8033_v3 = vmul.f32 %v14411_v19, %v14411_v19 }
 0xefc   : > { %8063 = vadd.xlane.f32.xlu0 %v8034_v5  ;;  %v8683_v5 = vld [vmem:[#allocation10 + $0x100] sm:$0xff] }
 0xefd   : > { %8061 = vadd.xlane.f32.xlu1 %v8033_v3  ;;  %v8684_v3 = vld [vmem:[#allocation10 + $0x108] sm:$0xff] }
 0xf28   : > { %v7988_v8 = vpop.xlane.xlu0 %7987 }
 0xf29   : > { %v8004_v22 = vmul.f32 0.0078125, %v7988_v8  ;;  %v7986_v35 = vpop.xlane.xlu1 %7985  ;;  %v8669_v8 = vld [vmem:[#allocation10 + $0x90] sm:$0xff] }
 0xf2a   : > { %v8003_v50 = vmul.f32 0.0078125, %v7986_v35  ;;  %v8670_v35 = vld [vmem:[#allocation10 + $0x98] sm:$0xff] }
 0xf2b   : > { %v14418_v16 = vsub.f32 %v14340_v6, %v8004_v22  ;;  %v14449_v22 = vpack.c.bf16 %v8684_v3, %v8683_v5  ;;  %v10928_v5 = vpack.c.bf16 %v8674_v23, %v8673_v10  ;;  %v8706_v3 = vld [vmem:[#allocation10 + $0x1b8] sm:$0xff]  ;;  %v8709_v10 = vld [vmem:[#allocation10 + $0x1d0] sm:$0xff] }
 0xf2c   : > { %v14421_v52 = vsub.f32 %v14343_v39, %v8003_v50  ;;  %v8701_v50 = vld [vmem:[#allocation10 + $0x190] sm:$0xff]  ;;  %v8710_v23 = vld [vmem:[#allocation10 + $0x1d8] sm:$0xff] }
 0xf2d   : > { %v8036_v41 = vmul.f32 %v14418_v16, %v14418_v16 }
 0xf2e   : > { %v8035_v58 = vmul.f32 %v14421_v52, %v14421_v52 }
 0xf2f   : > { %8067 = vadd.xlane.f32.xlu0 %v8036_v41  ;;  %v8702_v41 = vld [vmem:[#allocation10 + $0x198] sm:$0xff] }
 0xf30   : > { %v8040_v4 = vpop.xlane.xlu0 %8039  ;;  %8065 = vadd.xlane.f32.xlu1 %v8035_v58  ;;  %v10920_v58 = vpack.c.bf16 %v8670_v35, %v8669_v8  ;;  %v8657_v8 = vld [vmem:[#allocation10 + $0x30] sm:$0xff]  ;;  %v8658_v35 = vld [vmem:[#allocation10 + $0x38] sm:$0xff] }
 0xf31   : > { %v8070_v62 = vmul.f32 0.0078125, %v8040_v4  ;;  %v8038_v40 = vpop.xlane.xlu1 %8037  ;;  %v14452_v4 = vpack.c.bf16 %v8702_v41, %v8701_v50  ;;  %v14464_v50 = vpack.c.bf16 %v8706_v3, %v8705_v53  ;;  %v8689_v41 = vld [vmem:[#allocation10 + $0x130] sm:$0xff] }
 0xf32   : > { %v8069_v47 = vmul.f32 0.0078125, %v8038_v40  ;;  %v8654_v40 = vld [vmem:[#allocation10 + $0x18] sm:$0xff]  ;;  %v8661_v3 = vld [vmem:[#allocation10 + $0x50] sm:$0xff] }
 0xf33   : > { %v8086_v11 = vadd.f32 1e-05, %v8070_v62  ;;  %v8653_v62 = vld [vmem:[#allocation10 + $0x10] sm:$0xff] }
 0xf34   : > { %v8085_v28 = vadd.f32 1e-05, %v8069_v47  ;;  %v8685_v47 = vld [vmem:[#allocation10 + $0x110] sm:$0xff] }
 0xf35   : > { %11743 = vrsqrt.f32 %v8086_v11  ;;  %v10922_v11 = vpack.c.bf16 %v8654_v40, %v8653_v62  ;;  %v8675_v62 = vld [vmem:[#allocation10 + $0xc0] sm:$0xff]  ;;  %v8676_v40 = vld [vmem:[#allocation10 + $0xc8] sm:$0xff] }
 0xf36   : > { %11745 = vrsqrt.f32 %v8085_v28  ;;  %v8686_v28 = vld [vmem:[#allocation10 + $0x118] sm:$0xff] }
 0xf3f   : > { %v11744_v21 = vpop.eup %11743 }
 0xf40   : > { %v11746_v54 = vpop.eup %11745  ;;  %v8118_v12 = vmul.f32 %v11744_v21, %v14348_v42  ;;  %v8667_v42 = vld [vmem:[#allocation10 + $0x80] sm:$0xff] }
 0xf41   : > { %v8117_v46 = vmul.f32 %v11746_v54, %v14351_v27  ;;  %v10916_v49 = vpack.c.bf16 %v8668_v61, %v8667_v42  ;;  %v8671_v21 = vld [vmem:[#allocation10 + $0xa0] sm:$0xff]  ;;  %v8672_v54 = vld [vmem:[#allocation10 + $0xa8] sm:$0xff] }
 0xf42   : > { %v8141_v25 = vmul.f32 %v14430_v37, %v8118_v12  ;;  %v10924_v12 = vpack.c.bf16 %v8672_v54, %v8671_v21  ;;  %v8656_v42 = vld [vmem:[#allocation10 + $0x28] sm:$0xff]  ;;  %v8687_v61 = vld [vmem:[#allocation10 + $0x120] sm:$0xff]  ;;  %v10932_v54 = vpack.c.bf16 %v8676_v40, %v8675_v62  ;;  %v8694_v62 = vld [vmem:[#allocation10 + $0x158] sm:$0xff] }
 0xf43   : > { %v8140_v24 = vmul.f32 %v14430_v37, %v8117_v46  ;;  %10917 = vmatprep.subr.bf16.mxu1 %v10916_v49  ;;  %v14456_v46 = vpack.c.bf16 %v8686_v28, %v8685_v47  ;;  %v8707_v47 = vld [vmem:[#allocation10 + $0x1c0] sm:$0xff]  ;;  %v10930_v28 = vpack.c.bf16 %v8658_v35, %v8657_v8  ;;  %v8662_v8 = vld [vmem:[#allocation10 + $0x58] sm:$0xff]  ;;  %v8693_v35 = vld [vmem:[#allocation10 + $0x150] sm:$0xff] }
 0xf44   : > { %v8164_v27 = vadd.f32 %v14437_v34, %v8141_v25  ;;  %v8655_v25 = vld [vmem:[#allocation10 + $0x20] sm:$0xff] }
 0xf45   : > { %v8163_v36 = vadd.f32 %v14437_v34, %v8140_v24  ;;  %v8703_v24 = vld [vmem:[#allocation10 + $0x1a0] sm:$0xff]  ;;  %v10926_v49 = vpack.c.bf16 %v8656_v42, %v8655_v25  ;;  %v8692_v42 = vld [vmem:[#allocation10 + $0x148] sm:$0xff] }
 0xf46   : > { %v8679_v40 = vld [vmem:[#allocation10 + $0xe0] sm:$0xff] }
 0xf47   : > { %8330 = vmatmul.mubr.f32.vlgmr.msra.gmra.mrb[84].mxu1 %v8163_v36  ;;  %8491 = vmatmul.mubr.f32.vlgmr.msra.gmra.mrb[108].mxu0 %v8163_v36  ;;  %v8704_v36 = vld [vmem:[#allocation10 + $0x1a8] sm:$0xff] }
 0xf48   : > { %8335 = vmatprep.mubr.f32.mxu1 %v14923_v7  ;;  %8496 = vmatprep.mubr.f32.mxu0 %v14923_v7 }
 0xf49   : > { %10919 = vmatpush3.bf16.msra.mxu1 %v10918_v17  ;;  %10951 = vmatpush3.bf16.msra.mxu0 %v14449_v22  ;;  %v14461_v17 = vpack.c.bf16 %v8688_v55, %v8687_v61  ;;  %v8677_v61 = vld [vmem:[#allocation10 + $0xd0] sm:$0xff]  ;;  %v8678_v55 = vld [vmem:[#allocation10 + $0xd8] sm:$0xff] }
 0xf4a   : > { %10921 = vmatprep.subr.bf16.mxu1 %v10920_v58  ;;  %10953 = vmatprep.subr.bf16.mxu0 %v14452_v4  ;;  %v8690_v58 = vld [vmem:[#allocation10 + $0x138] sm:$0xff] }
 0xf4b   : > { %8336 = vmatmul.mubr.f32.gmra.mrb[86].mxu1 %v8164_v27  ;;  %8497 = vmatmul.mubr.f32.gmra.mrb[110].mxu0 %v8164_v27  ;;  %v14458_v27 = vpack.c.bf16 %v8704_v36, %v8703_v24  ;;  %v14467_v21 = vpack.c.bf16 %v8690_v58, %v8689_v41  ;;  %v8660_v24 = vld [vmem:[#allocation10 + $0x48] sm:$0xff]  ;;  %v8691_v36 = vld [vmem:[#allocation10 + $0x140] sm:$0xff]  ;;  %v14476_v58 = vpack.c.bf16 %v8710_v23, %v8709_v10 }
 0xf4c   : > { %8341 = vmatprep.mubr.f32.mxu1 %v14923_v7  ;;  %8502 = vmatprep.mubr.f32.mxu0 %v14923_v7  ;;  %v14473_v53 = vpack.c.bf16 %v8692_v42, %v8691_v36  ;;  %v14479_v36 = vpack.c.bf16 %v8694_v62, %v8693_v35 }
 0xf4d   : > { %10923 = vmatpush3.bf16.msra.mxu1 %v10922_v11  ;;  %10955 = vmatpush3.bf16.msra.mxu0 %v14456_v46  ;;  %v8708_v11 = vld [vmem:[#allocation10 + $0x1c8] sm:$0xff] }
 0xf4e   : > { %10925 = vmatprep.subr.bf16.mxu1 %v10924_v12  ;;  %10957 = vmatprep.subr.bf16.mxu0 %v14458_v27  ;;  %v8659_v12 = vld [vmem:[#allocation10 + $0x40] sm:$0xff]  ;;  %v14470_v25 = vpack.c.bf16 %v8708_v11, %v8707_v47  ;;  %v8680_v47 = vld [vmem:[#allocation10 + $0xe8] sm:$0xff] }
 0xf4f   : > { %v10940_v42 = vpack.c.bf16 %v8680_v47, %v8679_v40 }
 0xf51   : > { %10927 = vmatpush3.bf16.msra.mxu1 %v10926_v49  ;;  %10959 = vmatpush3.bf16.msra.mxu0 %v14461_v17  ;;  %v10934_v49 = vpack.c.bf16 %v8660_v24, %v8659_v12  ;;  %v8712_v12 = vld [vmem:[#allocation10 + $0x1e8] sm:$0xff]  ;;  %v10938_v24 = vpack.c.bf16 %v8662_v8, %v8661_v3 }
 0xf52   : > { %10929 = vmatprep.subr.bf16.mxu1 %v10928_v5  ;;  %10961 = vmatprep.subr.bf16.mxu0 %v14464_v50  ;;  %v10936_v5 = vpack.c.bf16 %v8678_v55, %v8677_v61 }
 0xf55   : > { %10931 = vmatpush3.bf16.msra.mxu1 %v10930_v28  ;;  %10963 = vmatpush3.bf16.msra.mxu0 %v14467_v21  ;;  %v8711_v28 = vld [vmem:[#allocation10 + $0x1e0] sm:$0xff] }
 0xf56   : > { %10933 = vmatprep.subr.bf16.mxu1 %v10932_v54  ;;  %10965 = vmatprep.subr.bf16.mxu0 %v14470_v25  ;;  %v14482_v55 = vpack.c.bf16 %v8712_v12, %v8711_v28 }
 0xf59   : > { %10935 = vmatpush3.bf16.msra.mxu1 %v10934_v49  ;;  %10967 = vmatpush3.bf16.msra.mxu0 %v14473_v53 }
 0xf5a   : > { %10937 = vmatprep.subr.bf16.mxu1 %v10936_v5  ;;  %10969 = vmatprep.subr.bf16.mxu0 %v14476_v58 }
 0xf5d   : > { %10939 = vmatpush3.bf16.msra.mxu1 %v10938_v24  ;;  %10971 = vmatpush3.bf16.msra.mxu0 %v14479_v36 }
 0xf5e   : > { %10941 = vmatprep.subr.bf16.mxu1 %v10940_v42  ;;  %10973 = vmatprep.subr.bf16.mxu0 %v14482_v55 }
 0xf69   : > { %v8042_v41 = vpop.xlane.xlu1 %8041 }
 0xf6a   : > { %v8071_v11 = vmul.f32 0.0078125, %v8042_v41 }
 0xf6c   : > { %v8087_v54 = vadd.f32 1e-05, %v8071_v11 }
 0xf6d   : > { %v8044_v61 = vpop.xlane.xlu0 %8043 }
 0xf6e   : > { %11747 = vrsqrt.f32 %v8087_v54  ;;  %v8072_v10 = vmul.f32 0.0078125, %v8044_v61 }
 0xf70   : > { %v8088_v23 = vadd.f32 1e-05, %v8072_v10 }
 0xf71   : > { %v8048_v49 = vpop.xlane.xlu0 %8047 }
 0xf72   : > { %11749 = vrsqrt.f32 %v8088_v23  ;;  %v8074_v5 = vmul.f32 0.0078125, %v8048_v49  ;;  %v8046_v3 = vpop.xlane.xlu1 %8045 }
 0xf73   : > { %v8073_v8 = vmul.f32 0.0078125, %v8046_v3 }
 0xf74   : > { %v8090_v35 = vadd.f32 1e-05, %v8074_v5 }
 0xf75   : > { %v8089_v41 = vadd.f32 1e-05, %v8073_v8 }
 0xf76   : > { %11751 = vrsqrt.f32 %v8090_v35 }
 0xf77   : > { %11753 = vrsqrt.f32 %v8089_v41 }
 0xf78   : > { %v11748_v62 = vpop.eup %11747  ;;  %v8052_v40 = vpop.xlane.xlu0 %8051 }
 0xf79   : > { %v8076_v47 = vmul.f32 0.0078125, %v8052_v40  ;;  %v8050_v11 = vpop.xlane.xlu1 %8049  ;;  %v8119_v28 = vmul.f32 %v11748_v62, %v14358_v38 }
 0xf7a   : > { %v8075_v12 = vmul.f32 0.0078125, %v8050_v11 }
 0xf7b   : > { %v8092_v24 = vadd.f32 1e-05, %v8076_v47  ;;  %v8142_v54 = vmul.f32 %v14430_v37, %v8119_v28 }
 0xf7c   : > { %v11750_v42 = vpop.eup %11749  ;;  %v8091_v61 = vadd.f32 1e-05, %v8075_v12 }
 0xf7d   : > { %11755 = vrsqrt.f32 %v8092_v24  ;;  %v8056_v10 = vpop.xlane.xlu0 %8055  ;;  %v8165_v23 = vadd.f32 %v14437_v34, %v8142_v54  ;;  %v8120_v49 = vmul.f32 %v11750_v42, %v14363_v20 }
 0xf7e   : > { %11757 = vrsqrt.f32 %v8091_v61  ;;  %v8078_v5 = vmul.f32 0.0078125, %v8056_v10  ;;  %v8054_v3 = vpop.xlane.xlu1 %8053 }
 0xf7f   : > { %v8077_v8 = vmul.f32 0.0078125, %v8054_v3  ;;  %8342 = vmatmul.mubr.f32.gmra.mrb[88].mxu1 %v8165_v23  ;;  %8503 = vmatmul.mubr.f32.gmra.mrb[112].mxu0 %v8165_v23  ;;  %v8143_v38 = vmul.f32 %v14430_v37, %v8120_v49 }
 0xf80   : > { %v11752_v35 = vpop.eup %11751  ;;  %8347 = vmatprep.mubr.f32.mxu1 %v14923_v7  ;;  %8508 = vmatprep.mubr.f32.mxu0 %v14923_v7  ;;  %v8094_v62 = vadd.f32 1e-05, %v8078_v5 }
 0xf81   : > { %v11754_v41 = vpop.eup %11753  ;;  %v8093_v40 = vadd.f32 1e-05, %v8077_v8  ;;  %v8166_v47 = vadd.f32 %v14437_v34, %v8143_v38  ;;  %v8122_v11 = vmul.f32 %v11752_v35, %v14368_v48 }
 0xf82   : > { %v8121_v20 = vmul.f32 %v11754_v41, %v14371_v18 }
 0xf83   : > { %11759 = vrsqrt.f32 %v8093_v40  ;;  %8348 = vmatmul.mubr.f32.gmra.mrb[90].mxu1 %v8166_v47  ;;  %8509 = vmatmul.mubr.f32.gmra.mrb[114].mxu0 %v8166_v47  ;;  %v8145_v18 = vmul.f32 %v14430_v37, %v8122_v11 }
 0xf84   : > { %v8060_v28 = vpop.xlane.xlu0 %8059  ;;  %8353 = vmatprep.mubr.f32.mxu1 %v14923_v7  ;;  %8514 = vmatprep.mubr.f32.mxu0 %v14923_v7  ;;  %v8144_v12 = vmul.f32 %v14430_v37, %v8121_v20  ;;  %11761 = vrsqrt.f32 %v8094_v62 }
 0xf85   : > { %v8080_v24 = vmul.f32 0.0078125, %v8060_v28  ;;  %v8058_v54 = vpop.xlane.xlu1 %8057  ;;  %v8168_v38 = vadd.f32 %v14437_v34, %v8145_v18 }
 0xf86   : > { %v8079_v42 = vmul.f32 0.0078125, %v8058_v54  ;;  %v8167_v61 = vadd.f32 %v14437_v34, %v8144_v12 }
 0xf87   : > { %v11756_v10 = vpop.eup %11755  ;;  %v8096_v23 = vadd.f32 1e-05, %v8080_v24 }
 0xf88   : > { %v11758_v48 = vpop.eup %11757  ;;  %v8095_v49 = vadd.f32 1e-05, %v8079_v42  ;;  %8354 = vmatmul.mubr.f32.gmra.mrb[92].mxu1 %v8167_v61  ;;  %8515 = vmatmul.mubr.f32.gmra.mrb[116].mxu0 %v8167_v61  ;;  %v8124_v35 = vmul.f32 %v11756_v10, %v14378_v0 }
 0xf89   : > { %8359 = vmatprep.mubr.f32.mxu1 %v14923_v7  ;;  %8520 = vmatprep.mubr.f32.mxu0 %v14923_v7  ;;  %v8123_v5 = vmul.f32 %v11758_v48, %v14381_v44  ;;  %v8064_v3 = vpop.xlane.xlu0 %8063 }
 0xf8a   : > { %11763 = vrsqrt.f32 %v8095_v49  ;;  %v8062_v8 = vpop.xlane.xlu1 %8061  ;;  %v8082_v47 = vmul.f32 0.0078125, %v8064_v3  ;;  %v8147_v11 = vmul.f32 %v14430_v37, %v8124_v35  ;;  %v8664_v49 = vld [vmem:[#allocation10 + $0x68] sm:$0xff] }
 0xf8b   : > { %v8081_v41 = vmul.f32 0.0078125, %v8062_v8  ;;  %v8146_v62 = vmul.f32 %v14430_v37, %v8123_v5  ;;  %11765 = vrsqrt.f32 %v8096_v23  ;;  %v8663_v23 = vld [vmem:[#allocation10 + $0x60] sm:$0xff]  ;;  %v8696_v8 = vld [vmem:[#allocation10 + $0x168] sm:$0xff] }
 0xf8c   : > { %8360 = vmatmul.mubr.f32.gmra.mrb[94].mxu1 %v8168_v38  ;;  %8521 = vmatmul.mubr.f32.gmra.mrb[118].mxu0 %v8168_v38  ;;  %v8098_v12 = vadd.f32 1e-05, %v8082_v47  ;;  %v8170_v24 = vadd.f32 %v14437_v34, %v8147_v11  ;;  %v10942_v3 = vpack.c.bf16 %v8664_v49, %v8663_v23  ;;  %v8713_v47 = vld [vmem:[#allocation10 + $0x1f0] sm:$0xff] }
 0xf8d   : > { %v11760_v40 = vpop.eup %11759  ;;  %v8097_v20 = vadd.f32 1e-05, %v8081_v41  ;;  %8365 = vmatprep.mubr.f32.mxu1 %v14923_v7  ;;  %8526 = vmatprep.mubr.f32.mxu0 %v14923_v7  ;;  %v8169_v44 = vadd.f32 %v14437_v34, %v8146_v62  ;;  %v8681_v62 = vld [vmem:[#allocation10 + $0xf0] sm:$0xff] }
 0xf8e   : > { %v8125_v28 = vmul.f32 %v11760_v40, %v14391_v59  ;;  %v11762_v0 = vpop.eup %11761  ;;  %10943 = vmatpush3.bf16.msra.mxu1 %v10942_v3  ;;  %v8682_v40 = vld [vmem:[#allocation10 + $0xf8] sm:$0xff]  ;;  %v8665_v11 = vld [vmem:[#allocation10 + $0x70] sm:$0xff] }
 0xf8f   : > { %11767 = vrsqrt.f32 %v8097_v20  ;;  %v8126_v42 = vmul.f32 %v11762_v0, %v14388_v1  ;;  %v8695_v1 = vld [vmem:[#allocation10 + $0x160] sm:$0xff]  ;;  %v10944_v20 = vpack.c.bf16 %v8682_v40, %v8681_v62 }
 0xf90   : > { %8366 = vmatmul.mubr.f32.gmra.mrb[96].mxu1 %v8169_v44  ;;  %8527 = vmatmul.mubr.f32.gmra.mrb[120].mxu0 %v8169_v44  ;;  %v8148_v54 = vmul.f32 %v14430_v37, %v8125_v28  ;;  %11769 = vrsqrt.f32 %v8098_v12  ;;  %v14527_v41 = vpack.c.bf16 %v8696_v8, %v8695_v1  ;;  %v8714_v44 = vld [vmem:[#allocation10 + $0x1f8] sm:$0xff] }
 0xf91   : > { %8371 = vmatprep.mubr.f32.mxu1 %v14923_v7  ;;  %8532 = vmatprep.mubr.f32.mxu0 %v14923_v7  ;;  %v8149_v10 = vmul.f32 %v14430_v37, %v8126_v42  ;;  %v8666_v28 = vld [vmem:[#allocation10 + $0x78] sm:$0xff]  ;;  %v14532_v0 = vpack.c.bf16 %v8714_v44, %v8713_v47 }
 0xf92   : > { %v8171_v18 = vadd.f32 %v14437_v34, %v8148_v54  ;;  %v10946_v12 = vpack.c.bf16 %v8666_v28, %v8665_v11  ;;  %v8698_v54 = vld [vmem:[#allocation10 + $0x178] sm:$0xff]  ;;  %10975 = vmatpush3.bf16.msra.mxu0 %v14527_v41  ;;  %10945 = vmatprep.subr.bf16.mxu1 %v10944_v20  ;;  %v14956_v28 = vld [vmem:[#allocation32_spill] sm:$0xff] }
 0xf93   : > { %v8172_v38 = vadd.f32 %v14437_v34, %v8149_v10  ;;  %10977 = vmatprep.subr.bf16.mxu0 %v14532_v0 }
 0xf94   : > { %v11764_v61 = vpop.eup %11763  ;;  %8372 = vmatmul.mubr.f32.gmra.mrb[98].mxu1 %v8170_v24  ;;  %8533 = vmatmul.mubr.f32.gmra.mrb[122].mxu0 %v8170_v24  ;;  %v8697_v24 = vld [vmem:[#allocation10 + $0x170] sm:$0xff] }
 0xf95   : > { %8377 = vmatprep.mubr.f32.mxu1 %v14923_v7  ;;  %8538 = vmatprep.mubr.f32.mxu0 %v14923_v7  ;;  %v11766_v59 = vpop.eup %11765  ;;  %v8127_v48 = vmul.f32 %v11764_v61, %v14401_v30 }
 0xf96   : > { %v8128_v5 = vmul.f32 %v11766_v59, %v14398_v26  ;;  %v14537_v59 = vpack.c.bf16 %v8698_v54, %v8697_v24  ;;  %10947 = vmatpush3.bf16.msra.mxu1 %v10946_v12  ;;  %v8259_v12 = vsub.s32 3, %v14956_v28 }
 0xf97   : > { %v8150_v35 = vmul.f32 %v14430_v37, %v8127_v48  ;;  %10980 = vmatprep.subr.bf16.mxu1 %v14447_v29 }
 0xf98   : > { %8378 = vmatmul.mubr.f32.gmra.mrb[100].mxu1 %v8171_v18  ;;  %8539 = vmatmul.mubr.f32.gmra.mrb[124].mxu0 %v8171_v18  ;;  %v8151_v26 = vmul.f32 %v14430_v37, %v8128_v5 }
 0xf99   : > { %8383 = vmatprep.mubr.f32.mxu1 %v14923_v7  ;;  %8544 = vmatprep.mubr.f32.mxu0 %v14923_v7  ;;  %v11768_v30 = vpop.eup %11767  ;;  %v8173_v42 = vadd.f32 %v14437_v34, %v8150_v35 }
 0xf9a   : > { %v8129_v61 = vmul.f32 %v11768_v30, %v14411_v19  ;;  %v11770_v18 = vpop.eup %11769  ;;  %v8174_v10 = vadd.f32 %v14437_v34, %v8151_v26  ;;  %10979 = vmatpush3.bf16.msra.mxu0 %v14537_v59  ;;  %v8243_v26 = vld [vmem:[%s14957_s11] sm:$0xf]  ;;  %s11939_s11 = scalar_lea.vmem %s11938_s29, 4096 }
 0xf9b   : > { %v8130_v19 = vmul.f32 %v11770_v18, %v14408_v51  ;;  %p11941_p2 = scmp.lt.s32.totalorder %s11939_s11, %s11933_s27 }
 0xf9c   : > { %8384 = vmatmul.mubr.f32.gmra.mrb[102].mxu1 %v8172_v38  ;;  %8545 = vmatmul.mubr.f32.gmra.mrb[126].mxu0 %v8172_v38  ;;  %v8152_v48 = vmul.f32 %v14430_v37, %v8129_v61 }
 0xf9d   : > { %8389 = vmatprep.mubr.f32.mxu1 %v14923_v7  ;;  %8550 = vmatprep.mubr.f32.mxu0 %v14923_v7  ;;  %v8153_v49 = vmul.f32 %v14430_v37, %v8130_v19  ;;  %p11942_p1 = por %p11941_p2, %p11940_p12 }
 0xf9e   : > { %v8175_v23 = vadd.f32 %v14437_v34, %v8152_v48 }
 0xf9f   : > { %v8176_v51 = vadd.f32 %v14437_v34, %v8153_v49  ;;  %p11943_p13 = pnand %p11942_p1, %p11936_p7 }
 0xfa0   : > { %8390 = vmatmul.mubr.f32.gmra.mrb[104].mxu1 %v8173_v42  ;;  %8551 = vmatmul.mubr.f32.gmra.mrb[128].mxu0 %v8173_v42 }
 0xfa1   : > { %8395 = vmatprep.mubr.f32.mxu1 %v14923_v7  ;;  %8556 = vmatprep.mubr.f32.mxu0 %v14923_v7 }
 0xfa4   : > { %8396 = vmatmul.mubr.f32.gmra.mrb[106].mxu1 %v8174_v10  ;;  %8557 = vmatmul.mubr.f32.gmra.mrb[130].mxu0 %v8174_v10 }
 0xfa5   : > { %8401 = vmatprep.mubr.f32.mxu1 %v14923_v7  ;;  %8562 = vmatprep.mubr.f32.mxu0 %v14923_v7 }
 0xfa8   : > { %8402 = vmatmul.mubr.f32.gmra.mrb[108].mxu1 %v8175_v23  ;;  %8563 = vmatmul.mubr.f32.gmra.mrb[132].mxu0 %v8175_v23 }
 0xfa9   : > { %8407 = vmatprep.mubr.f32.mxu1 %v14923_v7  ;;  %8568 = vmatprep.mubr.f32.mxu0 %v14923_v7 }
 0xfac   : > { %8408 = vmatmul.mubr.f32.gmra.mrb[110].mxu1 %v8176_v51  ;;  %8569 = vmatmul.mubr.f32.gmra.mrb[134].mxu0 %v8176_v51 }
 0xfad   : > { %8413 = vmatprep.mubr.f32.mxu1 %v14923_v7  ;;  %8574 = vmatprep.mubr.f32.mxu0 %v14923_v7 }
 0xfbc   : > { %v8068_v29 = vpop.xlane.xlu0 %8067 }
 0xfbd   : > { %v8084_v1 = vmul.f32 0.0078125, %v8068_v29  ;;  %v8066_v5 = vpop.xlane.xlu1 %8065 }
 0xfbe   : > { %v8083_v3 = vmul.f32 0.0078125, %v8066_v5 }
 0xfbf   : > { %v8100_v8 = vadd.f32 1e-05, %v8084_v1 }
 0xfc0   : > { %v8099_v38 = vadd.f32 1e-05, %v8083_v3 }
 0xfc1   : > { %11771 = vrsqrt.f32 %v8100_v8 }
 0xfc2   : > { %11773 = vrsqrt.f32 %v8099_v38 }
 0xfcb   : > { %v11772_v35 = vpop.eup %11771 }
 0xfcc   : > { %v11774_v30 = vpop.eup %11773  ;;  %v8132_v40 = vmul.f32 %v11772_v35, %v14418_v16  ;;  %v8255_v16 = vsub.s32 2, %v14956_v28 }
 0xfcd   : > { %v8131_v62 = vmul.f32 %v11774_v30, %v14421_v52  ;;  %v8247_v52 = vsub.s32 0, %v14956_v28 }
 0xfce   : > { %v8155_v44 = vmul.f32 %v14430_v37, %v8132_v40  ;;  %v14573_v54 = vrot.slane %v8243_v26, %v8255_v16 }
 0xfcf   : > { %v8154_v47 = vmul.f32 %v14430_v37, %v8131_v62  ;;  %v8251_v37 = vsub.s32 1, %v14956_v28  ;;  %v14571_v24 = vrot.slane %v8243_v26, %v8247_v52 }
 0xfd0   : > { %v8178_v11 = vadd.f32 %v14437_v34, %v8155_v44 }
 0xfd1   : > { %v8177_v20 = vadd.f32 %v14437_v34, %v8154_v47  ;;  %v14577_v34 = vrot.slane %v8243_v26, %v8259_v12 }
 0xfd3   : > { %8414 = vmatmul.mubr.f32.gmra.mrb[112].mxu1 %v8177_v20  ;;  %8575 = vmatmul.mubr.f32.gmra.mrb[136].mxu0 %v8177_v20 }
 0xfd4   : > { %8419 = vmatprep.mubr.f32.mxu1 %v14923_v7  ;;  %8580 = vmatprep.mubr.f32.mxu0 %v14923_v7  ;;  %v14575_v7 = vrot.slane %v8243_v26, %v8251_v37 }
 0xfd7   : > { %8420 = vmatmul.mubr.f32.gmra.mrb[114].mxu1 %v8178_v11  ;;  %8581 = vmatmul.mubr.f32.gmra.mrb[138].mxu0 %v8178_v11 }
0x101a   : > { %v8331_v42 = vpop.f32.mrb[84].mxu1  ;;  %v8492_v61 = vpop.f32.mrb[108].mxu0 }
0x101b   : > { %v8332_v18 = vadd.f32 %v8331_v42, %v14571_v24  ;;  %v8493_v10 = vadd.f32 %v8492_v61, %v14573_v54  ;;  %v8333_v48 = vpop.f32.mrb[85].mxu1  ;;  %v8494_v19 = vpop.f32.mrb[109].mxu0 }
0x101c   : > { %v8334_v23 = vadd.f32 %v8333_v48, %v14575_v7  ;;  %v8495_v49 = vadd.f32 %v8494_v19, %v14577_v34 }
0x101d   : > { %v8587_v3 = vmax.f32 %v8332_v18, 0.0  ;;  %v8589_v8 = vmax.f32 %v8493_v10, 0.0 }
0x101e   : > { %v8588_v51 = vmax.f32 %v8334_v23, 0.0  ;;  %v8590_v29 = vmax.f32 %v8495_v49, 0.0  ;;  %v8337_v1 = vpop.f32.mrb[86].mxu1  ;;  %v8498_v5 = vpop.f32.mrb[110].mxu0 }
0x101f   : > { %v8338_v38 = vadd.f32 %v8337_v1, %v14571_v24  ;;  %v8499_v35 = vadd.f32 %v8498_v5, %v14573_v54  ;;  %v8339_v30 = vpop.f32.mrb[87].mxu1  ;;  %v8500_v62 = vpop.f32.mrb[111].mxu0 }
0x1020   : > { %v8340_v40 = vadd.f32 %v8339_v30, %v14575_v7  ;;  %v8501_v47 = vadd.f32 %v8500_v62, %v14577_v34  ;;  %8786 = vmatprep.mubr.f32.mxu1 %v8588_v51  ;;  %8931 = vmatprep.mubr.f32.mxu0 %v8590_v29 }
0x1021   : > { %8787 = vmatmul.mubr.f32.vlgmr.msra.gmra.mrb[116].mxu1 %v8587_v3  ;;  %8932 = vmatmul.mubr.f32.vlgmr.msra.gmra.mrb[140].mxu0 %v8589_v8  ;;  %v8591_v11 = vmax.f32 %v8338_v38, 0.0  ;;  %v8593_v28 = vmax.f32 %v8499_v35, 0.0 }
0x1022   : > { %v8592_v20 = vmax.f32 %v8340_v40, 0.0  ;;  %v8594_v44 = vmax.f32 %v8501_v47, 0.0  ;;  %10988 = vmatpush3.bf16.msra.mxu1 %v14449_v22 }
0x1023   : > { %10981 = vmatprep.subr.bf16.mxu1 %v14452_v4 }
0x1024   : > { %8791 = vmatprep.mubr.f32.mxu1 %v8592_v20  ;;  %8936 = vmatprep.mubr.f32.mxu0 %v8594_v44 }
0x1025   : > { %8792 = vmatmul.mubr.f32.gmra.mrb[118].mxu1 %v8591_v11  ;;  %8937 = vmatmul.mubr.f32.gmra.mrb[142].mxu0 %v8593_v28 }
0x1026   : > { %10989 = vmatpush3.bf16.msra.mxu1 %v14456_v46 }
0x1027   : > { %10982 = vmatprep.subr.bf16.mxu1 %v14458_v27 }
0x102a   : > { %10990 = vmatpush3.bf16.msra.mxu1 %v14461_v17 }
0x102b   : > { %10983 = vmatprep.subr.bf16.mxu1 %v14464_v50 }
0x102e   : > { %10991 = vmatpush3.bf16.msra.mxu1 %v14467_v21 }
0x102f   : > { %10984 = vmatprep.subr.bf16.mxu1 %v14470_v25 }
0x1032   : > { %10992 = vmatpush3.bf16.msra.mxu1 %v14473_v53 }
0x1033   : > { %10985 = vmatprep.subr.bf16.mxu1 %v14476_v58 }
0x1036   : > { %10993 = vmatpush3.bf16.msra.mxu1 %v14479_v36 }
0x1037   : > { %10986 = vmatprep.subr.bf16.mxu1 %v14482_v55 }
0x103a   : > { %10994 = vmatpush3.bf16.msra.mxu1 %v14527_v41 }
0x103b   : > { %10987 = vmatprep.subr.bf16.mxu1 %v14532_v0 }
0x103e   : > { %10995 = vmatpush3.bf16.msra.mxu1 %v14537_v59 }
0x1052   : > { %v8343_v22 = vpop.f32.mrb[88].mxu1  ;;  %v8504_v4 = vpop.f32.mrb[112].mxu0 }
0x1053   : > { %v8344_v46 = vadd.f32 %v8343_v22, %v14571_v24  ;;  %v8505_v27 = vadd.f32 %v8504_v4, %v14573_v54  ;;  %v8345_v17 = vpop.f32.mrb[89].mxu1  ;;  %v8506_v50 = vpop.f32.mrb[113].mxu0 }
0x1054   : > { %v8346_v21 = vadd.f32 %v8345_v17, %v14575_v7  ;;  %v8507_v25 = vadd.f32 %v8506_v50, %v14577_v34 }
0x1055   : > { %v8595_v41 = vmax.f32 %v8344_v46, 0.0  ;;  %v8597_v0 = vmax.f32 %v8505_v27, 0.0 }
0x1056   : > { %v8596_v53 = vmax.f32 %v8346_v21, 0.0  ;;  %v8598_v58 = vmax.f32 %v8507_v25, 0.0  ;;  %v8349_v36 = vpop.f32.mrb[90].mxu1  ;;  %v8510_v55 = vpop.f32.mrb[114].mxu0 }
0x1057   : > { %v8350_v59 = vadd.f32 %v8349_v36, %v14571_v24  ;;  %v8511_v52 = vadd.f32 %v8510_v55, %v14573_v54  ;;  %v8351_v16 = vpop.f32.mrb[91].mxu1  ;;  %v8512_v26 = vpop.f32.mrb[115].mxu0 }
0x1058   : > { %v8352_v37 = vadd.f32 %v8351_v16, %v14575_v7  ;;  %v8513_v12 = vadd.f32 %v8512_v26, %v14577_v34  ;;  %8796 = vmatprep.mubr.f32.mxu1 %v8596_v53  ;;  %8941 = vmatprep.mubr.f32.mxu0 %v8598_v58 }
0x1059   : > { %8797 = vmatmul.mubr.f32.gmra.mrb[120].mxu1 %v8595_v41  ;;  %8942 = vmatmul.mubr.f32.gmra.mrb[144].mxu0 %v8597_v0  ;;  %v8599_v18 = vmax.f32 %v8350_v59, 0.0  ;;  %v8601_v10 = vmax.f32 %v8511_v52, 0.0 }
0x105a   : > { %v8600_v42 = vmax.f32 %v8352_v37, 0.0  ;;  %v8602_v61 = vmax.f32 %v8513_v12, 0.0 }
0x105b   : > { %v8355_v48 = vpop.f32.mrb[92].mxu1  ;;  %v8516_v19 = vpop.f32.mrb[116].mxu0 }
0x105c   : > { %v8356_v23 = vadd.f32 %v8355_v48, %v14571_v24  ;;  %v8517_v49 = vadd.f32 %v8516_v19, %v14573_v54  ;;  %v8357_v51 = vpop.f32.mrb[93].mxu1  ;;  %v8518_v29 = vpop.f32.mrb[117].mxu0  ;;  %8801 = vmatprep.mubr.f32.mxu1 %v8600_v42  ;;  %8946 = vmatprep.mubr.f32.mxu0 %v8602_v61 }
0x105d   : > { %v8358_v1 = vadd.f32 %v8357_v51, %v14575_v7  ;;  %v8519_v5 = vadd.f32 %v8518_v29, %v14577_v34  ;;  %8802 = vmatmul.mubr.f32.gmra.mrb[122].mxu1 %v8599_v18  ;;  %8947 = vmatmul.mubr.f32.gmra.mrb[146].mxu0 %v8601_v10 }
0x105e   : > { %v8603_v30 = vmax.f32 %v8356_v23, 0.0  ;;  %v8605_v62 = vmax.f32 %v8517_v49, 0.0 }
0x105f   : > { %v8604_v3 = vmax.f32 %v8358_v1, 0.0  ;;  %v8606_v8 = vmax.f32 %v8519_v5, 0.0  ;;  %v8361_v38 = vpop.f32.mrb[94].mxu1  ;;  %v8522_v35 = vpop.f32.mrb[118].mxu0 }
0x1060   : > { %v8362_v40 = vadd.f32 %v8361_v38, %v14571_v24  ;;  %v8523_v47 = vadd.f32 %v8522_v35, %v14573_v54  ;;  %v8363_v20 = vpop.f32.mrb[95].mxu1  ;;  %v8524_v44 = vpop.f32.mrb[119].mxu0 }
0x1061   : > { %v8364_v11 = vadd.f32 %v8363_v20, %v14575_v7  ;;  %v8525_v28 = vadd.f32 %v8524_v44, %v14577_v34  ;;  %8806 = vmatprep.mubr.f32.mxu1 %v8604_v3  ;;  %8951 = vmatprep.mubr.f32.mxu0 %v8606_v8 }
0x1062   : > { %8807 = vmatmul.mubr.f32.gmra.mrb[124].mxu1 %v8603_v30  ;;  %8952 = vmatmul.mubr.f32.gmra.mrb[148].mxu0 %v8605_v62  ;;  %v8607_v17 = vmax.f32 %v8362_v40, 0.0  ;;  %v8609_v50 = vmax.f32 %v8523_v47, 0.0 }
0x1063   : > { %v8608_v22 = vmax.f32 %v8364_v11, 0.0  ;;  %v8610_v4 = vmax.f32 %v8525_v28, 0.0  ;;  %v8367_v46 = vpop.f32.mrb[96].mxu1  ;;  %v8528_v27 = vpop.f32.mrb[120].mxu0 }
0x1064   : > { %v8368_v21 = vadd.f32 %v8367_v46, %v14571_v24  ;;  %v8529_v25 = vadd.f32 %v8528_v27, %v14573_v54  ;;  %v8369_v53 = vpop.f32.mrb[97].mxu1  ;;  %v8530_v58 = vpop.f32.mrb[121].mxu0 }
0x1065   : > { %v8370_v36 = vadd.f32 %v8369_v53, %v14575_v7  ;;  %v8531_v55 = vadd.f32 %v8530_v58, %v14577_v34  ;;  %8811 = vmatprep.mubr.f32.mxu1 %v8608_v22  ;;  %8956 = vmatprep.mubr.f32.mxu0 %v8610_v4 }
0x1066   : > { %8812 = vmatmul.mubr.f32.gmra.mrb[126].mxu1 %v8607_v17  ;;  %8957 = vmatmul.mubr.f32.gmra.mrb[150].mxu0 %v8609_v50  ;;  %v8611_v16 = vmax.f32 %v8368_v21, 0.0  ;;  %v8613_v26 = vmax.f32 %v8529_v25, 0.0 }
0x1067   : > { %v8612_v41 = vmax.f32 %v8370_v36, 0.0  ;;  %v8614_v0 = vmax.f32 %v8531_v55, 0.0  ;;  %v8373_v59 = vpop.f32.mrb[98].mxu1  ;;  %v8534_v52 = vpop.f32.mrb[122].mxu0 }
0x1068   : > { %v8374_v37 = vadd.f32 %v8373_v59, %v14571_v24  ;;  %v8535_v12 = vadd.f32 %v8534_v52, %v14573_v54  ;;  %v8375_v42 = vpop.f32.mrb[99].mxu1  ;;  %v8536_v61 = vpop.f32.mrb[123].mxu0 }
0x1069   : > { %v8376_v18 = vadd.f32 %v8375_v42, %v14575_v7  ;;  %v8537_v10 = vadd.f32 %v8536_v61, %v14577_v34  ;;  %8816 = vmatprep.mubr.f32.mxu1 %v8612_v41  ;;  %8961 = vmatprep.mubr.f32.mxu0 %v8614_v0 }
0x106a   : > { %8817 = vmatmul.mubr.f32.gmra.mrb[128].mxu1 %v8611_v16  ;;  %8962 = vmatmul.mubr.f32.gmra.mrb[152].mxu0 %v8613_v26  ;;  %v8615_v51 = vmax.f32 %v8374_v37, 0.0  ;;  %v8617_v29 = vmax.f32 %v8535_v12, 0.0 }
0x106b   : > { %v8616_v48 = vmax.f32 %v8376_v18, 0.0  ;;  %v8618_v19 = vmax.f32 %v8537_v10, 0.0  ;;  %v8379_v23 = vpop.f32.mrb[100].mxu1  ;;  %v8540_v49 = vpop.f32.mrb[124].mxu0 }
0x106c   : > { %v8380_v1 = vadd.f32 %v8379_v23, %v14571_v24  ;;  %v8541_v5 = vadd.f32 %v8540_v49, %v14573_v54  ;;  %v8381_v3 = vpop.f32.mrb[101].mxu1  ;;  %v8542_v8 = vpop.f32.mrb[125].mxu0 }
0x106d   : > { %v8382_v38 = vadd.f32 %v8381_v3, %v14575_v7  ;;  %v8543_v35 = vadd.f32 %v8542_v8, %v14577_v34  ;;  %8821 = vmatprep.mubr.f32.mxu1 %v8616_v48  ;;  %8966 = vmatprep.mubr.f32.mxu0 %v8618_v19 }
0x106e   : > { %8822 = vmatmul.mubr.f32.gmra.mrb[130].mxu1 %v8615_v51  ;;  %8967 = vmatmul.mubr.f32.gmra.mrb[154].mxu0 %v8617_v29  ;;  %v8619_v20 = vmax.f32 %v8380_v1, 0.0  ;;  %v8621_v44 = vmax.f32 %v8541_v5, 0.0 }
0x106f   : > { %v8620_v30 = vmax.f32 %v8382_v38, 0.0  ;;  %v8622_v62 = vmax.f32 %v8543_v35, 0.0  ;;  %v8385_v40 = vpop.f32.mrb[102].mxu1  ;;  %v8546_v47 = vpop.f32.mrb[126].mxu0 }
0x1070   : > { %v8386_v11 = vadd.f32 %v8385_v40, %v14571_v24  ;;  %v8547_v28 = vadd.f32 %v8546_v47, %v14573_v54  ;;  %v8387_v22 = vpop.f32.mrb[103].mxu1  ;;  %v8548_v4 = vpop.f32.mrb[127].mxu0 }
0x1071   : > { %v8388_v46 = vadd.f32 %v8387_v22, %v14575_v7  ;;  %v8549_v27 = vadd.f32 %v8548_v4, %v14577_v34  ;;  %8826 = vmatprep.mubr.f32.mxu1 %v8620_v30  ;;  %8971 = vmatprep.mubr.f32.mxu0 %v8622_v62 }
0x1072   : > { %8827 = vmatmul.mubr.f32.gmra.mrb[132].mxu1 %v8619_v20  ;;  %8972 = vmatmul.mubr.f32.gmra.mrb[156].mxu0 %v8621_v44  ;;  %v8623_v53 = vmax.f32 %v8386_v11, 0.0  ;;  %v8625_v58 = vmax.f32 %v8547_v28, 0.0 }
0x1073   : > { %v8624_v17 = vmax.f32 %v8388_v46, 0.0  ;;  %v8626_v50 = vmax.f32 %v8549_v27, 0.0  ;;  %v8391_v21 = vpop.f32.mrb[104].mxu1  ;;  %v8552_v25 = vpop.f32.mrb[128].mxu0 }
0x1074   : > { %v8392_v36 = vadd.f32 %v8391_v21, %v14571_v24  ;;  %v8553_v55 = vadd.f32 %v8552_v25, %v14573_v54  ;;  %v8393_v41 = vpop.f32.mrb[105].mxu1  ;;  %v8554_v0 = vpop.f32.mrb[129].mxu0 }
0x1075   : > { %v8394_v59 = vadd.f32 %v8393_v41, %v14575_v7  ;;  %v8555_v52 = vadd.f32 %v8554_v0, %v14577_v34  ;;  %8831 = vmatprep.mubr.f32.mxu1 %v8624_v17  ;;  %8976 = vmatprep.mubr.f32.mxu0 %v8626_v50 }
0x1076   : > { %8832 = vmatmul.mubr.f32.gmra.mrb[134].mxu1 %v8623_v53  ;;  %8977 = vmatmul.mubr.f32.gmra.mrb[158].mxu0 %v8625_v58  ;;  %v8627_v42 = vmax.f32 %v8392_v36, 0.0  ;;  %v8629_v61 = vmax.f32 %v8553_v55, 0.0 }
0x1077   : > { %v8628_v16 = vmax.f32 %v8394_v59, 0.0  ;;  %v8630_v26 = vmax.f32 %v8555_v52, 0.0  ;;  %v8397_v37 = vpop.f32.mrb[106].mxu1  ;;  %v8558_v12 = vpop.f32.mrb[130].mxu0 }
0x1078   : > { %v8398_v18 = vadd.f32 %v8397_v37, %v14571_v24  ;;  %v8559_v10 = vadd.f32 %v8558_v12, %v14573_v54  ;;  %v8399_v48 = vpop.f32.mrb[107].mxu1  ;;  %v8560_v19 = vpop.f32.mrb[131].mxu0 }
0x1079   : > { %v8400_v23 = vadd.f32 %v8399_v48, %v14575_v7  ;;  %v8561_v49 = vadd.f32 %v8560_v19, %v14577_v34  ;;  %8836 = vmatprep.mubr.f32.mxu1 %v8628_v16  ;;  %8981 = vmatprep.mubr.f32.mxu0 %v8630_v26 }
0x107a   : > { %8837 = vmatmul.mubr.f32.gmra.mrb[136].mxu1 %v8627_v42  ;;  %8982 = vmatmul.mubr.f32.gmra.mrb[160].mxu0 %v8629_v61  ;;  %v8631_v3 = vmax.f32 %v8398_v18, 0.0  ;;  %v8633_v8 = vmax.f32 %v8559_v10, 0.0 }
0x107b   : > { %v8632_v51 = vmax.f32 %v8400_v23, 0.0  ;;  %v8634_v29 = vmax.f32 %v8561_v49, 0.0  ;;  %v8403_v1 = vpop.f32.mrb[108].mxu1  ;;  %v8564_v5 = vpop.f32.mrb[132].mxu0 }
0x107c   : > { %v8404_v38 = vadd.f32 %v8403_v1, %v14571_v24  ;;  %v8405_v35 = vpop.f32.mrb[109].mxu1  ;;  %v8566_v30 = vpop.f32.mrb[133].mxu0  ;;  %v8565_v42 = vadd.f32 %v8564_v5, %v14573_v54 }
0x107d   : > { %v8406_v62 = vadd.f32 %v8405_v35, %v14575_v7  ;;  %8841 = vmatprep.mubr.f32.mxu1 %v8632_v51  ;;  %8986 = vmatprep.mubr.f32.mxu0 %v8634_v29  ;;  %v8567_v26 = vadd.f32 %v8566_v30, %v14577_v34  ;;  %v14661_v30 = vld [vmem:[%s14958_s3] ss:$0 sm:$0xff] }
0x107e   : > { %8842 = vmatmul.mubr.f32.gmra.mrb[138].mxu1 %v8631_v3  ;;  %8987 = vmatmul.mubr.f32.gmra.mrb[162].mxu0 %v8633_v8  ;;  %v8635_v44 = vmax.f32 %v8404_v38, 0.0  ;;  %v8637_v48 = vmax.f32 %v8565_v42, 0.0 }
0x107f   : > { %v8636_v40 = vmax.f32 %v8406_v62, 0.0  ;;  %v8409_v47 = vpop.f32.mrb[110].mxu1  ;;  %v8570_v20 = vpop.f32.mrb[134].mxu0  ;;  %v8638_v18 = vmax.f32 %v8567_v26, 0.0 }
0x1080   : > { %v8410_v11 = vadd.f32 %v8409_v47, %v14571_v24  ;;  %v8411_v28 = vpop.f32.mrb[111].mxu1  ;;  %v8572_v22 = vpop.f32.mrb[135].mxu0 }
0x1081   : > { %v8412_v4 = vadd.f32 %v8411_v28, %v14575_v7  ;;  %8846 = vmatprep.mubr.f32.mxu1 %v8636_v40  ;;  %v8573_v10 = vadd.f32 %v8572_v22, %v14577_v34 }
0x1082   : > { %8847 = vmatmul.mubr.f32.gmra.mrb[140].mxu1 %v8635_v44  ;;  %v8639_v27 = vmax.f32 %v8410_v11, 0.0 }
0x1083   : > { %v8640_v46 = vmax.f32 %v8412_v4, 0.0  ;;  %v8642_v19 = vmax.f32 %v8573_v10, 0.0 }
0x1085   : > { %8851 = vmatprep.mubr.f32.mxu1 %v8640_v46 }
0x1086   : > { %8852 = vmatmul.mubr.f32.gmra.mrb[142].mxu1 %v8639_v27 }
0x10a6   : > { %v8415_v17 = vpop.f32.mrb[112].mxu1  ;;  %v8576_v50 = vpop.f32.mrb[136].mxu0 }
0x10a7   : > { %v8416_v21 = vadd.f32 %v8415_v17, %v14571_v24  ;;  %v8417_v25 = vpop.f32.mrb[113].mxu1  ;;  %v8578_v53 = vpop.f32.mrb[137].mxu0  ;;  %v8577_v49 = vadd.f32 %v8576_v50, %v14573_v54 }
0x10a8   : > { %v8418_v58 = vadd.f32 %v8417_v25, %v14575_v7  ;;  %v8579_v23 = vadd.f32 %v8578_v53, %v14577_v34 }
0x10a9   : > { %v8643_v0 = vmax.f32 %v8416_v21, 0.0  ;;  %v8645_v1 = vmax.f32 %v8577_v49, 0.0 }
0x10aa   : > { %v8644_v36 = vmax.f32 %v8418_v58, 0.0  ;;  %v8421_v55 = vpop.f32.mrb[114].mxu1  ;;  %v8582_v41 = vpop.f32.mrb[138].mxu0  ;;  %v8646_v51 = vmax.f32 %v8579_v23, 0.0 }
0x10ab   : > { %v8422_v59 = vadd.f32 %v8421_v55, %v14571_v24  ;;  %v8423_v52 = vpop.f32.mrb[115].mxu1  ;;  %v8584_v16 = vpop.f32.mrb[139].mxu0  ;;  %v8571_v24 = vadd.f32 %v8570_v20, %v14573_v54  ;;  %v8583_v5 = vadd.f32 %v8582_v41, %v14573_v54 }
0x10ac   : > { %v8424_v37 = vadd.f32 %v8423_v52, %v14575_v7  ;;  %8856 = vmatprep.mubr.f32.mxu1 %v8644_v36  ;;  %v8585_v29 = vadd.f32 %v8584_v16, %v14577_v34 }
0x10ad   : > { %8857 = vmatmul.mubr.f32.gmra.mrb[144].mxu1 %v8643_v0  ;;  %v8647_v61 = vmax.f32 %v8422_v59, 0.0  ;;  %v8641_v7 = vmax.f32 %v8571_v24, 0.0  ;;  %v8649_v8 = vmax.f32 %v8583_v5, 0.0 }
0x10ae   : > { %v8648_v12 = vmax.f32 %v8424_v37, 0.0  ;;  %v8650_v3 = vmax.f32 %v8585_v29, 0.0 }
0x10b0   : > { %8861 = vmatprep.mubr.f32.mxu1 %v8648_v12 }
0x10b1   : > { %8862 = vmatmul.mubr.f32.gmra.mrb[146].mxu1 %v8647_v61 }
0x10b2   : > { %8991 = vmatprep.mubr.f32.mxu1 %v8638_v18 }
0x10b5   : > { %8992 = vmatmul.mubr.f32.vlgmr.msra.gmra.mrb[148].mxu1 %v8637_v48 }
0x10b6   : > { %8996 = vmatprep.mubr.f32.mxu1 %v8642_v19 }
0x10b9   : > { %8997 = vmatmul.mubr.f32.gmra.mrb[150].mxu1 %v8641_v7 }
0x10ba   : > { %9001 = vmatprep.mubr.f32.mxu1 %v8646_v51 }
0x10bd   : > { %9002 = vmatmul.mubr.f32.gmra.mrb[152].mxu1 %v8645_v1 }
0x10be   : > { %9006 = vmatprep.mubr.f32.mxu1 %v8650_v3 }
0x10c1   : > { %9007 = vmatmul.mubr.f32.gmra.mrb[154].mxu1 %v8649_v8 }
0x10f4   : > { %v9748_v38 = vpop.f32.mrb[116].mxu1  ;;  %v9828_v35 = vpop.f32.mrb[140].mxu0 }
0x10f5   : > { %v9749_v62 = vpop.f32.mrb[117].mxu1  ;;  %v9829_v34 = vpop.f32.mrb[141].mxu0 }
0x10f6   : > { %v9750_v40 = vadd.f32 %v9749_v62, %v9748_v38  ;;  %v9830_v47 = vadd.f32 %v9829_v34, %v9828_v35 }
0x10f8   : > { %v8789_v20 = vadd.f32 %v9750_v40, %v14661_v30  ;;  %v9751_v54 = vpop.f32.mrb[118].mxu1  ;;  %v9831_v44 = vpop.f32.mrb[142].mxu0 }
0x10f9   : > { %v9752_v11 = vpop.f32.mrb[119].mxu1  ;;  %v9832_v28 = vpop.f32.mrb[143].mxu0 }
0x10fa   : > { %v8934_v22 = vadd.f32 %v9830_v47, %v8789_v20  ;;  %v9753_v4 = vadd.f32 %v9752_v11, %v9751_v54  ;;  %v9833_v46 = vadd.f32 %v9832_v28, %v9831_v44 }
0x10fc   : > { %v9012_v27 = vadd.f32 %v8934_v22, %v14273_v57  ;;  %v8794_v17 = vadd.f32 %v9753_v4, %v14661_v30 }
0x10fe   : > { %9028 = vst [vmem:[%s14668_s14] sm:$0xff] %v9012_v27  ;;  %v8939_v50 = vadd.f32 %v9833_v46, %v8794_v17 }
0x1100   : > { %v9013_v21 = vadd.f32 %v8939_v50, %v14270_v43 }
0x1102   : > { %9029 = vst [vmem:[%s14668_s14 + $0x8] sm:$0xff] %v9013_v21 }
0x112c   : > { %v9754_v25 = vpop.f32.mrb[120].mxu1  ;;  %v9834_v53 = vpop.f32.mrb[144].mxu0 }
0x112d   : > { %v9755_v58 = vpop.f32.mrb[121].mxu1  ;;  %v9835_v36 = vpop.f32.mrb[145].mxu0 }
0x112e   : > { %v9756_v55 = vadd.f32 %v9755_v58, %v9754_v25  ;;  %v9836_v41 = vadd.f32 %v9835_v36, %v9834_v53 }
0x1130   : > { %v8799_v57 = vadd.f32 %v9756_v55, %v14661_v30  ;;  %v9757_v0 = vpop.f32.mrb[122].mxu1  ;;  %v9837_v59 = vpop.f32.mrb[146].mxu0 }
0x1131   : > { %v9758_v52 = vpop.f32.mrb[123].mxu1  ;;  %v9838_v16 = vpop.f32.mrb[147].mxu0 }
0x1132   : > { %v8944_v26 = vadd.f32 %v9836_v41, %v8799_v57  ;;  %v9759_v37 = vadd.f32 %v9758_v52, %v9757_v0  ;;  %v9839_v12 = vadd.f32 %v9838_v16, %v9837_v59 }
0x1134   : > { %v9014_v43 = vadd.f32 %v8944_v26, %v14280_v56  ;;  %v8804_v42 = vadd.f32 %v9759_v37, %v14661_v30 }
0x1135   : > { %v9760_v61 = vpop.f32.mrb[124].mxu1  ;;  %v9840_v18 = vpop.f32.mrb[148].mxu0 }
0x1136   : > { %9030 = vst [vmem:[%s14668_s14 + $0x10] sm:$0xff] %v9014_v43  ;;  %v8949_v10 = vadd.f32 %v9839_v12, %v8804_v42  ;;  %v9761_v48 = vpop.f32.mrb[125].mxu1  ;;  %v9841_v24 = vpop.f32.mrb[149].mxu0 }
0x1137   : > { %v9762_v19 = vadd.f32 %v9761_v48, %v9760_v61  ;;  %v9842_v23 = vadd.f32 %v9841_v24, %v9840_v18 }
0x1138   : > { %v9015_v7 = vadd.f32 %v8949_v10, %v14284_v31 }
0x1139   : > { %v8809_v49 = vadd.f32 %v9762_v19, %v14661_v30  ;;  %v9763_v51 = vpop.f32.mrb[126].mxu1  ;;  %v9843_v29 = vpop.f32.mrb[150].mxu0 }
0x113a   : > { %9031 = vst [vmem:[%s14668_s14 + $0x18] sm:$0xff] %v9015_v7  ;;  %v9764_v1 = vpop.f32.mrb[127].mxu1  ;;  %v9844_v56 = vpop.f32.mrb[151].mxu0 }
0x113b   : > { %v8954_v5 = vadd.f32 %v9842_v23, %v8809_v49  ;;  %v9765_v3 = vadd.f32 %v9764_v1, %v9763_v51  ;;  %v9845_v8 = vadd.f32 %v9844_v56, %v9843_v29 }
0x113d   : > { %v9016_v38 = vadd.f32 %v8954_v5, %v14293_v9  ;;  %v8814_v35 = vadd.f32 %v9765_v3, %v14661_v30  ;;  %v9766_v62 = vpop.f32.mrb[128].mxu1  ;;  %v9846_v34 = vpop.f32.mrb[152].mxu0 }
0x113e   : > { %v9767_v40 = vpop.f32.mrb[129].mxu1  ;;  %v9847_v31 = vpop.f32.mrb[153].mxu0 }
0x113f   : > { %9032 = vst [vmem:[%s14668_s14 + $0x20] sm:$0xff] %v9016_v38  ;;  %v8959_v47 = vadd.f32 %v9845_v8, %v8814_v35  ;;  %v9768_v20 = vadd.f32 %v9767_v40, %v9766_v62  ;;  %v9848_v54 = vadd.f32 %v9847_v31, %v9846_v34 }
0x1141   : > { %v9017_v44 = vadd.f32 %v8959_v47, %v14290_v2  ;;  %v8819_v11 = vadd.f32 %v9768_v20, %v14661_v30  ;;  %v9769_v28 = vpop.f32.mrb[130].mxu1  ;;  %v9849_v22 = vpop.f32.mrb[154].mxu0 }
0x1142   : > { %v9770_v4 = vpop.f32.mrb[131].mxu1  ;;  %v9850_v9 = vpop.f32.mrb[155].mxu0 }
0x1143   : > { %9033 = vst [vmem:[%s14668_s14 + $0x28] sm:$0xff] %v9017_v44  ;;  %v8964_v46 = vadd.f32 %v9848_v54, %v8819_v11  ;;  %v9771_v27 = vadd.f32 %v9770_v4, %v9769_v28  ;;  %v9851_v17 = vadd.f32 %v9850_v9, %v9849_v22 }
0x1145   : > { %v9018_v50 = vadd.f32 %v8964_v46, %v14303_v13  ;;  %v8824_v21 = vadd.f32 %v9771_v27, %v14661_v30  ;;  %v9772_v25 = vpop.f32.mrb[132].mxu1  ;;  %v9852_v53 = vpop.f32.mrb[156].mxu0 }
0x1146   : > { %v9773_v58 = vpop.f32.mrb[133].mxu1  ;;  %v9853_v2 = vpop.f32.mrb[157].mxu0 }
0x1147   : > { %9034 = vst [vmem:[%s14668_s14 + $0x30] sm:$0xff] %v9018_v50  ;;  %v8969_v36 = vadd.f32 %v9851_v17, %v8824_v21  ;;  %v9774_v55 = vadd.f32 %v9773_v58, %v9772_v25  ;;  %v9854_v41 = vadd.f32 %v9853_v2, %v9852_v53 }
0x1149   : > { %v9019_v57 = vadd.f32 %v8969_v36, %v14300_v45  ;;  %v8829_v0 = vadd.f32 %v9774_v55, %v14661_v30  ;;  %v9775_v59 = vpop.f32.mrb[134].mxu1  ;;  %v9855_v52 = vpop.f32.mrb[158].mxu0 }
0x114a   : > { %v9776_v16 = vpop.f32.mrb[135].mxu1  ;;  %v9856_v13 = vpop.f32.mrb[159].mxu0 }
0x114b   : > { %9035 = vst [vmem:[%s14668_s14 + $0x38] sm:$0xff] %v9019_v57  ;;  %v8974_v26 = vadd.f32 %v9854_v41, %v8829_v0  ;;  %v9777_v37 = vadd.f32 %v9776_v16, %v9775_v59  ;;  %v9857_v12 = vadd.f32 %v9856_v13, %v9855_v52 }
0x114d   : > { %v9020_v43 = vadd.f32 %v8974_v26, %v14313_v60  ;;  %v8834_v42 = vadd.f32 %v9777_v37, %v14661_v30  ;;  %v9778_v61 = vpop.f32.mrb[136].mxu1  ;;  %v9858_v18 = vpop.f32.mrb[160].mxu0 }
0x114e   : > { %v9779_v10 = vpop.f32.mrb[137].mxu1  ;;  %v9859_v45 = vpop.f32.mrb[161].mxu0 }
0x114f   : > { %9036 = vst [vmem:[%s14668_s14 + $0x40] sm:$0xff] %v9020_v43  ;;  %v8979_v48 = vadd.f32 %v9857_v12, %v8834_v42  ;;  %v9780_v24 = vadd.f32 %v9779_v10, %v9778_v61  ;;  %v9860_v19 = vadd.f32 %v9859_v45, %v9858_v18 }
0x1151   : > { %v9021_v23 = vadd.f32 %v8979_v48, %v14310_v63  ;;  %v8839_v7 = vadd.f32 %v9780_v24, %v14661_v30  ;;  %v9781_v49 = vpop.f32.mrb[138].mxu1  ;;  %v9861_v51 = vpop.f32.mrb[162].mxu0 }
0x1152   : > { %v9782_v29 = vpop.f32.mrb[139].mxu1  ;;  %v9862_v60 = vpop.f32.mrb[163].mxu0 }
0x1153   : > { %9037 = vst [vmem:[%s14668_s14 + $0x48] sm:$0xff] %v9021_v23  ;;  %v8984_v1 = vadd.f32 %v9860_v19, %v8839_v7  ;;  %v9783_v56 = vadd.f32 %v9782_v29, %v9781_v49  ;;  %v9863_v5 = vadd.f32 %v9862_v60, %v9861_v51 }
0x1155   : > { %v9022_v3 = vadd.f32 %v8984_v1, %v14323_v33  ;;  %v8844_v8 = vadd.f32 %v9783_v56, %v14661_v30  ;;  %v9784_v38 = vpop.f32.mrb[140].mxu1 }
0x1156   : > { %v9785_v35 = vpop.f32.mrb[141].mxu1 }
0x1157   : > { %9038 = vst [vmem:[%s14668_s14 + $0x50] sm:$0xff] %v9022_v3  ;;  %v8989_v62 = vadd.f32 %v9863_v5, %v8844_v8  ;;  %v9786_v63 = vadd.f32 %v9785_v35, %v9784_v38 }
0x1159   : > { %v9023_v34 = vadd.f32 %v8989_v62, %v14320_v15  ;;  %v9787_v40 = vpop.f32.mrb[142].mxu1  ;;  %v8849_v9 = vadd.f32 %v9786_v63, %v14661_v30 }
0x115a   : > { %v9788_v31 = vpop.f32.mrb[143].mxu1 }
0x115b   : > { %9039 = vst [vmem:[%s14668_s14 + $0x58] sm:$0xff] %v9023_v34  ;;  %v9789_v47 = vadd.f32 %v9788_v31, %v9787_v40 }
0x115d   : > { %v8854_v50 = vadd.f32 %v9789_v47, %v14661_v30 }
0x1180   : > { %v9790_v20 = vpop.f32.mrb[144].mxu1 }
0x1181   : > { %v9791_v54 = vpop.f32.mrb[145].mxu1 }
0x1182   : > { %v9792_v44 = vadd.f32 %v9791_v54, %v9790_v20 }
0x1184   : > { %v9793_v11 = vpop.f32.mrb[146].mxu1  ;;  %v8859_v36 = vadd.f32 %v9792_v44, %v14661_v30 }
0x1185   : > { %v9794_v28 = vpop.f32.mrb[147].mxu1 }
0x1186   : > { %v9795_v33 = vadd.f32 %v9794_v28, %v9793_v11 }
0x1188   : > { %v9864_v22 = vpop.f32.mrb[148].mxu1  ;;  %v8864_v59 = vadd.f32 %v9795_v33, %v14661_v30 }
0x1189   : > { %v9865_v4 = vpop.f32.mrb[149].mxu1 }
0x118a   : > { %v9866_v46 = vadd.f32 %v9865_v4, %v9864_v22 }
0x118c   : > { %v8994_v27 = vadd.f32 %v9866_v46, %v8849_v9  ;;  %v9867_v17 = vpop.f32.mrb[150].mxu1 }
0x118d   : > { %v9868_v15 = vpop.f32.mrb[151].mxu1 }
0x118e   : > { %v9024_v21 = vadd.f32 %v8994_v27, %v14333_v32  ;;  %v9869_v25 = vadd.f32 %v9868_v15, %v9867_v17 }
0x1190   : > { %9040 = vst [vmem:[%s14668_s14 + $0x60] sm:$0xff] %v9024_v21  ;;  %v8999_v53 = vadd.f32 %v9869_v25, %v8854_v50  ;;  %v9870_v58 = vpop.f32.mrb[152].mxu1 }
0x1191   : > { %v9871_v2 = vpop.f32.mrb[153].mxu1 }
0x1192   : > { %v9025_v55 = vadd.f32 %v8999_v53, %v14330_v14  ;;  %v9872_v41 = vadd.f32 %v9871_v2, %v9870_v58 }
0x1194   : > { %9041 = vst [vmem:[%s14668_s14 + $0x68] sm:$0xff] %v9025_v55  ;;  %v9004_v57 = vadd.f32 %v9872_v41, %v8859_v36  ;;  %v9873_v0 = vpop.f32.mrb[154].mxu1 }
0x1195   : > { %v9874_v32 = vpop.f32.mrb[155].mxu1 }
0x1196   : > { %v9026_v52 = vadd.f32 %v9004_v57, %v14343_v39  ;;  %v9875_v16 = vadd.f32 %v9874_v32, %v9873_v0 }
0x1198   : > { %9042 = vst [vmem:[%s14668_s14 + $0x70] sm:$0xff] %v9026_v52  ;;  %v9009_v13 = vadd.f32 %v9875_v16, %v8864_v59 }
0x119a   : > { %v9027_v14 = vadd.f32 %v9009_v13, %v14340_v6 }
0x119c   : > { %9043 = vst [vmem:[%s14668_s14 + $0x78] sm:$0xff] %v9027_v14 }
0x119d   : > { %11946 = shalt.err (!%p11943_p13)
}
0x119e   : > { %s11947_s9 = scalar_lea.hbm %s14718_s28, 2048  ;;  %s11951_s14 = scalar_lea.hbm %s14959_s13, 4096 }
0x119f   : > { %p11948_p9 = scmp.ne.s32.totalorder %s14718_s28, %s11947_s9  ;;  %p11952_p4 = scmp.lt.u32.totalorder %s14718_s28, %s14959_s13 }
0x11a0   : > { %p11953_p8 = scmp.lt.u32.totalorder %s11951_s14, %s11947_s9  ;;  %p11955_p3 = scmp.lt.u32.totalorder %s11947_s9, %s14718_s28 }
0x11a1   : > { %p11949_p0 = pnand %p11948_p9, %p12254_p10 }
0x11a2   : > { %p11954_p6 = por %p11953_p8, %p11952_p4 }
0x11a3   : > { %p11950_p11 = pneg %p11949_p0 }
0x11a4   : > { %p11956_p5 = por %p11955_p3, %p11954_p6 }
0x11a6   : > { %p11957_p7 = pnand %p11956_p5, %p11950_p11 }
0x11a8   : > { %11960 = shalt.err (!%p11957_p7)
}
0x11a9   : > { %s12025_s18 = smov 128   ;;  %s12026_s27 = smov 8  }
0x11aa   : > { %11014 = dma.vmem_to_hbm [thread:$0]  (%p12254_p10), %s14720_s26, 2048, %s14718_s28, %s9045_s12, %s12025_s18, %s12025_s18, %s12026_s27  }
0x11ab PF: > { %s14960_s25 = sld [smem:[#allocation16_spill]]  ;;  %s14961_s29 = sld [smem:[#allocation17_spill]] }
0x11ac   : > { %p14963_p2 = scmp.ge.s32.totalorder %s12007_s24, 2 }
0x11b1   : > { %s9074_s11 = sand.u32 1, %s14960_s25   ;;  %p14962_p12 = scmp.ne.s32.totalorder %s14961_s29, 0 }
0x11b2   : > { %s9075_s9 = scalar_lea.sflag [#allocation4], %s9074_s11 }
0x11b3   : > { %p11034_p1 = pnand %p14963_p2, %p14962_p12 }
0x11b5   : > { %11990 = dma.done.wait (!%p11034_p1), %s9075_s9, 2048  }
0x11b6   : > { %11992 = vsyncadd (!%p11034_p1), %s9075_s9, 4294965248  ;;  %p27_p13 = scmp.ge.s32.totalorder %s12244_s30, 4   ;;  %s14964_s21 = smov %s11999_s22 }
0x11b7   : > { %s14965_s22 = smov %s12003_s23  ;;  %s14966_s23 = smov %s12260_s20 }
0x11b8   : > { %s14967_s24 = smov %s12244_s30  ;;  %29 = sbr.rel (!%p27_p13) target bundleno = 12 (0xc), region = 129 }
0x11bf   :  { %9080 = vsyncpa [#allocation3], 1 }
0x11c0   :  { %9082 = vsyncpa [#allocation3 + $0x1], 1 }
0x11c1   :  { %9083 = vsyncpa [#allocation6], 1 }
0x11c2   :  { %9084 = vsyncpa [#allocation9], 1 }
0x11c3   :  { %9085 = vsyncpa [#allocation4], 1 }
0x11c4   :  { %9087 = vsyncpa [#allocation4 + $0x1], 1 }

</bundles_post_ra>
